<compile_context>
chip_gen: v7x
topology: tpu7x:2x2x1
jax: 0.10.0
libtpu: 0.0.40
codegen_flags: <defaults>
</compile_context>

<pallas_src>
import functools

import jax
import jax.numpy as jnp
from jax.experimental import pallas as pl
from jax.experimental.pallas import tpu as pltpu

IN_DIM = 768
HID_DIM = 1000
HID_PAD = 1024     # 1000 rounded up to a full multiple of 128 lanes (exact padding)
OUT_DIM = 1


def _round_up(x, m):
    return ((x + m - 1) // m) * m


def _discriminator_kernel(xt_ref, w1t_ref, b1_ref, w2_ref, b2_ref, o_ref):
    """Fused Linear -> (Dropout=id) -> ReLU -> Linear for one lane-major batch tile.

    xt_ref : (768, bm)   bf16   activations, batch along lanes
    w1t_ref: (1024, 768) bf16   W1^T, zero-padded 1000->1024, VMEM-resident
    b1_ref : (1024, 1)   f32    b1 column
    w2_ref : (1, 1024)   bf16   w2 row, zero-padded
    b2_ref : (1, 1)      f32
    o_ref  : (1, bm)     f32    lane-dense output row
    """
    # First linear on the MXU: (1024, 768) @ (768, bm) -> (1024, bm), f32 accumulate.
    h = jnp.dot(w1t_ref[...], xt_ref[...], preferred_element_type=jnp.float32)
    # Bias + ReLU on the VPU (Dropout(p=0.1) in eval mode is the identity).
    h = jnp.maximum(h + b1_ref[...], jnp.float32(0.0))
    # Second linear (out_features=1): (1, 1024) @ (1024, bm) -> lane-dense (1, bm).
    out = jnp.dot(w2_ref[...], h.astype(jnp.bfloat16),
                  preferred_element_type=jnp.float32) + b2_ref[...]
    o_ref[...] = out.astype(o_ref.dtype)


def prepare_params(w1, b1, w2, b2):
    """One-time parameter prep (call at init, NOT per forward).

    Pads the hidden dim 1000 -> 1024 with zeros (numerically exact: ReLU(0+0)=0 and
    padded w2 entries are 0), transposes W1 for the lane-major layout, and casts the
    matmul operands to bf16.
    """
    assert w1.shape == (IN_DIM, HID_DIM)
    assert w2.shape == (HID_DIM, OUT_DIM)
    pad = HID_PAD - HID_DIM
    w1t = jnp.pad(w1, ((0, 0), (0, pad))).T.astype(jnp.bfloat16)            # (1024, 768)
    b1c = jnp.pad(b1.reshape(-1), (0, pad)).reshape(HID_PAD, 1)             # (1024, 1) f32
    b1c = b1c.astype(jnp.float32)
    w2r = jnp.pad(w2.reshape(-1), (0, pad)).reshape(1, HID_PAD)             # (1, 1024)
    w2r = w2r.astype(jnp.bfloat16)
    b2s = b2.reshape(1, OUT_DIM).astype(jnp.float32)                        # (1, 1)
    return w1t, b1c, w2r, b2s


@functools.partial(jax.jit, static_argnames=("block_m",))
def discriminator_clean_forward(x, w1t, b1c, w2r, b2s, *, block_m=512):
    """x: (B, 768); prepared params from prepare_params(). Returns (B, 1).

    Equivalent to relu(x @ w1 + b1) @ w2 + b2 (Dropout is eval-mode identity).
    """
    B, d_in = x.shape
    assert d_in == IN_DIM

    # Batch tile size along the lane axis.  Must be a multiple of 128 lanes unless it
    # covers the whole batch; prefer >= 2 grid steps so dimension_semantics=("parallel",)
    # can shard across v7x's two TensorCores (no effect on single-TC v5e/v6e).
    if B <= 128:
        bm = B
    else:
        bm = min(block_m, _round_up(pl.cdiv(B, 2), 128))
    grid_m = pl.cdiv(B, bm)

    # Lane-major activations: (768, B) bf16.  Layout plumbing in the wrapper so the
    # kernel's output block is lane-dense (unmasked stores); also halves x DMA.
    xt = x.T.astype(jnp.bfloat16)

    out_row = pl.pallas_call(
        _discriminator_kernel,
        out_shape=jax.ShapeDtypeStruct((1, grid_m * bm), jnp.float32),
        grid_spec=pltpu.PrefetchScalarGridSpec(
            num_scalar_prefetch=0,
            grid=(grid_m,),
            in_specs=[
                # batch tile of activations (lanes = batch)
                pl.BlockSpec((IN_DIM, bm), lambda i: (0, i)),
                # weights / biases: full arrays, resident across all grid steps
                pl.BlockSpec((HID_PAD, IN_DIM), lambda i: (0, 0)),
                pl.BlockSpec((HID_PAD, 1), lambda i: (0, 0)),
                pl.BlockSpec((1, HID_PAD), lambda i: (0, 0)),
                pl.BlockSpec((1, OUT_DIM), lambda i: (0, 0)),
            ],
            out_specs=pl.BlockSpec((1, bm), lambda i: (0, i)),
        ),
        compiler_params=pltpu.CompilerParams(
            dimension_semantics=("parallel",),
        ),
    )(xt, w1t, b1c, w2r, b2s)

    # Drop padded tail columns (rows beyond B) and restore the (B, 1) module output.
    return out_row[0, :B].reshape(B, OUT_DIM).astype(x.dtype)


def _init_params(key):
    """PyTorch nn.Linear default init: U[-1/sqrt(fan_in), 1/sqrt(fan_in)]."""
    k1, k2, k3, k4 = jax.random.split(key, 4)
    bound1 = 1.0 / jnp.sqrt(jnp.float32(IN_DIM))
    bound2 = 1.0 / jnp.sqrt(jnp.float32(HID_DIM))
    w1 = jax.random.uniform(k1, (IN_DIM, HID_DIM), jnp.float32, -bound1, bound1)
    b1 = jax.random.uniform(k2, (1, HID_DIM), jnp.float32, -bound1, bound1)
    w2 = jax.random.uniform(k3, (HID_DIM, OUT_DIM), jnp.float32, -bound2, bound2)
    b2 = jax.random.uniform(k4, (1, OUT_DIM), jnp.float32, -bound2, bound2)
    return w1, b1, w2, b2


if __name__ == "__main__":
    key = jax.random.PRNGKey(0)
    k_x, k_p = jax.random.split(key)

    B = 32  # small batch; feature dim is fixed at 768 by the module
    x = jax.random.normal(k_x, (B, IN_DIM), jnp.float32)
    w1, b1, w2, b2 = _init_params(k_p)

    # Parameter padding / transpose / bf16 cast done ONCE, outside the forward.
    w1t, b1c, w2r, b2s = prepare_params(w1, b1, w2, b2)

    out = discriminator_clean_forward(x, w1t, b1c, w2r, b2s)
    out = jax.block_until_ready(out)

    # Pure-JAX f32 reference of the same forward (dropout = identity in eval).
    ref = jnp.maximum(x @ w1 + b1, 0.0) @ w2 + b2
    assert out.shape == (B, OUT_DIM)
    # bf16 MXU inputs with f32 accumulation: ~1e-3 absolute error on O(0.3) outputs.
    assert jnp.allclose(out, ref, atol=2e-2, rtol=2e-2), float(jnp.max(jnp.abs(out - ref)))

    print("KERNEL_OK")
</pallas_src>

<mosaic_0001>
module attributes {stable_mosaic.version = 11 : i64} {
  func.func @_discriminator_kernel(%arg0: i32, %arg1: memref<768x32xbf16, #tpu.memory_space<vmem>>, %arg2: memref<1024x768xbf16, #tpu.memory_space<vmem>>, %arg3: memref<1024x1xf32, #tpu.memory_space<vmem>>, %arg4: memref<1x1024xbf16, #tpu.memory_space<vmem>>, %arg5: memref<1x1xf32, #tpu.memory_space<vmem>>, %arg6: memref<1x32xf32, #tpu.memory_space<vmem>>) attributes {dimension_semantics = [#tpu.dimension_semantics<parallel>], iteration_bounds = array<i64: 1>, scalar_prefetch = 0 : i64, scratch_operands = 0 : i64, tpu.core_type = #tpu.core_type<tc>, window_params = [{transform_indices = @transform_0, window_bounds = array<i64: 768, 32>}, {pipeline_mode = #tpu.pipeline_mode<synchronous>, transform_indices = @transform_1, window_bounds = array<i64: 1024, 768>}, {pipeline_mode = #tpu.pipeline_mode<synchronous>, transform_indices = @transform_2, window_bounds = array<i64: 1024, 1>}, {pipeline_mode = #tpu.pipeline_mode<synchronous>, transform_indices = @transform_3, window_bounds = array<i64: 1, 1024>}, {pipeline_mode = #tpu.pipeline_mode<synchronous>, transform_indices = @transform_4, window_bounds = array<i64: 1, 1>}, {transform_indices = @transform_5, window_bounds = array<i64: 1, 32>}]} {
    %c0 = arith.constant 0 : index
    %c0_0 = arith.constant 0 : index
    %0 = vector.load %arg2[%c0, %c0_0] : memref<1024x768xbf16, #tpu.memory_space<vmem>>, vector<1024x768xbf16>
    %c0_1 = arith.constant 0 : index
    %c0_2 = arith.constant 0 : index
    %1 = vector.load %arg1[%c0_1, %c0_2] : memref<768x32xbf16, #tpu.memory_space<vmem>>, vector<768x32xbf16>
    %cst = arith.constant dense<0.000000e+00> : vector<1024x32xf32>
    %2 = tpu.matmul %0, %1, %cst {dimension_numbers = #tpu.dot_dimension_numbers<[1], [0], [0], [1], [0, 0, 1, 1], [], []>} : vector<1024x768xbf16>, vector<768x32xbf16>, vector<1024x32xf32> -> vector<1024x32xf32>
    %c0_3 = arith.constant 0 : index
    %c0_4 = arith.constant 0 : index
    %3 = vector.load %arg3[%c0_3, %c0_4] : memref<1024x1xf32, #tpu.memory_space<vmem>>, vector<1024x1xf32>
    %4 = vector.broadcast %3 : vector<1024x1xf32> to vector<1024x32xf32>
    %5 = arith.addf %2, %4 : vector<1024x32xf32>
    %cst_5 = arith.constant 0.000000e+00 : f32
    %6 = vector.broadcast %cst_5 : f32 to vector<1024x32xf32>
    %7 = arith.maximumf %5, %6 : vector<1024x32xf32>
    %c0_6 = arith.constant 0 : index
    %c0_7 = arith.constant 0 : index
    %8 = vector.load %arg4[%c0_6, %c0_7] : memref<1x1024xbf16, #tpu.memory_space<vmem>>, vector<1x1024xbf16>
    %9 = arith.truncf %7 : vector<1024x32xf32> to vector<1024x32xbf16>
    %cst_8 = arith.constant dense<0.000000e+00> : vector<1x32xf32>
    %10 = tpu.matmul %8, %9, %cst_8 {dimension_numbers = #tpu.dot_dimension_numbers<[1], [0], [0], [1], [0, 0, 1, 1], [], []>} : vector<1x1024xbf16>, vector<1024x32xbf16>, vector<1x32xf32> -> vector<1x32xf32>
    %c0_9 = arith.constant 0 : index
    %c0_10 = arith.constant 0 : index
    %11 = vector.load %arg5[%c0_9, %c0_10] : memref<1x1xf32, #tpu.memory_space<vmem>>, vector<1x1xf32>
    %12 = vector.broadcast %11 : vector<1x1xf32> to vector<1x32xf32>
    %13 = arith.addf %10, %12 : vector<1x32xf32>
    %c0_11 = arith.constant 0 : index
    %c0_12 = arith.constant 0 : index
    %14 = vector.load %arg6[%c0_11, %c0_12] : memref<1x32xf32, #tpu.memory_space<vmem>>, vector<1x32xf32>
    tpu.vector_store %arg6[%c0_11, %c0_12], %13 {strides = array<i32>} : memref<1x32xf32, #tpu.memory_space<vmem>>, vector<1x32xf32>,
    return
  }
  func.func @transform_0(%arg0: i32) -> (i32, i32) {
    %c0_i32 = arith.constant 0 : i32
    %c0_i32_0 = arith.constant 0 : i32
    return %c0_i32, %arg0 : i32, i32
  }
  func.func @transform_1(%arg0: i32) -> (i32, i32) {
    %c0_i32 = arith.constant 0 : i32
    %c0_i32_0 = arith.constant 0 : i32
    %c0_i32_1 = arith.constant 0 : i32
    return %c0_i32, %c0_i32_0 : i32, i32
  }
  func.func @transform_2(%arg0: i32) -> (i32, i32) {
    %c0_i32 = arith.constant 0 : i32
    %c0_i32_0 = arith.constant 0 : i32
    %c0_i32_1 = arith.constant 0 : i32
    return %c0_i32, %c0_i32_0 : i32, i32
  }
  func.func @transform_3(%arg0: i32) -> (i32, i32) {
    %c0_i32 = arith.constant 0 : i32
    %c0_i32_0 = arith.constant 0 : i32
    %c0_i32_1 = arith.constant 0 : i32
    return %c0_i32, %c0_i32_0 : i32, i32
  }
  func.func @transform_4(%arg0: i32) -> (i32, i32) {
    %c0_i32 = arith.constant 0 : i32
    %c0_i32_0 = arith.constant 0 : i32
    %c0_i32_1 = arith.constant 0 : i32
    return %c0_i32, %c0_i32_0 : i32, i32
  }
  func.func @transform_5(%arg0: i32) -> (i32, i32) {
    %c0_i32 = arith.constant 0 : i32
    %c0_i32_0 = arith.constant 0 : i32
    return %c0_i32, %arg0 : i32, i32
  }
}

</mosaic_0001>

<bundles_post_ra>
// kernel: discriminator_clean_forward.1
= control target key start
LH: loop header
LB: loop body
LE: loop exit
PB: predicated region body
PF: predicated region fallthrough
CT: control target
= control target key end

     0   :  { %s8952_s0 = inlined_call_operand.vmem [shape: bf16[768,32], index: 0, kind: input, shape index: {}]   ;;  %s8953_s1 = inlined_call_operand.hbm [shape: bf16[1024,768], index: 1, kind: input, shape index: {}]   ;;  %s8954_s2 = inlined_call_operand.vmem [shape: f32[1024,1], index: 2, kind: input, shape index: {}]   ;;  %s8955_s3 = inlined_call_operand.hbm [shape: bf16[1,1024], index: 3, kind: input, shape index: {}]   ;;  %s8956_s4 = inlined_call_operand.<no memory space> [shape: f32[1,1], index: 4, kind: input, shape index: {}]   ;;  %s8957_s5 = inlined_call_operand.hbm [shape: f32[1,32], index: 5, kind: output, shape index: {}]  }
   0x1   :  { %v10_v0 = vstv %s8956_s4 }
   0x2   :  { %11 = vst [vmem:[#allocation2] sm:$0x1] %v10_v0 }
   0x3   :  { %12 = vsyncpa [#allocation4], 0 }
   0x4   :  { %13 = vsyncpa [#allocation7], 0 }
   0x5   :  { %14 = vsyncpa [#allocation5], 0  ;;  %s7350_s20 = smov [#allocation3]   ;;  %s7278_s24 = scalar_lea.hbm %s8953_s1, 49152 }
   0x6   :  { %s22_s21 = sshll.u32 %s7350_s20, 4  ;;  %p7279_p0 = scmp.ne.s32.totalorder %s8953_s1, %s7278_s24  ;;  %s23_s21 = int_to_ptr.vmem [resolvable:$true] %s22_s21 }
   0x7   :  { %p7282_p1 = scmp.lt.u32.totalorder %s7278_s24, %s8953_s1 }
   0x9   :  { %p7284_p2 = pnand %p7282_p1, %p7279_p0 }
   0xb   :  { %7287 = shalt.err (!%p7284_p2)
}
   0xc   :  { %s7288_s4 = scalar_lea.vmem %s23_s21, 49152  ;;  %p7293_p4 = scmp.lt.s32.totalorder %s23_s21, %s23_s21 }
   0xd   :  { %p7289_p3 = scmp.ne.s32.totalorder %s23_s21, %s7288_s4  ;;  %p7294_p5 = scmp.lt.s32.totalorder %s7288_s4, %s7288_s4 }
   0xf   :  { %p7295_p6 = por %p7294_p5, %p7293_p4 }
  0x11   :  { %p7296_p7 = pnand %p7295_p6, %p7289_p3 }
  0x13   :  { %7299 = shalt.err (!%p7296_p7)
}
  0x14   :  { %s7351_s29 = smov 384   ;;  %s7352_s30 = smov 24  }
  0x15   :  { %28 = dma.hbm_to_vmem [thread:$0]  %s8953_s1, 49152, %s23_s21, [#allocation4], %s7351_s29, %s7351_s29, %s7352_s30  }
  0x16   :  { %s7353_s8 = smov [#allocation6]   ;;  %s7300_s12 = scalar_lea.hbm %s8955_s3, 128 }
  0x17   :  { %s37_s9 = sshll.u32 %s7353_s8, 4  ;;  %p7301_p8 = scmp.ne.s32.totalorder %s8955_s3, %s7300_s12  ;;  %s38_s9 = int_to_ptr.vmem [resolvable:$true] %s37_s9 }
  0x18   :  { %p7304_p9 = scmp.lt.u32.totalorder %s7300_s12, %s8955_s3 }
  0x1a   :  { %p7306_p10 = pnand %p7304_p9, %p7301_p8 }
  0x1c   :  { %7309 = shalt.err (!%p7306_p10)
}
  0x1d   :  { %s7310_s17 = scalar_lea.vmem %s38_s9, 128  ;;  %p7315_p12 = scmp.lt.s32.totalorder %s38_s9, %s38_s9 }
  0x1e   :  { %p7311_p11 = scmp.ne.s32.totalorder %s38_s9, %s7310_s17  ;;  %p7316_p13 = scmp.lt.s32.totalorder %s7310_s17, %s7310_s17 }
  0x20   :  { %p7317_p0 = por %p7316_p13, %p7315_p12 }
  0x22   :  { %p7318_p1 = pnand %p7317_p0, %p7311_p11 }
  0x24   :  { %7321 = shalt.err (!%p7318_p1)
}
  0x25   :  { %40 = dma.hbm_to_vmem [thread:$0]  %s8955_s3, 128, %s38_s9, [#allocation7]  }
  0x26   :  { %7344 = dma.done.wait [#allocation4], 49152  }
  0x27   :  { %7345 = vsyncadd [#allocation4], 4294918144 }
  0x28   :  { %7346 = dma.done.wait [#allocation7], 128  }
  0x29   :  { %7347 = vsyncadd [#allocation7], 4294967168  ;;  %v7354_v1 = vmov 0   ;;  %v6653_v2 = vld [vmem:[%s8952_s0] sm:$0xff]   ;;  %v6655_v4 = vld [vmem:[%s8952_s0 + $0x8] sm:$0xff]   ;;  %vm5562_vm0 = vcmask 253952  }
  0x2a   :  { %3506 = vmatprep.subr.bf16.mxu1 %v7354_v1  ;;  %4051 = vmatprep.subr.bf16.mxu0 %v7354_v1  ;;  %v7424_v3 = vld [vmem:[%s8952_s0 + $0x80] sm:$0xff]   ;;  %v7434_v5 = vld [vmem:[%s8952_s0 + $0x88] sm:$0xff]   ;;  %v6657_v6 = vld [vmem:[%s8952_s0 + $0x10] sm:$0xff]  }
  0x2b   :  { %6651 = vset.pattern.permute.xlu0 %v7354_v1  ;;  %6652 = vset.pattern.permute.xlu1 %v7354_v1  ;;  %v7445_v7 = vld [vmem:[%s8952_s0 + $0x90] sm:$0xff]   ;;  %v6659_v8 = vld [vmem:[%s8952_s0 + $0x18] sm:$0xff]   ;;  %v6661_v10 = vld [vmem:[%s8952_s0 + $0x20] sm:$0xff]  }
  0x2c   :  { %3507 = vmatpush1.bf16.msra.mxu1 %v6653_v2  ;;  %4052 = vmatpush1.bf16.msra.mxu0 %v7424_v3  ;;  %v7456_v9 = vld [vmem:[%s8952_s0 + $0x98] sm:$0xff]   ;;  %v7467_v11 = vld [vmem:[%s8952_s0 + $0xa0] sm:$0xff]   ;;  %v6663_v12 = vld [vmem:[%s8952_s0 + $0x28] sm:$0xff]  }
  0x2d   :  { %3508 = vmatprep.subr.bf16.mxu1 %v7354_v1  ;;  %4053 = vmatprep.subr.bf16.mxu0 %v7354_v1  ;;  %v7478_v13 = vld [vmem:[%s8952_s0 + $0xa8] sm:$0xff]   ;;  %v6665_v14 = vld [vmem:[%s8952_s0 + $0x30] sm:$0xff]   ;;  %v6667_v16 = vld [vmem:[%s8952_s0 + $0x38] sm:$0xff]  }
  0x2e   :  { %v7489_v15 = vld [vmem:[%s8952_s0 + $0xb0] sm:$0xff]   ;;  %v7500_v17 = vld [vmem:[%s8952_s0 + $0xb8] sm:$0xff]   ;;  %v6669_v18 = vld [vmem:[%s8952_s0 + $0x40] sm:$0xff]  }
  0x2f   :  { %v7511_v19 = vld [vmem:[%s8952_s0 + $0xc0] sm:$0xff]   ;;  %v6671_v21 = vld [vmem:[%s8952_s0 + $0x48] sm:$0xff]   ;;  %v6673_v24 = vld [vmem:[%s8952_s0 + $0x50] sm:$0xff]  }
  0x30   :  { %3509 = vmatpush1.bf16.msra.mxu1 %v6655_v4  ;;  %4054 = vmatpush1.bf16.msra.mxu0 %v7434_v5  ;;  %v6687_v20 = vld [vmem:[#allocation3 + $0x4] ss:$24 sps:$4 sm:$0xff]   ;;  %v7533_v25 = vld [vmem:[%s8952_s0 + $0xd0] sm:$0xff]   ;;  %v6685_v36 = vld [vmem:[#allocation3] ss:$24 sps:$4 sm:$0xff]  }
  0x31   :  { %3510 = vmatprep.subr.bf16.mxu1 %v7354_v1  ;;  %4055 = vmatprep.subr.bf16.mxu0 %v7354_v1  ;;  %v6690_v22 = vld [vmem:[#allocation3 + $0xc] ss:$24 sps:$4 sm:$0xff]   ;;  %v6675_v26 = vld [vmem:[%s8952_s0 + $0x58] sm:$0xff]   ;;  %v6688_v37 = vld [vmem:[#allocation3 + $0x8] ss:$24 sps:$4 sm:$0xff]  }
  0x32   :  { %v7522_v23 = vld [vmem:[%s8952_s0 + $0xc8] sm:$0xff]   ;;  %3538 = vmatprep.mubr.bf16.mxu1 %v6687_v20  ;;  %4083 = vmatprep.mubr.bf16.mxu0 %v6690_v22  ;;  %v7544_v27 = vld [vmem:[%s8952_s0 + $0xd8] sm:$0xff]   ;;  %v6677_v28 = vld [vmem:[%s8952_s0 + $0x60] sm:$0xff]  }
  0x33   :  { %v7555_v29 = vld [vmem:[%s8952_s0 + $0xe0] sm:$0xff]   ;;  %v6679_v30 = vld [vmem:[%s8952_s0 + $0x68] sm:$0xff]   ;;  %v6681_v32 = vld [vmem:[%s8952_s0 + $0x70] sm:$0xff]  }
  0x34   :  { %3511 = vmatpush1.bf16.msra.mxu1 %v6657_v6  ;;  %4056 = vmatpush1.bf16.msra.mxu0 %v7445_v7  ;;  %v7566_v31 = vld [vmem:[%s8952_s0 + $0xe8] sm:$0xff]   ;;  %v7577_v33 = vld [vmem:[%s8952_s0 + $0xf0] sm:$0xff]   ;;  %v6683_v34 = vld [vmem:[%s8952_s0 + $0x78] sm:$0xff]  }
  0x35   :  { %3512 = vmatprep.subr.bf16.mxu1 %v7354_v1  ;;  %4057 = vmatprep.subr.bf16.mxu0 %v7354_v1  ;;  %v7588_v35 = vld [vmem:[%s8952_s0 + $0xf8] sm:$0xff]   ;;  %v6691_v38 = vld [vmem:[%s8952_s0 + $0x100] sm:$0xff]   ;;  %v6704_v41 = vld [vmem:[%s8952_s0 + $0x108] sm:$0xff]  }
  0x36   :  { %v6692_v39 = vld [vmem:[#allocation3 + $0x34] ss:$24 sps:$4 sm:$0xff]   ;;  %v6696_v42 = vld [vmem:[#allocation3 + $0x30] ss:$24 sps:$4 sm:$0xff]   ;;  %v6698_v44 = vld [vmem:[#allocation3 + $0x64] ss:$24 sps:$4 sm:$0xff]  }
  0x37   :  { %v6694_v40 = vld [vmem:[#allocation3 + $0x3c] ss:$24 sps:$4 sm:$0xff]   ;;  %v6697_v43 = vld [vmem:[#allocation3 + $0x38] ss:$24 sps:$4 sm:$0xff]   ;;  %v6700_v45 = vld [vmem:[#allocation3 + $0x6c] ss:$24 sps:$4 sm:$0xff]  }
  0x38   :  { %3513 = vmatpush1.bf16.msra.mxu1 %v6659_v8  ;;  %4058 = vmatpush1.bf16.msra.mxu0 %v7456_v9  ;;  %v6723_v46 = vld [vmem:[%s8952_s0 + $0x110] sm:$0xff]   ;;  %v6736_v47 = vld [vmem:[%s8952_s0 + $0x118] sm:$0xff]   ;;  %v6703_v49 = vld [vmem:[#allocation3 + $0x68] ss:$24 sps:$4 sm:$0xff]  }
  0x39   :  { %3514 = vmatprep.subr.bf16.mxu1 %v7354_v1  ;;  %4059 = vmatprep.subr.bf16.mxu0 %v7354_v1  ;;  %v6702_v48 = vld [vmem:[#allocation3 + $0x60] ss:$24 sps:$4 sm:$0xff]   ;;  %v6705_v50 = vld [vmem:[#allocation3 + $0x94] ss:$24 sps:$4 sm:$0xff]   ;;  %v6709_v54 = vld [vmem:[#allocation3 + $0x90] ss:$24 sps:$4 sm:$0xff]  }
  0x3a   :  { %v6707_v51 = vld [vmem:[#allocation3 + $0x9c] ss:$24 sps:$4 sm:$0xff]   ;;  %v6768_v53 = vld [vmem:[%s8952_s0 + $0x128] sm:$0xff]   ;;  %v6710_v55 = vld [vmem:[#allocation3 + $0x98] ss:$24 sps:$4 sm:$0xff]  }
  0x3b   :  { %v6753_v52 = vld [vmem:[%s8952_s0 + $0x120] sm:$0xff]   ;;  %v6781_v58 = vld [vmem:[%s8952_s0 + $0x130] sm:$0xff]   ;;  %v6800_v59 = vld [vmem:[%s8952_s0 + $0x138] sm:$0xff]  }
  0x3c   :  { %3515 = vmatpush1.bf16.msra.mxu1 %v6661_v10  ;;  %4060 = vmatpush1.bf16.msra.mxu0 %v7467_v11  ;;  %v6711_v56 = vld [vmem:[#allocation3 + $0xc4] ss:$24 sps:$4 sm:$0xff]   ;;  %v6715_v60 = vld [vmem:[#allocation3 + $0xc0] ss:$24 sps:$4 sm:$0xff]   ;;  %v6717_v62 = vld [vmem:[#allocation3 + $0xf4] ss:$24 sps:$4 sm:$0xff]  }
  0x3d   :  { %3516 = vmatprep.subr.bf16.mxu1 %v7354_v1  ;;  %4061 = vmatprep.subr.bf16.mxu0 %v7354_v1  ;;  %v6713_v57 = vld [vmem:[#allocation3 + $0xcc] ss:$24 sps:$4 sm:$0xff]   ;;  %v6716_v61 = vld [vmem:[#allocation3 + $0xc8] ss:$24 sps:$4 sm:$0xff]   ;;  %v6719_v63 = vld [vmem:[#allocation3 + $0xfc] ss:$24 sps:$4 sm:$0xff]  }
  0x3e   :  { %v6813_v0 = vld [vmem:[%s8952_s0 + $0x140] sm:$0xff]   ;;  %v6721_v2 = vld [vmem:[#allocation3 + $0xf0] ss:$24 sps:$4 sm:$0xff]   ;;  %v6730_v8 = vld [vmem:[#allocation3 + $0x154] ss:$24 sps:$4 sm:$0xff]  }
  0x3f   :  { %v6724_v4 = vld [vmem:[#allocation3 + $0x124] ss:$24 sps:$4 sm:$0xff]   ;;  %v6728_v6 = vld [vmem:[#allocation3 + $0x120] ss:$24 sps:$4 sm:$0xff]   ;;  %v532_v22 = vld [vmem:[%s8954_s2 + $0x10] sm:$0xff] }
  0x40   :  { %3517 = vmatpush1.bf16.msra.mxu1 %v6663_v12  ;;  %4062 = vmatpush1.bf16.msra.mxu0 %v7478_v13  ;;  %v6832_v10 = vld [vmem:[%s8952_s0 + $0x148] sm:$0xff]   ;;  %v6735_v12 = vld [vmem:[#allocation3 + $0x158] ss:$24 sps:$4 sm:$0xff]  }
  0x41   :  { %3518 = vmatprep.subr.bf16.mxu1 %v7354_v1  ;;  %4063 = vmatprep.subr.bf16.mxu0 %v7354_v1  ;;  %v531_v20 = vld [vmem:[%s8954_s2 + $0x8] sm:$0xff] }
  0x42   :  { %670 = vperm.xlu1 %6652, %v532_v22   ;;  %v550_v22 = vld [vmem:[%s8954_s2 + $0xa0] sm:$0xff] }
  0x44   :  { %3519 = vmatpush1.bf16.msra.mxu1 %v6665_v14  ;;  %4064 = vmatpush1.bf16.msra.mxu0 %v7489_v15  ;;  %v6739_v14 = vld [vmem:[#allocation3 + $0x18c] ss:$24 sps:$4 sm:$0xff]  }
  0x45   :  { %3520 = vmatprep.subr.bf16.mxu1 %v7354_v1  ;;  %4065 = vmatprep.subr.bf16.mxu0 %v7354_v1 }
  0x48   :  { %3521 = vmatpush1.bf16.msra.mxu1 %v6667_v16  ;;  %4066 = vmatpush1.bf16.msra.mxu0 %v7500_v17  ;;  %v6741_v16 = vld [vmem:[#allocation3 + $0x180] ss:$24 sps:$4 sm:$0xff]  }
  0x49   :  { %3522 = vmatprep.subr.bf16.mxu1 %v7354_v1  ;;  %4067 = vmatprep.subr.bf16.mxu0 %v7354_v1 }
  0x4c   :  { %3523 = vmatpush1.bf16.msra.mxu1 %v6669_v18  ;;  %4068 = vmatpush1.bf16.msra.mxu0 %v7511_v19  ;;  %v6743_v18 = vld [vmem:[#allocation3 + $0x1b4] ss:$24 sps:$4 sm:$0xff]  }
  0x4d   :  { %3524 = vmatprep.subr.bf16.mxu1 %v7354_v1  ;;  %4069 = vmatprep.subr.bf16.mxu0 %v7354_v1 }
  0x50   :  { %3525 = vmatpush1.bf16.msra.mxu1 %v6671_v21  ;;  %4070 = vmatpush1.bf16.msra.mxu0 %v7522_v23  ;;  %v6845_v21 = vld [vmem:[%s8952_s0 + $0x150] sm:$0xff]  }
  0x51   :  { %3526 = vmatprep.subr.bf16.mxu1 %v7354_v1  ;;  %4071 = vmatprep.subr.bf16.mxu0 %v7354_v1 }
  0x54   :  { %3527 = vmatpush1.bf16.msra.mxu1 %v6673_v24  ;;  %4072 = vmatpush1.bf16.msra.mxu0 %v7533_v25  ;;  %v6748_v24 = vld [vmem:[#allocation3 + $0x1b8] ss:$24 sps:$4 sm:$0xff]  }
  0x55   :  { %3528 = vmatprep.subr.bf16.mxu1 %v7354_v1  ;;  %4073 = vmatprep.subr.bf16.mxu0 %v7354_v1 }
  0x58   :  { %3529 = vmatpush1.bf16.msra.mxu1 %v6675_v26  ;;  %4074 = vmatpush1.bf16.msra.mxu0 %v7544_v27  ;;  %v6751_v26 = vld [vmem:[#allocation3 + $0x1ec] ss:$24 sps:$4 sm:$0xff]  }
  0x59   :  { %3530 = vmatprep.subr.bf16.mxu1 %v7354_v1  ;;  %4075 = vmatprep.subr.bf16.mxu0 %v7354_v1 }
  0x5c   :  { %3531 = vmatpush1.bf16.msra.mxu1 %v6677_v28  ;;  %4076 = vmatpush1.bf16.msra.mxu0 %v7555_v29  ;;  %v6754_v28 = vld [vmem:[#allocation3 + $0x1e0] ss:$24 sps:$4 sm:$0xff]  }
  0x5d   :  { %3532 = vmatprep.subr.bf16.mxu1 %v7354_v1  ;;  %4077 = vmatprep.subr.bf16.mxu0 %v7354_v1 }
  0x60   :  { %3533 = vmatpush1.bf16.msra.mxu1 %v6679_v30  ;;  %4078 = vmatpush1.bf16.msra.mxu0 %v7566_v31  ;;  %v6756_v30 = vld [vmem:[#allocation3 + $0x214] ss:$24 sps:$4 sm:$0xff]  }
  0x61   :  { %3534 = vmatprep.subr.bf16.mxu1 %v7354_v1  ;;  %4079 = vmatprep.subr.bf16.mxu0 %v7354_v1 }
  0x64   :  { %3535 = vmatpush1.bf16.msra.mxu1 %v6681_v32  ;;  %4080 = vmatpush1.bf16.msra.mxu0 %v7577_v33  ;;  %v535_v32 = vld [vmem:[%s8954_s2 + $0x28] sm:$0xff] }
  0x65   :  { %3536 = vmatprep.subr.bf16.mxu1 %v7354_v1  ;;  %4081 = vmatprep.subr.bf16.mxu0 %v7354_v1 }
  0x68   :  { %3537 = vmatpush1.bf16.msra.mxu1 %v6683_v34  ;;  %4082 = vmatpush1.bf16.msra.mxu0 %v7588_v35  ;;  %v6760_v34 = vld [vmem:[#allocation3 + $0x210] ss:$24 sps:$4 sm:$0xff]  }
  0x69   :  { %6100 = vmatprep.subr.bf16.mxu1 %v7354_v1  ;;  %4596 = vmatprep.subr.bf16.mxu0 %v7354_v1 }
  0x6b   :  { %3539 = vmatmul.mubr.bf16.vlgmr.msra.gmra.mrb[0].mxu1 %v6685_v36  ;;  %4084 = vmatmul.mubr.bf16.vlgmr.msra.gmra.mrb[0].mxu0 %v6688_v37  ;;  %v6762_v36 = vld [vmem:[#allocation3 + $0x244] ss:$24 sps:$4 sm:$0xff]  }
  0x6c   :  { %3546 = vmatprep.mubr.bf16.mxu1 %v6692_v39  ;;  %4597 = vmatpush1.bf16.msra.mxu0 %v6691_v38  ;;  %v6764_v37 = vld [vmem:[#allocation3 + $0x24c] ss:$24 sps:$4 sm:$0xff]   ;;  %v6864_v38 = vld [vmem:[%s8952_s0 + $0x158] sm:$0xff]  }
  0x6d   :  { %4091 = vmatprep.mubr.bf16.mxu0 %v6694_v40  ;;  %4598 = vmatprep.subr.bf16.mxu0 %v7354_v1  ;;  %v537_v39 = vld [vmem:[%s8954_s2 + $0x38] sm:$0xff]  ;;  %v536_v40 = vld [vmem:[%s8954_s2 + $0x30] sm:$0xff] }
  0x6e   :  { %6116 = vmatpush1.bf16.msra.mxu1 %v7424_v3  ;;  %v6722_v3 = vld [vmem:[#allocation3 + $0xf8] ss:$24 sps:$4 sm:$0xff]  }
  0x6f   :  { %6101 = vmatprep.subr.bf16.mxu1 %v7354_v1 }
  0x70   :  { %4599 = vmatpush1.bf16.msra.mxu0 %v6704_v41  ;;  %v6766_v41 = vld [vmem:[#allocation3 + $0x240] ss:$24 sps:$4 sm:$0xff]  }
  0x71   :  { %4600 = vmatprep.subr.bf16.mxu0 %v7354_v1 }
  0x72   :  { %6117 = vmatpush1.bf16.msra.mxu1 %v7434_v5  ;;  %v6726_v5 = vld [vmem:[#allocation3 + $0x12c] ss:$24 sps:$4 sm:$0xff]  }
  0x73   :  { %3547 = vmatmul.mubr.bf16.gmra.mrb[4].mxu1 %v6696_v42  ;;  %6102 = vmatprep.subr.bf16.mxu1 %v7354_v1  ;;  %v6767_v42 = vld [vmem:[#allocation3 + $0x248] ss:$24 sps:$4 sm:$0xff]  }
  0x74   :  { %4092 = vmatmul.mubr.bf16.gmra.mrb[4].mxu0 %v6697_v43  ;;  %3554 = vmatprep.mubr.bf16.mxu1 %v6698_v44  ;;  %v6769_v43 = vld [vmem:[#allocation3 + $0x274] ss:$24 sps:$4 sm:$0xff]  }
  0x75   :  { %4099 = vmatprep.mubr.bf16.mxu0 %v6700_v45  ;;  %4601 = vmatpush1.bf16.msra.mxu0 %v6723_v46  ;;  %v6771_v44 = vld [vmem:[#allocation3 + $0x27c] ss:$24 sps:$4 sm:$0xff]   ;;  %v539_v45 = vld [vmem:[%s8954_s2 + $0x48] sm:$0xff] }
  0x76   :  { %4602 = vmatprep.subr.bf16.mxu0 %v7354_v1  ;;  %6118 = vmatpush1.bf16.msra.mxu1 %v7445_v7  ;;  %v6729_v7 = vld [vmem:[#allocation3 + $0x128] ss:$24 sps:$4 sm:$0xff]  }
  0x77   :  { %6103 = vmatprep.subr.bf16.mxu1 %v7354_v1  ;;  %v538_v46 = vld [vmem:[%s8954_s2 + $0x40] sm:$0xff] }
  0x79   :  { %4603 = vmatpush1.bf16.msra.mxu0 %v6736_v47  ;;  %v6773_v47 = vld [vmem:[#allocation3 + $0x270] ss:$24 sps:$4 sm:$0xff]  }
  0x7a   :  { %4604 = vmatprep.subr.bf16.mxu0 %v7354_v1  ;;  %6119 = vmatpush1.bf16.msra.mxu1 %v7456_v9  ;;  %v6732_v9 = vld [vmem:[#allocation3 + $0x15c] ss:$24 sps:$4 sm:$0xff]  }
  0x7b   :  { %3555 = vmatmul.mubr.bf16.gmra.mrb[8].mxu1 %v6702_v48  ;;  %6104 = vmatprep.subr.bf16.mxu1 %v7354_v1  ;;  %v6774_v48 = vld [vmem:[#allocation3 + $0x278] ss:$24 sps:$4 sm:$0xff]  }
  0x7c   :  { %4100 = vmatmul.mubr.bf16.gmra.mrb[8].mxu0 %v6703_v49  ;;  %3562 = vmatprep.mubr.bf16.mxu1 %v6705_v50  ;;  %v6775_v49 = vld [vmem:[#allocation3 + $0x2a4] ss:$24 sps:$4 sm:$0xff]  }
  0x7d   :  { %4107 = vmatprep.mubr.bf16.mxu0 %v6707_v51  ;;  %4605 = vmatpush1.bf16.msra.mxu0 %v6753_v52  ;;  %v6777_v50 = vld [vmem:[#allocation3 + $0x2ac] ss:$24 sps:$4 sm:$0xff]   ;;  %v541_v51 = vld [vmem:[%s8954_s2 + $0x58] sm:$0xff] }
  0x7e   :  { %4606 = vmatprep.subr.bf16.mxu0 %v7354_v1  ;;  %6120 = vmatpush1.bf16.msra.mxu1 %v7467_v11  ;;  %v6734_v11 = vld [vmem:[#allocation3 + $0x150] ss:$24 sps:$4 sm:$0xff]  }
  0x7f   :  { %6105 = vmatprep.subr.bf16.mxu1 %v7354_v1  ;;  %v540_v52 = vld [vmem:[%s8954_s2 + $0x50] sm:$0xff] }
  0x81   :  { %4607 = vmatpush1.bf16.msra.mxu0 %v6768_v53  ;;  %v6877_v53 = vld [vmem:[%s8952_s0 + $0x160] sm:$0xff]  }
  0x82   :  { %4608 = vmatprep.subr.bf16.mxu0 %v7354_v1  ;;  %6121 = vmatpush1.bf16.msra.mxu1 %v7478_v13  ;;  %v6737_v13 = vld [vmem:[#allocation3 + $0x184] ss:$24 sps:$4 sm:$0xff]  }
  0x83   :  { %3563 = vmatmul.mubr.bf16.gmra.mrb[12].mxu1 %v6709_v54  ;;  %6106 = vmatprep.subr.bf16.mxu1 %v7354_v1  ;;  %v6779_v54 = vld [vmem:[#allocation3 + $0x2a0] ss:$24 sps:$4 sm:$0xff]  }
  0x84   :  { %4108 = vmatmul.mubr.bf16.gmra.mrb[12].mxu0 %v6710_v55  ;;  %3570 = vmatprep.mubr.bf16.mxu1 %v6711_v56  ;;  %v6780_v55 = vld [vmem:[#allocation3 + $0x2a8] ss:$24 sps:$4 sm:$0xff]   ;;  %v6782_v56 = vld [vmem:[#allocation3 + $0x2d4] ss:$24 sps:$4 sm:$0xff]  }
  0x85   :  { %4115 = vmatprep.mubr.bf16.mxu0 %v6713_v57  ;;  %4609 = vmatpush1.bf16.msra.mxu0 %v6781_v58  ;;  %v6784_v57 = vld [vmem:[#allocation3 + $0x2dc] ss:$24 sps:$4 sm:$0xff]   ;;  %v543_v58 = vld [vmem:[%s8954_s2 + $0x68] sm:$0xff] }
  0x86   :  { %4610 = vmatprep.subr.bf16.mxu0 %v7354_v1  ;;  %6122 = vmatpush1.bf16.msra.mxu1 %v7489_v15  ;;  %v530_v15 = vld [vmem:[%s8954_s2] sm:$0xff] }
  0x87   :  { %6107 = vmatprep.subr.bf16.mxu1 %v7354_v1  ;;  %660 = vperm.xlu0 %6651, %v530_v15   ;;  %v548_v15 = vld [vmem:[%s8954_s2 + $0x90] sm:$0xff] }
  0x89   :  { %4611 = vmatpush1.bf16.msra.mxu0 %v6800_v59  ;;  %v542_v59 = vld [vmem:[%s8954_s2 + $0x60] sm:$0xff] }
  0x8a   :  { %4612 = vmatprep.subr.bf16.mxu0 %v7354_v1  ;;  %6123 = vmatpush1.bf16.msra.mxu1 %v7500_v17  ;;  %v6742_v17 = vld [vmem:[#allocation3 + $0x188] ss:$24 sps:$4 sm:$0xff]  }
  0x8b   :  { %3571 = vmatmul.mubr.bf16.gmra.mrb[16].mxu1 %v6715_v60  ;;  %6108 = vmatprep.subr.bf16.mxu1 %v7354_v1  ;;  %v6786_v60 = vld [vmem:[#allocation3 + $0x2d0] ss:$24 sps:$4 sm:$0xff]  }
  0x8c   :  { %4116 = vmatmul.mubr.bf16.gmra.mrb[16].mxu0 %v6716_v61  ;;  %3578 = vmatprep.mubr.bf16.mxu1 %v6717_v62  ;;  %v6787_v61 = vld [vmem:[#allocation3 + $0x2d8] ss:$24 sps:$4 sm:$0xff]   ;;  %v6788_v62 = vld [vmem:[#allocation3 + $0x304] ss:$24 sps:$4 sm:$0xff]  }
  0x8d   :  { %4123 = vmatprep.mubr.bf16.mxu0 %v6719_v63  ;;  %4613 = vmatpush1.bf16.msra.mxu0 %v6813_v0  ;;  %v6790_v63 = vld [vmem:[#allocation3 + $0x30c] ss:$24 sps:$4 sm:$0xff]   ;;  %v545_v0 = vld [vmem:[%s8954_s2 + $0x78] sm:$0xff] }
  0x8e   :  { %4614 = vmatprep.subr.bf16.mxu0 %v7354_v1  ;;  %6124 = vmatpush1.bf16.msra.mxu1 %v7511_v19  ;;  %v6745_v19 = vld [vmem:[#allocation3 + $0x1bc] ss:$24 sps:$4 sm:$0xff]  }
  0x8f   :  { %6109 = vmatprep.subr.bf16.mxu1 %v7354_v1  ;;  %665 = vperm.xlu0 %6651, %v531_v20   ;;  %v6909_v20 = vld [vmem:[%s8952_s0 + $0x170] sm:$0xff]  }
  0x91   :  { %4615 = vmatpush1.bf16.msra.mxu0 %v6832_v10  ;;  %v6798_v10 = vld [vmem:[#allocation3 + $0x330] ss:$24 sps:$4 sm:$0xff]  }
  0x92   :  { %6125 = vmatpush1.bf16.msra.mxu1 %v7522_v23  ;;  %4616 = vmatprep.subr.bf16.mxu0 %v7354_v1  ;;  %v6747_v23 = vld [vmem:[#allocation3 + $0x1b0] ss:$24 sps:$4 sm:$0xff]  }
  0x93   :  { %3579 = vmatmul.mubr.bf16.gmra.mrb[20].mxu1 %v6721_v2  ;;  %6110 = vmatprep.subr.bf16.mxu1 %v7354_v1  ;;  %v544_v2 = vld [vmem:[%s8954_s2 + $0x70] sm:$0xff] }
  0x94   :  { %4124 = vmatmul.mubr.bf16.gmra.mrb[20].mxu0 %v6722_v3  ;;  %3586 = vmatprep.mubr.bf16.mxu1 %v6724_v4  ;;  %v6792_v3 = vld [vmem:[#allocation3 + $0x300] ss:$24 sps:$4 sm:$0xff]   ;;  %v6894_v4 = vld [vmem:[%s8952_s0 + $0x168] sm:$0xff]  }
  0x95   :  { %4131 = vmatprep.mubr.bf16.mxu0 %v6726_v5  ;;  %4617 = vmatpush1.bf16.msra.mxu0 %v6845_v21  ;;  %v6793_v5 = vld [vmem:[#allocation3 + $0x308] ss:$24 sps:$4 sm:$0xff]  }
  0x96   :  { %6126 = vmatpush1.bf16.msra.mxu1 %v7533_v25  ;;  %v6749_v25 = vld [vmem:[#allocation3 + $0x1e4] ss:$24 sps:$4 sm:$0xff]   ;;  %4618 = vmatprep.subr.bf16.mxu0 %v7354_v1 }
  0x97   :  { %6111 = vmatprep.subr.bf16.mxu1 %v7354_v1  ;;  %v551_v21 = vld [vmem:[%s8954_s2 + $0xa8] sm:$0xff] }
  0x99   :  { %4619 = vmatpush1.bf16.msra.mxu0 %v6864_v38  ;;  %v6828_v38 = vld [vmem:[#allocation3 + $0x42c] ss:$24 sps:$4 sm:$0xff]  }
  0x9a   :  { %6127 = vmatpush1.bf16.msra.mxu1 %v7544_v27  ;;  %v533_v27 = vld [vmem:[%s8954_s2 + $0x18] sm:$0xff]  ;;  %4620 = vmatprep.subr.bf16.mxu0 %v7354_v1 }
  0x9b   :  { %3587 = vmatmul.mubr.bf16.gmra.mrb[24].mxu1 %v6728_v6  ;;  %6112 = vmatprep.subr.bf16.mxu1 %v7354_v1  ;;  %v6794_v6 = vld [vmem:[#allocation3 + $0x334] ss:$24 sps:$4 sm:$0xff]  }
  0x9c   :  { %4132 = vmatmul.mubr.bf16.gmra.mrb[24].mxu0 %v6729_v7  ;;  %3594 = vmatprep.mubr.bf16.mxu1 %v6730_v8  ;;  %v6796_v7 = vld [vmem:[#allocation3 + $0x33c] ss:$24 sps:$4 sm:$0xff]   ;;  %v547_v8 = vld [vmem:[%s8954_s2 + $0x88] sm:$0xff] }
  0x9d   :  { %4139 = vmatprep.mubr.bf16.mxu0 %v6732_v9  ;;  %675 = vperm.xlu1 %6652, %v533_v27   ;;  %v546_v9 = vld [vmem:[%s8954_s2 + $0x80] sm:$0xff]  ;;  %v553_v27 = vld [vmem:[%s8954_s2 + $0xb8] sm:$0xff] }
  0x9e   :  { %6128 = vmatpush1.bf16.msra.mxu1 %v7555_v29  ;;  %v6755_v29 = vld [vmem:[#allocation3 + $0x1e8] ss:$24 sps:$4 sm:$0xff]   ;;  %4621 = vmatpush1.bf16.msra.mxu0 %v6877_v53 }
  0x9f   :  { %6113 = vmatprep.subr.bf16.mxu1 %v7354_v1  ;;  %4622 = vmatprep.subr.bf16.mxu0 %v7354_v1  ;;  %v578_v53 = vld [vmem:[%s8954_s2 + $0x180] sm:$0xff] }
  0xa1   :  { %685 = vperm.xlu1 %6652, %v535_v32   ;;  %v6822_v32 = vld [vmem:[#allocation3 + $0x3fc] ss:$24 sps:$4 sm:$0xff]  }
  0xa2   :  { %6129 = vmatpush1.bf16.msra.mxu1 %v7566_v31  ;;  %v6758_v31 = vld [vmem:[#allocation3 + $0x21c] ss:$24 sps:$4 sm:$0xff]   ;;  %4623 = vmatpush1.bf16.msra.mxu0 %v6894_v4 }
  0xa3   :  { %3595 = vmatmul.mubr.bf16.gmra.mrb[28].mxu1 %v6734_v11  ;;  %6114 = vmatprep.subr.bf16.mxu1 %v7354_v1  ;;  %v6799_v11 = vld [vmem:[#allocation3 + $0x338] ss:$24 sps:$4 sm:$0xff]  }
  0xa4   :  { %4140 = vmatmul.mubr.bf16.gmra.mrb[28].mxu0 %v6735_v12  ;;  %3602 = vmatprep.mubr.bf16.mxu1 %v6737_v13  ;;  %v6801_v12 = vld [vmem:[#allocation3 + $0x364] ss:$24 sps:$4 sm:$0xff]  }
  0xa5   :  { %4147 = vmatprep.mubr.bf16.mxu0 %v6739_v14  ;;  %695 = vperm.xlu1 %6652, %v537_v39   ;;  %v6803_v13 = vld [vmem:[#allocation3 + $0x36c] ss:$24 sps:$4 sm:$0xff]   ;;  %v549_v14 = vld [vmem:[%s8954_s2 + $0x98] sm:$0xff] }
  0xa6   :  { %6130 = vmatpush1.bf16.msra.mxu1 %v7577_v33  ;;  %v534_v33 = vld [vmem:[%s8954_s2 + $0x20] sm:$0xff]  ;;  %4624 = vmatprep.subr.bf16.mxu0 %v7354_v1  ;;  %v557_v39 = vld [vmem:[%s8954_s2 + $0xd8] sm:$0xff] }
  0xa7   :  { %6115 = vmatprep.subr.bf16.mxu1 %v7354_v1  ;;  %680 = vperm.xlu0 %6651, %v534_v33   ;;  %v554_v33 = vld [vmem:[%s8954_s2 + $0xc0] sm:$0xff]  ;;  %v565_v4 = vld [vmem:[%s8954_s2 + $0x118] sm:$0xff] }
  0xa8   :  { %4625 = vmatpush1.bf16.msra.mxu0 %v6909_v20  ;;  %v6865_v20 = vld [vmem:[#allocation3 + $0x544] ss:$24 sps:$4 sm:$0xff]  }
  0xa9   :  { %705 = vperm.xlu1 %6652, %v539_v45   ;;  %4626 = vmatprep.subr.bf16.mxu0 %v7354_v1  ;;  %v555_v1 = vld [vmem:[%s8954_s2 + $0xc8] sm:$0xff] }
  0xaa   :  { %6131 = vmatpush1.bf16.msra.mxu1 %v7588_v35  ;;  %v6761_v35 = vld [vmem:[#allocation3 + $0x218] ss:$24 sps:$4 sm:$0xff]   ;;  %v559_v45 = vld [vmem:[%s8954_s2 + $0xe8] sm:$0xff] }
  0xab   :  { %3603 = vmatmul.mubr.bf16.gmra.mrb[32].mxu1 %v6741_v16  ;;  %690 = vperm.xlu0 %6651, %v536_v40   ;;  %v6805_v16 = vld [vmem:[#allocation3 + $0x360] ss:$24 sps:$4 sm:$0xff]   ;;  %v556_v40 = vld [vmem:[%s8954_s2 + $0xd0] sm:$0xff] }
  0xac   :  { %4148 = vmatmul.mubr.bf16.gmra.mrb[32].mxu0 %v6742_v17  ;;  %3610 = vmatprep.mubr.bf16.mxu1 %v6743_v18  ;;  %v6806_v17 = vld [vmem:[#allocation3 + $0x368] ss:$24 sps:$4 sm:$0xff]   ;;  %v6807_v18 = vld [vmem:[#allocation3 + $0x394] ss:$24 sps:$4 sm:$0xff]  }
  0xad   :  { %4155 = vmatprep.mubr.bf16.mxu0 %v6745_v19  ;;  %715 = vperm.xlu1 %6652, %v541_v51   ;;  %v6809_v19 = vld [vmem:[#allocation3 + $0x39c] ss:$24 sps:$4 sm:$0xff]  }
  0xae   :  { %v561_v51 = vld [vmem:[%s8954_s2 + $0xf8] sm:$0xff] }
  0xaf   :  { %700 = vperm.xlu0 %6651, %v538_v46   ;;  %v558_v46 = vld [vmem:[%s8954_s2 + $0xe0] sm:$0xff] }
  0xb1   :  { %725 = vperm.xlu1 %6652, %v543_v58   ;;  %v6848_v58 = vld [vmem:[#allocation3 + $0x4bc] ss:$24 sps:$4 sm:$0xff]  }
  0xb3   :  { %3611 = vmatmul.mubr.bf16.gmra.mrb[36].mxu1 %v6747_v23  ;;  %710 = vperm.xlu0 %6651, %v540_v52   ;;  %v6811_v23 = vld [vmem:[#allocation3 + $0x390] ss:$24 sps:$4 sm:$0xff]  }
  0xb4   :  { %4156 = vmatmul.mubr.bf16.gmra.mrb[36].mxu0 %v6748_v24  ;;  %3618 = vmatprep.mubr.bf16.mxu1 %v6749_v25  ;;  %v6812_v24 = vld [vmem:[#allocation3 + $0x398] ss:$24 sps:$4 sm:$0xff]   ;;  %v6814_v25 = vld [vmem:[#allocation3 + $0x3c4] ss:$24 sps:$4 sm:$0xff]  }
  0xb5   :  { %4163 = vmatprep.mubr.bf16.mxu0 %v6751_v26  ;;  %735 = vperm.xlu1 %6652, %v545_v0   ;;  %v6816_v26 = vld [vmem:[#allocation3 + $0x3cc] ss:$24 sps:$4 sm:$0xff]   ;;  %v6851_v0 = vld [vmem:[#allocation3 + $0x4b8] ss:$24 sps:$4 sm:$0xff]  }
  0xb6   :  { %v560_v52 = vld [vmem:[%s8954_s2 + $0xf0] sm:$0xff] }
  0xb7   :  { %720 = vperm.xlu0 %6651, %v542_v59   ;;  %v563_v59 = vld [vmem:[%s8954_s2 + $0x108] sm:$0xff] }
  0xb9   :  { %745 = vperm.xlu1 %6652, %v547_v8   ;;  %v582_v8 = vld [vmem:[%s8954_s2 + $0x1a0] sm:$0xff] }
  0xbb   :  { %3619 = vmatmul.mubr.bf16.gmra.mrb[40].mxu1 %v6754_v28  ;;  %730 = vperm.xlu0 %6651, %v544_v2   ;;  %v552_v28 = vld [vmem:[%s8954_s2 + $0xb0] sm:$0xff]  ;;  %v6852_v2 = vld [vmem:[#allocation3 + $0x4e4] ss:$24 sps:$4 sm:$0xff]  }
  0xbc   :  { %4164 = vmatmul.mubr.bf16.gmra.mrb[40].mxu0 %v6755_v29  ;;  %3626 = vmatprep.mubr.bf16.mxu1 %v6756_v30  ;;  %v6818_v29 = vld [vmem:[#allocation3 + $0x3c0] ss:$24 sps:$4 sm:$0xff]  }
  0xbd   :  { %4171 = vmatprep.mubr.bf16.mxu0 %v6758_v31  ;;  %755 = vperm.xlu1 %6652, %v549_v14   ;;  %v6819_v30 = vld [vmem:[#allocation3 + $0x3c8] ss:$24 sps:$4 sm:$0xff]   ;;  %v6820_v31 = vld [vmem:[#allocation3 + $0x3f4] ss:$24 sps:$4 sm:$0xff]  }
  0xbf   :  { %740 = vperm.xlu0 %6651, %v546_v9   ;;  %v6857_v9 = vld [vmem:[#allocation3 + $0x4e8] ss:$24 sps:$4 sm:$0xff]  }
  0xc1   :  { %765 = vperm.xlu1 %6652, %v551_v21  }
  0xc3   :  { %3627 = vmatmul.mubr.bf16.gmra.mrb[44].mxu1 %v6760_v34  ;;  %750 = vperm.xlu0 %6651, %v548_v15   ;;  %v6922_v34 = vld [vmem:[%s8952_s0 + $0x178] sm:$0xff]  }
  0xc4   :  { %4172 = vmatmul.mubr.bf16.gmra.mrb[44].mxu0 %v6761_v35  ;;  %3634 = vmatprep.mubr.bf16.mxu1 %v6762_v36  ;;  %v6824_v35 = vld [vmem:[#allocation3 + $0x3f0] ss:$24 sps:$4 sm:$0xff]   ;;  %v585_v15 = vld [vmem:[%s8954_s2 + $0x1b8] sm:$0xff] }
  0xc5   :  { %4179 = vmatprep.mubr.bf16.mxu0 %v6764_v37  ;;  %775 = vperm.xlu1 %6652, %v553_v27   ;;  %v6825_v36 = vld [vmem:[#allocation3 + $0x3f8] ss:$24 sps:$4 sm:$0xff]   ;;  %v6826_v37 = vld [vmem:[#allocation3 + $0x424] ss:$24 sps:$4 sm:$0xff]  }
  0xc6   :  { %4627 = vmatpush1.bf16.msra.mxu0 %v6922_v34  ;;  %v587_v27 = vld [vmem:[%s8954_s2 + $0x1c8] sm:$0xff] }
  0xc7   :  { %760 = vperm.xlu0 %6651, %v550_v22   ;;  %v6867_v22 = vld [vmem:[#allocation3 + $0x54c] ss:$24 sps:$4 sm:$0xff]  }
  0xc9   :  { %785 = vperm.xlu1 %6652, %v555_v1  }
  0xcb   :  { %3635 = vmatmul.mubr.bf16.gmra.mrb[48].mxu1 %v6766_v41  ;;  %770 = vperm.xlu0 %6651, %v552_v28   ;;  %v6830_v41 = vld [vmem:[#allocation3 + $0x420] ss:$24 sps:$4 sm:$0xff]  }
  0xcc   :  { %4180 = vmatmul.mubr.bf16.gmra.mrb[48].mxu0 %v6767_v42  ;;  %3642 = vmatprep.mubr.bf16.mxu1 %v6769_v43  ;;  %v6831_v42 = vld [vmem:[#allocation3 + $0x428] ss:$24 sps:$4 sm:$0xff]   ;;  %v6833_v43 = vld [vmem:[#allocation3 + $0x454] ss:$24 sps:$4 sm:$0xff]  }
  0xcd   :  { %4187 = vmatprep.mubr.bf16.mxu0 %v6771_v44  ;;  %795 = vperm.xlu1 %6652, %v557_v39   ;;  %v6835_v44 = vld [vmem:[#allocation3 + $0x45c] ss:$24 sps:$4 sm:$0xff]   ;;  %v6869_v28 = vld [vmem:[#allocation3 + $0x540] ss:$24 sps:$4 sm:$0xff]   ;;  %v6875_v39 = vld [vmem:[#allocation3 + $0x570] ss:$24 sps:$4 sm:$0xff]  }
  0xcf   :  { %780 = vperm.xlu0 %6651, %v554_v33   ;;  %v6873_v33 = vld [vmem:[#allocation3 + $0x57c] ss:$24 sps:$4 sm:$0xff]  }
  0xd1   :  { %805 = vperm.xlu1 %6652, %v559_v45   ;;  %v6880_v45 = vld [vmem:[#allocation3 + $0x5ac] ss:$24 sps:$4 sm:$0xff]  }
  0xd3   :  { %3643 = vmatmul.mubr.bf16.gmra.mrb[52].mxu1 %v6773_v47  ;;  %790 = vperm.xlu0 %6651, %v556_v40   ;;  %v6837_v47 = vld [vmem:[#allocation3 + $0x450] ss:$24 sps:$4 sm:$0xff]  }
  0xd4   :  { %4188 = vmatmul.mubr.bf16.gmra.mrb[52].mxu0 %v6774_v48  ;;  %3650 = vmatprep.mubr.bf16.mxu1 %v6775_v49  ;;  %v6838_v48 = vld [vmem:[#allocation3 + $0x458] ss:$24 sps:$4 sm:$0xff]   ;;  %v6839_v49 = vld [vmem:[#allocation3 + $0x484] ss:$24 sps:$4 sm:$0xff]  }
  0xd5   :  { %4195 = vmatprep.mubr.bf16.mxu0 %v6777_v50  ;;  %v6841_v50 = vld [vmem:[#allocation3 + $0x48c] ss:$24 sps:$4 sm:$0xff]   ;;  %815 = vperm.xlu1 %6652, %v561_v51   ;;  %v6882_v51 = vld [vmem:[#allocation3 + $0x5a0] ss:$24 sps:$4 sm:$0xff]  }
  0xd7   :  { %800 = vperm.xlu0 %6651, %v558_v46  }
  0xd9   :  { %900 = vperm.xlu1 %6652, %v578_v53   ;;  %v590_v53 = vld [vmem:[%s8954_s2 + $0x1e0] sm:$0xff] }
  0xdb   :  { %3651 = vmatmul.mubr.bf16.gmra.mrb[56].mxu1 %v6779_v54  ;;  %810 = vperm.xlu0 %6651, %v560_v52   ;;  %v6843_v54 = vld [vmem:[#allocation3 + $0x480] ss:$24 sps:$4 sm:$0xff]  }
  0xdc   :  { %4196 = vmatmul.mubr.bf16.gmra.mrb[56].mxu0 %v6780_v55  ;;  %3658 = vmatprep.mubr.bf16.mxu1 %v6782_v56  ;;  %v562_v55 = vld [vmem:[%s8954_s2 + $0x100] sm:$0xff] }
  0xdd   :  { %4203 = vmatprep.mubr.bf16.mxu0 %v6784_v57  ;;  %v6844_v56 = vld [vmem:[#allocation3 + $0x488] ss:$24 sps:$4 sm:$0xff]   ;;  %v6846_v57 = vld [vmem:[#allocation3 + $0x4b4] ss:$24 sps:$4 sm:$0xff]   ;;  %825 = vperm.xlu1 %6652, %v563_v59  }
  0xde   :  { %v575_v59 = vld [vmem:[%s8954_s2 + $0x168] sm:$0xff] }
  0xdf   :  { %820 = vperm.xlu0 %6651, %v562_v55   ;;  %v6884_v55 = vld [vmem:[#allocation3 + $0x5d4] ss:$24 sps:$4 sm:$0xff]  }
  0xe3   :  { %3659 = vmatmul.mubr.bf16.gmra.mrb[60].mxu1 %v6786_v60  ;;  %v579_v60 = vld [vmem:[%s8954_s2 + $0x188] sm:$0xff] }
  0xe4   :  { %4204 = vmatmul.mubr.bf16.gmra.mrb[60].mxu0 %v6787_v61  ;;  %3666 = vmatprep.mubr.bf16.mxu1 %v6788_v62  ;;  %v581_v61 = vld [vmem:[%s8954_s2 + $0x198] sm:$0xff]  ;;  %v6850_v62 = vld [vmem:[#allocation3 + $0x4b0] ss:$24 sps:$4 sm:$0xff]  }
  0xe5   :  { %4211 = vmatprep.mubr.bf16.mxu0 %v6790_v63  ;;  %905 = vperm.xlu0 %6651, %v579_v60   ;;  %v580_v63 = vld [vmem:[%s8954_s2 + $0x190] sm:$0xff]  ;;  %v574_v60 = vld [vmem:[%s8954_s2 + $0x160] sm:$0xff] }
  0xe6   :  { %915 = vperm.xlu1 %6652, %v581_v61  }
  0xe9   :  { %910 = vperm.xlu0 %6651, %v580_v63   ;;  %v6888_v63 = vld [vmem:[#allocation3 + $0x5d0] ss:$24 sps:$4 sm:$0xff]  }
  0xea   :  { %835 = vperm.xlu1 %6652, %v565_v4   ;;  %v6890_v4 = vld [vmem:[#allocation3 + $0x604] ss:$24 sps:$4 sm:$0xff]  }
  0xeb   :  { %3667 = vmatmul.mubr.bf16.gmra.mrb[64].mxu1 %v6792_v3  ;;  %v6854_v3 = vld [vmem:[#allocation3 + $0x4ec] ss:$24 sps:$4 sm:$0xff]  }
  0xec   :  { %4212 = vmatmul.mubr.bf16.gmra.mrb[64].mxu0 %v6793_v5  ;;  %3674 = vmatprep.mubr.bf16.mxu1 %v6794_v6  ;;  %v564_v5 = vld [vmem:[%s8954_s2 + $0x110] sm:$0xff]  ;;  %v583_v6 = vld [vmem:[%s8954_s2 + $0x1a8] sm:$0xff] }
  0xed   :  { %4219 = vmatprep.mubr.bf16.mxu0 %v6796_v7  ;;  %830 = vperm.xlu0 %6651, %v564_v5   ;;  %v6856_v7 = vld [vmem:[#allocation3 + $0x4e0] ss:$24 sps:$4 sm:$0xff]  }
  0xee   :  { %925 = vperm.xlu1 %6652, %v583_v6   ;;  %v6892_v6 = vld [vmem:[#allocation3 + $0x60c] ss:$24 sps:$4 sm:$0xff]  }
  0xf1   :  { %920 = vperm.xlu0 %6651, %v582_v8   ;;  %v577_v8 = vld [vmem:[%s8954_s2 + $0x178] sm:$0xff] }
  0xf3   :  { %3675 = vmatmul.mubr.bf16.gmra.mrb[68].mxu1 %v6798_v10  ;;  %v6858_v10 = vld [vmem:[#allocation3 + $0x514] ss:$24 sps:$4 sm:$0xff]  }
  0xf4   :  { %4220 = vmatmul.mubr.bf16.gmra.mrb[68].mxu0 %v6799_v11  ;;  %3682 = vmatprep.mubr.bf16.mxu1 %v6801_v12  ;;  %v6860_v11 = vld [vmem:[#allocation3 + $0x51c] ss:$24 sps:$4 sm:$0xff]   ;;  %v567_v12 = vld [vmem:[%s8954_s2 + $0x128] sm:$0xff] }
  0xf5   :  { %4227 = vmatprep.mubr.bf16.mxu0 %v6803_v13  ;;  %v566_v13 = vld [vmem:[%s8954_s2 + $0x120] sm:$0xff]  ;;  %845 = vperm.xlu1 %6652, %v567_v12  }
  0xf6   :  { %840 = vperm.xlu0 %6651, %v566_v13   ;;  %v6896_v13 = vld [vmem:[#allocation3 + $0x608] ss:$24 sps:$4 sm:$0xff]  }
  0xf9   :  { %935 = vperm.xlu1 %6652, %v585_v15   ;;  %v6897_v15 = vld [vmem:[#allocation3 + $0x634] ss:$24 sps:$4 sm:$0xff]  }
  0xfb   :  { %3683 = vmatmul.mubr.bf16.gmra.mrb[72].mxu1 %v6805_v16  ;;  %v6862_v16 = vld [vmem:[#allocation3 + $0x510] ss:$24 sps:$4 sm:$0xff]  }
  0xfc   :  { %4228 = vmatmul.mubr.bf16.gmra.mrb[72].mxu0 %v6806_v17  ;;  %3690 = vmatprep.mubr.bf16.mxu1 %v6807_v18  ;;  %v584_v18 = vld [vmem:[%s8954_s2 + $0x1b0] sm:$0xff] }
  0xfd   :  { %4235 = vmatprep.mubr.bf16.mxu0 %v6809_v19  ;;  %v6863_v19 = vld [vmem:[#allocation3 + $0x518] ss:$24 sps:$4 sm:$0xff]   ;;  %930 = vperm.xlu0 %6651, %v584_v18  }
 0x103   :  { %3691 = vmatmul.mubr.bf16.gmra.mrb[76].mxu1 %v6811_v23 }
 0x104   :  { %4236 = vmatmul.mubr.bf16.gmra.mrb[76].mxu0 %v6812_v24  ;;  %3698 = vmatprep.mubr.bf16.mxu1 %v6814_v25  ;;  %v569_v24 = vld [vmem:[%s8954_s2 + $0x138] sm:$0xff]  ;;  %v568_v25 = vld [vmem:[%s8954_s2 + $0x130] sm:$0xff] }
 0x105   :  { %4243 = vmatprep.mubr.bf16.mxu0 %v6816_v26  ;;  %855 = vperm.xlu1 %6652, %v569_v24   ;;  %v6903_v24 = vld [vmem:[#allocation3 + $0x664] ss:$24 sps:$4 sm:$0xff]  }
 0x106   :  { %850 = vperm.xlu0 %6651, %v568_v25  }
 0x109   :  { %945 = vperm.xlu1 %6652, %v587_v27   ;;  %v6905_v27 = vld [vmem:[#allocation3 + $0x66c] ss:$24 sps:$4 sm:$0xff]  }
 0x10b   :  { %3699 = vmatmul.mubr.bf16.gmra.mrb[80].mxu1 %v6818_v29 }
 0x10c   :  { %4244 = vmatmul.mubr.bf16.gmra.mrb[80].mxu0 %v6819_v30  ;;  %3706 = vmatprep.mubr.bf16.mxu1 %v6820_v31  ;;  %v586_v30 = vld [vmem:[%s8954_s2 + $0x1c0] sm:$0xff] }
 0x10d   :  { %4251 = vmatprep.mubr.bf16.mxu0 %v6822_v32  ;;  %v6870_v31 = vld [vmem:[#allocation3 + $0x548] ss:$24 sps:$4 sm:$0xff]   ;;  %v6871_v32 = vld [vmem:[#allocation3 + $0x574] ss:$24 sps:$4 sm:$0xff]   ;;  %940 = vperm.xlu0 %6651, %v586_v30  }
 0x10e   :  { %v6907_v30 = vld [vmem:[#allocation3 + $0x660] ss:$24 sps:$4 sm:$0xff]  }
 0x113   :  { %3707 = vmatmul.mubr.bf16.gmra.mrb[84].mxu1 %v6824_v35  ;;  %v571_v35 = vld [vmem:[%s8954_s2 + $0x148] sm:$0xff] }
 0x114   :  { %4252 = vmatmul.mubr.bf16.gmra.mrb[84].mxu0 %v6825_v36  ;;  %3714 = vmatprep.mubr.bf16.mxu1 %v6826_v37  ;;  %v570_v36 = vld [vmem:[%s8954_s2 + $0x140] sm:$0xff] }
 0x115   :  { %4259 = vmatprep.mubr.bf16.mxu0 %v6828_v38  ;;  %865 = vperm.xlu1 %6652, %v571_v35   ;;  %v589_v38 = vld [vmem:[%s8954_s2 + $0x1d8] sm:$0xff] }
 0x116   :  { %860 = vperm.xlu0 %6651, %v570_v36   ;;  %v6912_v35 = vld [vmem:[#allocation3 + $0x69c] ss:$24 sps:$4 sm:$0xff]  }
 0x119   :  { %955 = vperm.xlu1 %6652, %v589_v38  }
 0x11b   :  { %3715 = vmatmul.mubr.bf16.gmra.mrb[88].mxu1 %v6830_v41  ;;  %v588_v41 = vld [vmem:[%s8954_s2 + $0x1d0] sm:$0xff] }
 0x11c   :  { %4260 = vmatmul.mubr.bf16.gmra.mrb[88].mxu0 %v6831_v42  ;;  %3722 = vmatprep.mubr.bf16.mxu1 %v6833_v43  ;;  %v6876_v42 = vld [vmem:[#allocation3 + $0x578] ss:$24 sps:$4 sm:$0xff]   ;;  %v6878_v43 = vld [vmem:[#allocation3 + $0x5a4] ss:$24 sps:$4 sm:$0xff]  }
 0x11d   :  { %4267 = vmatprep.mubr.bf16.mxu0 %v6835_v44  ;;  %950 = vperm.xlu0 %6651, %v588_v41   ;;  %v6915_v41 = vld [vmem:[#allocation3 + $0x698] ss:$24 sps:$4 sm:$0xff]  }
 0x123   :  { %3723 = vmatmul.mubr.bf16.gmra.mrb[92].mxu1 %v6837_v47  ;;  %v573_v47 = vld [vmem:[%s8954_s2 + $0x158] sm:$0xff] }
 0x124   :  { %4268 = vmatmul.mubr.bf16.gmra.mrb[92].mxu0 %v6838_v48  ;;  %3730 = vmatprep.mubr.bf16.mxu1 %v6839_v49  ;;  %v572_v48 = vld [vmem:[%s8954_s2 + $0x150] sm:$0xff] }
 0x125   :  { %4275 = vmatprep.mubr.bf16.mxu0 %v6841_v50  ;;  %875 = vperm.xlu1 %6652, %v573_v47   ;;  %v591_v50 = vld [vmem:[%s8954_s2 + $0x1e8] sm:$0xff] }
 0x126   :  { %870 = vperm.xlu0 %6651, %v572_v48   ;;  %v6920_v48 = vld [vmem:[#allocation3 + $0x6c0] ss:$24 sps:$4 sm:$0xff]  }
 0x129   :  { %965 = vperm.xlu1 %6652, %v591_v50  }
 0x12a   :  { %960 = vperm.xlu0 %6651, %v590_v53  }
 0x12b   :  { %3731 = vmatmul.mubr.bf16.gmra.mrb[96].mxu1 %v6843_v54  ;;  %v6883_v54 = vld [vmem:[#allocation3 + $0x5a8] ss:$24 sps:$4 sm:$0xff]  }
 0x12c   :  { %4276 = vmatmul.mubr.bf16.gmra.mrb[96].mxu0 %v6844_v56  ;;  %3738 = vmatprep.mubr.bf16.mxu1 %v6846_v57  ;;  %v6886_v57 = vld [vmem:[#allocation3 + $0x5dc] ss:$24 sps:$4 sm:$0xff]  }
 0x12d   :  { %4283 = vmatprep.mubr.bf16.mxu0 %v6848_v58  ;;  %885 = vperm.xlu1 %6652, %v575_v59  }
 0x12e   :  { %880 = vperm.xlu0 %6651, %v574_v60   ;;  %v6928_v60 = vld [vmem:[#allocation3 + $0x6f8] ss:$24 sps:$4 sm:$0xff]  }
 0x133   :  { %3739 = vmatmul.mubr.bf16.gmra.mrb[100].mxu1 %v6850_v62  ;;  %v593_v62 = vld [vmem:[%s8954_s2 + $0x1f8] sm:$0xff] }
 0x134   :  { %4284 = vmatmul.mubr.bf16.gmra.mrb[100].mxu0 %v6851_v0  ;;  %3746 = vmatprep.mubr.bf16.mxu1 %v6852_v2  ;;  %v592_v2 = vld [vmem:[%s8954_s2 + $0x1f0] sm:$0xff] }
 0x135   :  { %4291 = vmatprep.mubr.bf16.mxu0 %v6854_v3  ;;  %v6889_v3 = vld [vmem:[#allocation3 + $0x5d8] ss:$24 sps:$4 sm:$0xff]   ;;  %975 = vperm.xlu1 %6652, %v593_v62   ;;  %v6929_v62 = vld [vmem:[#allocation3 + $0x724] ss:$24 sps:$4 sm:$0xff]  }
 0x136   :  { %970 = vperm.xlu0 %6651, %v592_v2  }
 0x139   :  { %895 = vperm.xlu1 %6652, %v577_v8   ;;  %v6935_v8 = vld [vmem:[#allocation3 + $0x754] ss:$24 sps:$4 sm:$0xff]  }
 0x13b   :  { %3747 = vmatmul.mubr.bf16.gmra.mrb[104].mxu1 %v6856_v7 }
 0x13c   :  { %4292 = vmatmul.mubr.bf16.gmra.mrb[104].mxu0 %v6857_v9  ;;  %3754 = vmatprep.mubr.bf16.mxu1 %v6858_v10  ;;  %v576_v9 = vld [vmem:[%s8954_s2 + $0x170] sm:$0xff] }
 0x13d   :  { %4299 = vmatprep.mubr.bf16.mxu0 %v6860_v11  ;;  %890 = vperm.xlu0 %6651, %v576_v9   ;;  %v6895_v11 = vld [vmem:[#allocation3 + $0x600] ss:$24 sps:$4 sm:$0xff]  }
 0x13e   :  { %v7820_v14 = vpop.f32.mrb[0].mxu1 }
 0x13f   :  { %v3542_v17 = vpop.f32.mrb[1].mxu1 }
 0x140   :  { %v7828_v21 = vpop.f32.mrb[2].mxu1  ;;  %v6899_v17 = vld [vmem:[#allocation3 + $0x63c] ss:$24 sps:$4 sm:$0xff]  }
 0x141   :  { %v3545_v23 = vpop.f32.mrb[3].mxu1 }
 0x142   :  { %v6902_v23 = vld [vmem:[#allocation3 + $0x638] ss:$24 sps:$4 sm:$0xff]  }
 0x143   :  { %3755 = vmatmul.mubr.bf16.gmra.mrb[108].mxu1 %v6862_v16 }
 0x144   :  { %4300 = vmatmul.mubr.bf16.gmra.mrb[108].mxu0 %v6863_v19  ;;  %3762 = vmatprep.mubr.bf16.mxu1 %v6865_v20  ;;  %v6901_v20 = vld [vmem:[#allocation3 + $0x630] ss:$24 sps:$4 sm:$0xff]  }
 0x145   :  { %4307 = vmatprep.mubr.bf16.mxu0 %v6867_v22 }
 0x146   :  { %v7836_v26 = vpop.f32.mrb[4].mxu1 }
 0x147   :  { %v3550_v29 = vpop.f32.mrb[5].mxu1 }
 0x148   :  { %v7844_v1 = vpop.f32.mrb[6].mxu1 }
 0x149   :  { %v3553_v34 = vpop.f32.mrb[7].mxu1 }
 0x14b   :  { %3763 = vmatmul.mubr.bf16.gmra.mrb[112].mxu1 %v6869_v28 }
 0x14c   :  { %4308 = vmatmul.mubr.bf16.gmra.mrb[112].mxu0 %v6870_v31  ;;  %3770 = vmatprep.mubr.bf16.mxu1 %v6871_v32  ;;  %v6908_v32 = vld [vmem:[#allocation3 + $0x668] ss:$24 sps:$4 sm:$0xff]  }
 0x14d   :  { %4315 = vmatprep.mubr.bf16.mxu0 %v6873_v33  ;;  %v6910_v33 = vld [vmem:[#allocation3 + $0x694] ss:$24 sps:$4 sm:$0xff]  }
 0x14e   :  { %v7852_v37 = vpop.f32.mrb[8].mxu1 }
 0x14f   :  { %v3558_v40 = vpop.f32.mrb[9].mxu1 }
 0x150   :  { %v7860_v44 = vpop.f32.mrb[10].mxu1 }
 0x151   :  { %v3561_v46 = vpop.f32.mrb[11].mxu1 }
 0x153   :  { %3771 = vmatmul.mubr.bf16.gmra.mrb[116].mxu1 %v6875_v39  ;;  %v6914_v39 = vld [vmem:[#allocation3 + $0x690] ss:$24 sps:$4 sm:$0xff]  }
 0x154   :  { %4316 = vmatmul.mubr.bf16.gmra.mrb[116].mxu0 %v6876_v42  ;;  %3778 = vmatprep.mubr.bf16.mxu1 %v6878_v43  ;;  %v6916_v42 = vld [vmem:[#allocation3 + $0x6c4] ss:$24 sps:$4 sm:$0xff]  }
 0x155   :  { %4323 = vmatprep.mubr.bf16.mxu0 %v6880_v45  ;;  %v6918_v45 = vld [vmem:[#allocation3 + $0x6cc] ss:$24 sps:$4 sm:$0xff]  }
 0x156   :  { %v7868_v49 = vpop.f32.mrb[12].mxu1 }
 0x157   :  { %v3566_v52 = vpop.f32.mrb[13].mxu1 }
 0x158   :  { %v7876_v56 = vpop.f32.mrb[14].mxu1  ;;  %v6923_v52 = vld [vmem:[#allocation3 + $0x6f4] ss:$24 sps:$4 sm:$0xff]  }
 0x159   :  { %v3569_v58 = vpop.f32.mrb[15].mxu1 }
 0x15a   :  { %v6927_v58 = vld [vmem:[#allocation3 + $0x6f0] ss:$24 sps:$4 sm:$0xff]  }
 0x15b   :  { %3779 = vmatmul.mubr.bf16.gmra.mrb[120].mxu1 %v6882_v51  ;;  %v6921_v51 = vld [vmem:[#allocation3 + $0x6c8] ss:$24 sps:$4 sm:$0xff]  }
 0x15c   :  { %4324 = vmatmul.mubr.bf16.gmra.mrb[120].mxu0 %v6883_v54  ;;  %3786 = vmatprep.mubr.bf16.mxu1 %v6884_v55  ;;  %v6925_v54 = vld [vmem:[#allocation3 + $0x6fc] ss:$24 sps:$4 sm:$0xff]  }
 0x15d   :  { %4331 = vmatprep.mubr.bf16.mxu0 %v6886_v57 }
 0x15e   :  { %v7884_v61 = vpop.f32.mrb[16].mxu1 }
 0x15f   :  { %v3574_v0 = vpop.f32.mrb[17].mxu1 }
 0x160   :  { %v7892_v5 = vpop.f32.mrb[18].mxu1  ;;  %v6931_v0 = vld [vmem:[#allocation3 + $0x72c] ss:$24 sps:$4 sm:$0xff]  }
 0x161   :  { %v3577_v7 = vpop.f32.mrb[19].mxu1 }
 0x162   :  { %v6934_v7 = vld [vmem:[#allocation3 + $0x728] ss:$24 sps:$4 sm:$0xff]  }
 0x163   :  { %3787 = vmatmul.mubr.bf16.gmra.mrb[124].mxu1 %v6888_v63 }
 0x164   :  { %4332 = vmatmul.mubr.bf16.gmra.mrb[124].mxu0 %v6889_v3  ;;  %3794 = vmatprep.mubr.bf16.mxu1 %v6890_v4  ;;  %v6933_v4 = vld [vmem:[#allocation3 + $0x720] ss:$24 sps:$4 sm:$0xff]  }
 0x165   :  { %4339 = vmatprep.mubr.bf16.mxu0 %v6892_v6 }
 0x166   :  { %v7900_v10 = vpop.f32.mrb[20].mxu1 }
 0x167   :  { %v3582_v12 = vpop.f32.mrb[21].mxu1 }
 0x168   :  { %v7902_v16 = vpop.f32.mrb[22].mxu1 }
 0x169   :  { %v3585_v18 = vpop.f32.mrb[23].mxu1 }
 0x16a   :  { %v6937_v18 = vld [vmem:[#allocation3 + $0x10] ss:$24 sps:$4 sm:$0xff]  }
 0x16b   :  { %3795 = vmatmul.mubr.bf16.gmra.mrb[128].mxu1 %v6895_v11  ;;  %v6939_v11 = vld [vmem:[#allocation3 + $0x14] ss:$24 sps:$4 sm:$0xff]  }
 0x16c   :  { %4340 = vmatmul.mubr.bf16.gmra.mrb[128].mxu0 %v6896_v13  ;;  %3802 = vmatprep.mubr.bf16.mxu1 %v6897_v15  ;;  %v6940_v15 = vld [vmem:[#allocation3 + $0x750] ss:$24 sps:$4 sm:$0xff]  }
 0x16d   :  { %4347 = vmatprep.mubr.bf16.mxu0 %v6899_v17 }
 0x16e   :  { %v7904_v19 = vpop.f32.mrb[24].mxu1 }
 0x16f   :  { %v3590_v22 = vpop.f32.mrb[25].mxu1 }
 0x170   :  { %v7906_v25 = vpop.f32.mrb[26].mxu1 }
 0x171   :  { %v3593_v28 = vpop.f32.mrb[27].mxu1 }
 0x172   :  { %v610_v28 = vld [vmem:[%s8954_s2 + $0x280] sm:$0xff] }
 0x173   :  { %3803 = vmatmul.mubr.bf16.gmra.mrb[132].mxu1 %v6901_v20  ;;  %v6941_v20 = vld [vmem:[#allocation3 + $0x784] ss:$24 sps:$4 sm:$0xff]   ;;  %1060 = vperm.xlu0 %6651, %v610_v28  }
 0x174   :  { %4348 = vmatmul.mubr.bf16.gmra.mrb[132].mxu0 %v6902_v23  ;;  %3810 = vmatprep.mubr.bf16.mxu1 %v6903_v24  ;;  %v6943_v23 = vld [vmem:[#allocation3 + $0x44] ss:$24 sps:$4 sm:$0xff]  }
 0x175   :  { %4355 = vmatprep.mubr.bf16.mxu0 %v6905_v27  ;;  %v611_v27 = vld [vmem:[%s8954_s2 + $0x288] sm:$0xff] }
 0x176   :  { %v7908_v29 = vpop.f32.mrb[28].mxu1  ;;  %1065 = vperm.xlu1 %6652, %v611_v27   ;;  %v6963_v27 = vld [vmem:[#allocation3 + $0x810] ss:$24 sps:$4 sm:$0xff]  }
 0x177   :  { %v3598_v31 = vpop.f32.mrb[29].mxu1 }
 0x178   :  { %v7910_v34 = vpop.f32.mrb[30].mxu1  ;;  %v6945_v31 = vld [vmem:[#allocation3 + $0x780] ss:$24 sps:$4 sm:$0xff]  }
 0x179   :  { %v3601_v36 = vpop.f32.mrb[31].mxu1 }
 0x17b   :  { %3811 = vmatmul.mubr.bf16.gmra.mrb[136].mxu1 %v6907_v30 }
 0x17c   :  { %4356 = vmatmul.mubr.bf16.gmra.mrb[136].mxu0 %v6908_v32  ;;  %3818 = vmatprep.mubr.bf16.mxu1 %v6910_v33  ;;  %v6946_v33 = vld [vmem:[#allocation3 + $0x40] ss:$24 sps:$4 sm:$0xff]  }
 0x17d   :  { %4363 = vmatprep.mubr.bf16.mxu0 %v6912_v35  ;;  %v6947_v35 = vld [vmem:[#allocation3 + $0x7b4] ss:$24 sps:$4 sm:$0xff]  }
 0x17e   :  { %v7912_v38 = vpop.f32.mrb[32].mxu1 }
 0x17f   :  { %v3606_v40 = vpop.f32.mrb[33].mxu1 }
 0x180   :  { %v7914_v43 = vpop.f32.mrb[34].mxu1 }
 0x181   :  { %v3609_v46 = vpop.f32.mrb[35].mxu1 }
 0x182   :  { %v613_v46 = vld [vmem:[%s8954_s2 + $0x298] sm:$0xff] }
 0x183   :  { %3819 = vmatmul.mubr.bf16.gmra.mrb[140].mxu1 %v6914_v39  ;;  %v6949_v39 = vld [vmem:[#allocation3 + $0x74] ss:$24 sps:$4 sm:$0xff]  }
 0x184   :  { %4364 = vmatmul.mubr.bf16.gmra.mrb[140].mxu0 %v6915_v41  ;;  %3826 = vmatprep.mubr.bf16.mxu1 %v6916_v42  ;;  %v595_v41 = vld [vmem:[%s8954_s2 + $0x208] sm:$0xff]  ;;  %v594_v42 = vld [vmem:[%s8954_s2 + $0x200] sm:$0xff] }
 0x185   :  { %4371 = vmatprep.mubr.bf16.mxu0 %v6918_v45  ;;  %985 = vperm.xlu1 %6652, %v595_v41   ;;  %v601_v41 = vld [vmem:[%s8954_s2 + $0x238] sm:$0xff] }
 0x186   :  { %v7916_v47 = vpop.f32.mrb[36].mxu1  ;;  %980 = vperm.xlu0 %6651, %v594_v42   ;;  %v600_v42 = vld [vmem:[%s8954_s2 + $0x230] sm:$0xff] }
 0x187   :  { %v3614_v50 = vpop.f32.mrb[37].mxu1 }
 0x188   :  { %v7918_v53 = vpop.f32.mrb[38].mxu1 }
 0x189   :  { %v3617_v55 = vpop.f32.mrb[39].mxu1  ;;  %1075 = vperm.xlu1 %6652, %v613_v46  }
 0x18b   :  { %3827 = vmatmul.mubr.bf16.gmra.mrb[144].mxu1 %v6920_v48  ;;  %v6951_v48 = vld [vmem:[#allocation3 + $0x7b0] ss:$24 sps:$4 sm:$0xff]  }
 0x18c   :  { %4372 = vmatmul.mubr.bf16.gmra.mrb[144].mxu0 %v6921_v51  ;;  %3834 = vmatprep.mubr.bf16.mxu1 %v6923_v52  ;;  %v612_v51 = vld [vmem:[%s8954_s2 + $0x290] sm:$0xff] }
 0x18d   :  { %4379 = vmatprep.mubr.bf16.mxu0 %v6925_v54  ;;  %v6952_v52 = vld [vmem:[#allocation3 + $0x70] ss:$24 sps:$4 sm:$0xff]   ;;  %v6953_v54 = vld [vmem:[#allocation3 + $0x7e4] ss:$24 sps:$4 sm:$0xff]   ;;  %1070 = vperm.xlu0 %6651, %v612_v51  }
 0x18e   :  { %v7920_v57 = vpop.f32.mrb[40].mxu1 }
 0x18f   :  { %v3622_v59 = vpop.f32.mrb[41].mxu1 }
 0x190   :  { %v7922_v63 = vpop.f32.mrb[42].mxu1 }
 0x191   :  { %v3625_v2 = vpop.f32.mrb[43].mxu1 }
 0x192   :  { %v615_v2 = vld [vmem:[%s8954_s2 + $0x2a8] sm:$0xff] }
 0x193   :  { %3835 = vmatmul.mubr.bf16.gmra.mrb[148].mxu1 %v6927_v58  ;;  %v6955_v58 = vld [vmem:[#allocation3 + $0xa4] ss:$24 sps:$4 sm:$0xff]  }
 0x194   :  { %4380 = vmatmul.mubr.bf16.gmra.mrb[148].mxu0 %v6928_v60  ;;  %3842 = vmatprep.mubr.bf16.mxu1 %v6929_v62  ;;  %v597_v60 = vld [vmem:[%s8954_s2 + $0x218] sm:$0xff]  ;;  %v596_v62 = vld [vmem:[%s8954_s2 + $0x210] sm:$0xff] }
 0x195   :  { %4387 = vmatprep.mubr.bf16.mxu0 %v6931_v0  ;;  %995 = vperm.xlu1 %6652, %v597_v60   ;;  %v6973_v60 = vld [vmem:[#allocation3 + $0x134] ss:$24 sps:$4 sm:$0xff]  }
 0x196   :  { %v7924_v3 = vpop.f32.mrb[44].mxu1  ;;  %990 = vperm.xlu0 %6651, %v596_v62  }
 0x197   :  { %v3630_v6 = vpop.f32.mrb[45].mxu1 }
 0x198   :  { %v7926_v9 = vpop.f32.mrb[46].mxu1 }
 0x199   :  { %v3633_v12 = vpop.f32.mrb[47].mxu1  ;;  %1085 = vperm.xlu1 %6652, %v615_v2   ;;  %v603_v2 = vld [vmem:[%s8954_s2 + $0x248] sm:$0xff] }
 0x19b   :  { %3843 = vmatmul.mubr.bf16.gmra.mrb[152].mxu1 %v6933_v4  ;;  %v6957_v4 = vld [vmem:[#allocation3 + $0x7e0] ss:$24 sps:$4 sm:$0xff]  }
 0x19c   :  { %4388 = vmatmul.mubr.bf16.gmra.mrb[152].mxu0 %v6934_v7  ;;  %3850 = vmatprep.mubr.bf16.mxu1 %v6935_v8  ;;  %v614_v7 = vld [vmem:[%s8954_s2 + $0x2a0] sm:$0xff] }
 0x19d   :  { %4628 = vmatprep.mubr.bf16.mxu0 %v6939_v11  ;;  %v6958_v8 = vld [vmem:[#allocation3 + $0xa0] ss:$24 sps:$4 sm:$0xff]   ;;  %v6959_v11 = vld [vmem:[#allocation3 + $0x814] ss:$24 sps:$4 sm:$0xff]   ;;  %1080 = vperm.xlu0 %6651, %v614_v7  }
 0x19e   :  { %v7928_v13 = vpop.f32.mrb[48].mxu1  ;;  %v621_v7 = vld [vmem:[%s8954_s2 + $0x2d8] sm:$0xff] }
 0x19f   :  { %8963 = vst [vmem:[#allocation12_spill] sm:$0xff] %v7928_v13  ;;  %v3638_v17 = vpop.f32.mrb[49].mxu1  ;;  %v7057_v13 = vld [vmem:[#allocation3 + $0x3d4] ss:$24 sps:$4 sm:$0xff]  }
 0x1a0   :  { %v7930_v22 = vpop.f32.mrb[50].mxu1 }
 0x1a1   :  { %8964 = vst [vmem:[#allocation13_spill] sm:$0xff] %v7930_v22  ;;  %v3641_v24 = vpop.f32.mrb[51].mxu1 }
 0x1a2   :  { %v617_v24 = vld [vmem:[%s8954_s2 + $0x2b8] sm:$0xff] }
 0x1a3   :  { %3851 = vmatmul.mubr.bf16.gmra.mrb[156].mxu1 %v6940_v15  ;;  %v6961_v15 = vld [vmem:[#allocation3 + $0xd4] ss:$24 sps:$4 sm:$0xff]  }
 0x1a4   :  { %4629 = vmatmul.mubr.bf16.vlgmr.msra.gmra.mrb[0].mxu0 %v6937_v18  ;;  %3858 = vmatprep.mubr.bf16.mxu1 %v6941_v20  ;;  %v599_v18 = vld [vmem:[%s8954_s2 + $0x228] sm:$0xff]  ;;  %v598_v20 = vld [vmem:[%s8954_s2 + $0x220] sm:$0xff] }
 0x1a5   :  { %4636 = vmatprep.mubr.bf16.mxu0 %v6943_v23  ;;  %1005 = vperm.xlu1 %6652, %v599_v18   ;;  %v6977_v18 = vld [vmem:[#allocation3 + $0x8a4] ss:$24 sps:$4 sm:$0xff]  }
 0x1a6   :  { %v7938_v30 = vpop.f32.mrb[52].mxu1  ;;  %1000 = vperm.xlu0 %6651, %v598_v20  }
 0x1a7   :  { %8965 = vst [vmem:[#allocation14_spill] sm:$0xff] %v7938_v30  ;;  %v3646_v32 = vpop.f32.mrb[53].mxu1  ;;  %v640_v30 = vld [vmem:[%s8954_s2 + $0x370] sm:$0xff] }
 0x1a8   :  { %v7940_v36 = vpop.f32.mrb[54].mxu1  ;;  %v6964_v32 = vld [vmem:[#allocation3 + $0xd0] ss:$24 sps:$4 sm:$0xff]  }
 0x1a9   :  { %8966 = vst [vmem:[#allocation15_spill] sm:$0xff] %v7940_v36  ;;  %v3649_v40 = vpop.f32.mrb[55].mxu1  ;;  %1095 = vperm.xlu1 %6652, %v617_v24   ;;  %v6979_v24 = vld [vmem:[#allocation3 + $0x164] ss:$24 sps:$4 sm:$0xff]  }
 0x1aa   :  { %v657_v36 = vld [vmem:[%s8954_s2 + $0x3f8] sm:$0xff] }
 0x1ab   :  { %3859 = vmatmul.mubr.bf16.gmra.mrb[160].mxu1 %v6945_v31  ;;  %v616_v31 = vld [vmem:[%s8954_s2 + $0x2b0] sm:$0xff] }
 0x1ac   :  { %4637 = vmatmul.mubr.bf16.gmra.mrb[4].mxu0 %v6946_v33  ;;  %3866 = vmatprep.mubr.bf16.mxu1 %v6947_v35  ;;  %v6965_v33 = vld [vmem:[#allocation3 + $0x844] ss:$24 sps:$4 sm:$0xff]  }
 0x1ad   :  { %4644 = vmatprep.mubr.bf16.mxu0 %v6949_v39  ;;  %v6967_v39 = vld [vmem:[#allocation3 + $0x104] ss:$24 sps:$4 sm:$0xff]   ;;  %1090 = vperm.xlu0 %6651, %v616_v31   ;;  %v604_v31 = vld [vmem:[%s8954_s2 + $0x250] sm:$0xff] }
 0x1ae   :  { %v7948_v45 = vpop.f32.mrb[56].mxu1  ;;  %1015 = vperm.xlu1 %6652, %v601_v41   ;;  %v622_v41 = vld [vmem:[%s8954_s2 + $0x2e0] sm:$0xff] }
 0x1af   :  { %8967 = vst [vmem:[#allocation16_spill] sm:$0xff] %v7948_v45  ;;  %v3654_v50 = vpop.f32.mrb[57].mxu1 }
 0x1b0   :  { %v7956_v55 = vpop.f32.mrb[58].mxu1  ;;  %v6969_v50 = vld [vmem:[#allocation3 + $0x840] ss:$24 sps:$4 sm:$0xff]  }
 0x1b1   :  { %8968 = vst [vmem:[#allocation17_spill] sm:$0xff] %v7956_v55  ;;  %v3657_v59 = vpop.f32.mrb[59].mxu1  ;;  %1010 = vperm.xlu0 %6651, %v600_v42   ;;  %v6982_v42 = vld [vmem:[#allocation3 + $0x160] ss:$24 sps:$4 sm:$0xff]  }
 0x1b3   :  { %3867 = vmatmul.mubr.bf16.gmra.mrb[164].mxu1 %v6951_v48  ;;  %v619_v48 = vld [vmem:[%s8954_s2 + $0x2c8] sm:$0xff] }
 0x1b4   :  { %4645 = vmatmul.mubr.bf16.gmra.mrb[8].mxu0 %v6952_v52  ;;  %3874 = vmatprep.mubr.bf16.mxu1 %v6953_v54  ;;  %v618_v52 = vld [vmem:[%s8954_s2 + $0x2c0] sm:$0xff] }
 0x1b5   :  { %4652 = vmatprep.mubr.bf16.mxu0 %v6955_v58  ;;  %v6970_v54 = vld [vmem:[#allocation3 + $0x100] ss:$24 sps:$4 sm:$0xff]   ;;  %v6971_v58 = vld [vmem:[#allocation3 + $0x874] ss:$24 sps:$4 sm:$0xff]   ;;  %1105 = vperm.xlu1 %6652, %v619_v48  }
 0x1b6   :  { %v7964_v0 = vpop.f32.mrb[60].mxu1  ;;  %1100 = vperm.xlu0 %6651, %v618_v52   ;;  %v6983_v48 = vld [vmem:[#allocation3 + $0x8d4] ss:$24 sps:$4 sm:$0xff]  }
 0x1b7   :  { %8969 = vst [vmem:[#allocation18_spill] sm:$0xff] %v7964_v0  ;;  %v3662_v6 = vpop.f32.mrb[61].mxu1  ;;  %v638_v0 = vld [vmem:[%s8954_s2 + $0x360] sm:$0xff] }
 0x1b8   :  { %v7972_v12 = vpop.f32.mrb[62].mxu1 }
 0x1b9   :  { %8970 = vst [vmem:[#allocation19_spill] sm:$0xff] %v7972_v12  ;;  %v3665_v17 = vpop.f32.mrb[63].mxu1  ;;  %1025 = vperm.xlu1 %6652, %v603_v2   ;;  %v655_v12 = vld [vmem:[%s8954_s2 + $0x3e8] sm:$0xff] }
 0x1ba   :  { %v6976_v17 = vld [vmem:[#allocation3 + $0x130] ss:$24 sps:$4 sm:$0xff]  }
 0x1bb   :  { %3875 = vmatmul.mubr.bf16.gmra.mrb[168].mxu1 %v6957_v4  ;;  %v602_v4 = vld [vmem:[%s8954_s2 + $0x240] sm:$0xff] }
 0x1bc   :  { %4653 = vmatmul.mubr.bf16.gmra.mrb[12].mxu0 %v6958_v8  ;;  %3882 = vmatprep.mubr.bf16.mxu1 %v6959_v11  ;;  %v6975_v8 = vld [vmem:[#allocation3 + $0x870] ss:$24 sps:$4 sm:$0xff]  }
 0x1bd   :  { %4660 = vmatprep.mubr.bf16.mxu0 %v6961_v15  ;;  %1020 = vperm.xlu0 %6651, %v602_v4   ;;  %v620_v15 = vld [vmem:[%s8954_s2 + $0x2d0] sm:$0xff] }
 0x1be   :  { %v7980_v23 = vpop.f32.mrb[64].mxu1  ;;  %1115 = vperm.xlu1 %6652, %v621_v7   ;;  %v6988_v4 = vld [vmem:[#allocation3 + $0x190] ss:$24 sps:$4 sm:$0xff]   ;;  %v6989_v7 = vld [vmem:[#allocation3 + $0x904] ss:$24 sps:$4 sm:$0xff]  }
 0x1bf   :  { %8971 = vst [vmem:[#allocation20_spill] sm:$0xff] %v7980_v23  ;;  %v3670_v28 = vpop.f32.mrb[65].mxu1 }
 0x1c0   :  { %v7988_v35 = vpop.f32.mrb[66].mxu1  ;;  %v605_v28 = vld [vmem:[%s8954_s2 + $0x258] sm:$0xff] }
 0x1c1   :  { %8972 = vst [vmem:[#allocation21_spill] sm:$0xff] %v7988_v35  ;;  %v3673_v40 = vpop.f32.mrb[67].mxu1  ;;  %1110 = vperm.xlu0 %6651, %v620_v15  }
 0x1c2   :  { %1035 = vperm.xlu1 %6652, %v605_v28   ;;  %v6993_v28 = vld [vmem:[#allocation3 + $0x900] ss:$24 sps:$4 sm:$0xff]  }
 0x1c3   :  { %3883 = vmatmul.mubr.bf16.gmra.mrb[172].mxu1 %v6963_v27 }
 0x1c4   :  { %4661 = vmatmul.mubr.bf16.gmra.mrb[16].mxu0 %v6964_v32  ;;  %3890 = vmatprep.mubr.bf16.mxu1 %v6965_v33  ;;  %v623_v33 = vld [vmem:[%s8954_s2 + $0x2e8] sm:$0xff] }
 0x1c5   :  { %4668 = vmatprep.mubr.bf16.mxu0 %v6967_v39  ;;  %1030 = vperm.xlu0 %6651, %v604_v31   ;;  %v6981_v39 = vld [vmem:[#allocation3 + $0x8a0] ss:$24 sps:$4 sm:$0xff]  }
 0x1c6   :  { %v7996_v46 = vpop.f32.mrb[68].mxu1  ;;  %1125 = vperm.xlu1 %6652, %v623_v33   ;;  %v6994_v33 = vld [vmem:[#allocation3 + $0x1c0] ss:$24 sps:$4 sm:$0xff]  }
 0x1c7   :  { %8973 = vst [vmem:[#allocation22_spill] sm:$0xff] %v7996_v46  ;;  %v3678_v51 = vpop.f32.mrb[69].mxu1  ;;  %v636_v46 = vld [vmem:[%s8954_s2 + $0x350] sm:$0xff] }
 0x1c8   :  { %v8004_v59 = vpop.f32.mrb[70].mxu1  ;;  %v6985_v51 = vld [vmem:[#allocation3 + $0x194] ss:$24 sps:$4 sm:$0xff]  }
 0x1c9   :  { %8974 = vst [vmem:[#allocation23_spill] sm:$0xff] %v8004_v59  ;;  %v3681_v62 = vpop.f32.mrb[71].mxu1  ;;  %1120 = vperm.xlu0 %6651, %v622_v41   ;;  %v6997_v41 = vld [vmem:[#allocation3 + $0x1f4] ss:$24 sps:$4 sm:$0xff]  }
 0x1ca   :  { %v6987_v62 = vld [vmem:[#allocation3 + $0x8d0] ss:$24 sps:$4 sm:$0xff]   ;;  %v653_v59 = vld [vmem:[%s8954_s2 + $0x3d8] sm:$0xff] }
 0x1cb   :  { %3891 = vmatmul.mubr.bf16.gmra.mrb[176].mxu1 %v6969_v50 }
 0x1cc   :  { %4669 = vmatmul.mubr.bf16.gmra.mrb[20].mxu0 %v6970_v54  ;;  %3898 = vmatprep.mubr.bf16.mxu1 %v6971_v58  ;;  %v607_v54 = vld [vmem:[%s8954_s2 + $0x268] sm:$0xff]  ;;  %v606_v58 = vld [vmem:[%s8954_s2 + $0x260] sm:$0xff] }
 0x1cd   :  { %4676 = vmatprep.mubr.bf16.mxu0 %v6973_v60  ;;  %1045 = vperm.xlu1 %6652, %v607_v54   ;;  %v643_v54 = vld [vmem:[%s8954_s2 + $0x388] sm:$0xff] }
 0x1ce   :  { %v8012_v6 = vpop.f32.mrb[72].mxu1  ;;  %1040 = vperm.xlu0 %6651, %v606_v58   ;;  %v6999_v58 = vld [vmem:[#allocation3 + $0x930] ss:$24 sps:$4 sm:$0xff]  }
 0x1cf   :  { %8975 = vst [vmem:[#allocation24_spill] sm:$0xff] %v8012_v6  ;;  %v3686_v11 = vpop.f32.mrb[73].mxu1 }
 0x1d0   :  { %v8020_v20 = vpop.f32.mrb[74].mxu1  ;;  %v6991_v11 = vld [vmem:[#allocation3 + $0x1c4] ss:$24 sps:$4 sm:$0xff]  }
 0x1d1   :  { %8976 = vst [vmem:[#allocation25_spill] sm:$0xff] %v8020_v20  ;;  %v3689_v27 = vpop.f32.mrb[75].mxu1 }
 0x1d2   :  { %v608_v27 = vld [vmem:[%s8954_s2 + $0x270] sm:$0xff] }
 0x1d3   :  { %3899 = vmatmul.mubr.bf16.gmra.mrb[180].mxu1 %v6975_v8 }
 0x1d4   :  { %4677 = vmatmul.mubr.bf16.gmra.mrb[24].mxu0 %v6976_v17  ;;  %3906 = vmatprep.mubr.bf16.mxu1 %v6977_v18  ;;  %v624_v17 = vld [vmem:[%s8954_s2 + $0x2f0] sm:$0xff]  ;;  %v625_v18 = vld [vmem:[%s8954_s2 + $0x2f8] sm:$0xff] }
 0x1d5   :  { %4684 = vmatprep.mubr.bf16.mxu0 %v6979_v24  ;;  %1130 = vperm.xlu0 %6651, %v624_v17   ;;  %v7003_v17 = vld [vmem:[#allocation3 + $0x224] ss:$24 sps:$4 sm:$0xff]  }
 0x1d6   :  { %v8028_v32 = vpop.f32.mrb[76].mxu1  ;;  %1135 = vperm.xlu1 %6652, %v625_v18  }
 0x1d7   :  { %8977 = vst [vmem:[#allocation26_spill] sm:$0xff] %v8028_v32  ;;  %v3694_v40 = vpop.f32.mrb[77].mxu1  ;;  %v634_v32 = vld [vmem:[%s8954_s2 + $0x340] sm:$0xff] }
 0x1d8   :  { %v8036_v50 = vpop.f32.mrb[78].mxu1 }
 0x1d9   :  { %8978 = vst [vmem:[#allocation27_spill] sm:$0xff] %v8036_v50  ;;  %v3697_v52 = vpop.f32.mrb[79].mxu1  ;;  %1050 = vperm.xlu0 %6651, %v608_v27   ;;  %v627_v27 = vld [vmem:[%s8954_s2 + $0x308] sm:$0xff] }
 0x1da   :  { %v651_v50 = vld [vmem:[%s8954_s2 + $0x3c8] sm:$0xff] }
 0x1db   :  { %3907 = vmatmul.mubr.bf16.gmra.mrb[184].mxu1 %v6981_v39  ;;  %v6995_v39 = vld [vmem:[#allocation3 + $0x934] ss:$24 sps:$4 sm:$0xff]  }
 0x1dc   :  { %4685 = vmatmul.mubr.bf16.gmra.mrb[28].mxu0 %v6982_v42  ;;  %3914 = vmatprep.mubr.bf16.mxu1 %v6983_v48  ;;  %v609_v48 = vld [vmem:[%s8954_s2 + $0x278] sm:$0xff] }
 0x1dd   :  { %4692 = vmatprep.mubr.bf16.mxu0 %v6985_v51  ;;  %v642_v51 = vld [vmem:[%s8954_s2 + $0x380] sm:$0xff]  ;;  %1055 = vperm.xlu1 %6652, %v609_v48  }
 0x1de   :  { %v8044_v60 = vpop.f32.mrb[80].mxu1  ;;  %1220 = vperm.xlu0 %6651, %v642_v51   ;;  %v7006_v48 = vld [vmem:[#allocation3 + $0x220] ss:$24 sps:$4 sm:$0xff]   ;;  %v7007_v51 = vld [vmem:[#allocation3 + $0x994] ss:$24 sps:$4 sm:$0xff]  }
 0x1df   :  { %8979 = vst [vmem:[#allocation28_spill] sm:$0xff] %v8044_v60  ;;  %v3702_v2 = vpop.f32.mrb[81].mxu1 }
 0x1e0   :  { %v8046_v8 = vpop.f32.mrb[82].mxu1  ;;  %v626_v2 = vld [vmem:[%s8954_s2 + $0x300] sm:$0xff] }
 0x1e1   :  { %8980 = vst [vmem:[#allocation29_spill] sm:$0xff] %v8046_v8  ;;  %v3705_v15 = vpop.f32.mrb[83].mxu1  ;;  %1225 = vperm.xlu1 %6652, %v643_v54  }
 0x1e3   :  { %3915 = vmatmul.mubr.bf16.gmra.mrb[188].mxu1 %v6987_v62 }
 0x1e4   :  { %4693 = vmatmul.mubr.bf16.gmra.mrb[32].mxu0 %v6988_v4  ;;  %3922 = vmatprep.mubr.bf16.mxu1 %v6989_v7  ;;  %v8075_v4 = vpop.permute.xlu0 %660  ;;  %v7000_v7 = vld [vmem:[#allocation3 + $0x1f0] ss:$24 sps:$4 sm:$0xff]  }
 0x1e5   :  { %4700 = vmatprep.mubr.bf16.mxu0 %v6991_v11  ;;  %v7001_v11 = vld [vmem:[#allocation3 + $0x964] ss:$24 sps:$4 sm:$0xff]   ;;  %1140 = vperm.xlu0 %6651, %v626_v2  }
 0x1e6   :  { %v8054_v24 = vpop.f32.mrb[84].mxu1  ;;  %v645_v2 = vld [vmem:[%s8954_s2 + $0x398] sm:$0xff] }
 0x1e7   :  { %8981 = vst [vmem:[#allocation30_spill] sm:$0xff] %v8054_v24  ;;  %v3710_v31 = vpop.f32.mrb[85].mxu1  ;;  %v632_v24 = vld [vmem:[%s8954_s2 + $0x330] sm:$0xff] }
 0x1e8   :  { %v8059_v40 = vpop.f32.mrb[86].mxu1  ;;  %v8085_v31 = vpop.permute.xlu1 %670  ;;  %1145 = vperm.xlu1 %6652, %v627_v27   ;;  %v629_v27 = vld [vmem:[%s8954_s2 + $0x318] sm:$0xff] }
 0x1e9   :  { %8982 = vst [vmem:[#allocation31_spill] sm:$0xff] %v8059_v40  ;;  %v3713_v42 = vpop.f32.mrb[87].mxu1  ;;  %v649_v40 = vld [vmem:[%s8954_s2 + $0x3b8] sm:$0xff] }
 0x1eb   :  { %3923 = vmatmul.mubr.bf16.gmra.mrb[192].mxu1 %v6993_v28  ;;  %v644_v28 = vld [vmem:[%s8954_s2 + $0x390] sm:$0xff] }
 0x1ec   :  { %4701 = vmatmul.mubr.bf16.gmra.mrb[36].mxu0 %v6994_v33  ;;  %3930 = vmatprep.mubr.bf16.mxu1 %v6995_v39  ;;  %v8087_v33 = vpop.permute.xlu0 %665 }
 0x1ed   :  { %4708 = vmatprep.mubr.bf16.mxu0 %v6997_v41  ;;  %1230 = vperm.xlu0 %6651, %v644_v28   ;;  %v7005_v41 = vld [vmem:[#allocation3 + $0x960] ss:$24 sps:$4 sm:$0xff]  }
 0x1ee   :  { %v8067_v52 = vpop.f32.mrb[88].mxu1  ;;  %v646_v28 = vld [vmem:[%s8954_s2 + $0x3a0] sm:$0xff] }
 0x1ef   :  { %8983 = vst [vmem:[#allocation32_spill] sm:$0xff] %v8067_v52  ;;  %v3718_v62 = vpop.f32.mrb[89].mxu1 }
 0x1f0   :  { %v8077_v15 = vpop.f32.mrb[90].mxu1 }
 0x1f1   :  { %8984 = vst [vmem:[#allocation33_spill] sm:$0xff] %v8077_v15  ;;  %v3721_v18 = vpop.f32.mrb[91].mxu1 }
 0x1f3   :  { %3931 = vmatmul.mubr.bf16.gmra.mrb[196].mxu1 %v6999_v58  ;;  %v7009_v58 = vld [vmem:[#allocation3 + $0x254] ss:$24 sps:$4 sm:$0xff]  }
 0x1f4   :  { %4709 = vmatmul.mubr.bf16.gmra.mrb[40].mxu0 %v7000_v7  ;;  %3938 = vmatprep.mubr.bf16.mxu1 %v7001_v11  ;;  %v628_v7 = vld [vmem:[%s8954_s2 + $0x310] sm:$0xff]  ;;  %v8099_v11 = vpop.permute.xlu1 %675 }
 0x1f5   :  { %4716 = vmatprep.mubr.bf16.mxu0 %v7003_v17  ;;  %1235 = vperm.xlu1 %6652, %v645_v2   ;;  %v8101_v17 = vpop.permute.xlu0 %680 }
 0x1f6   :  { %v8089_v39 = vpop.f32.mrb[92].mxu1  ;;  %1150 = vperm.xlu0 %6651, %v628_v7   ;;  %v7015_v7 = vld [vmem:[#allocation3 + $0x284] ss:$24 sps:$4 sm:$0xff]  }
 0x1f7   :  { %8985 = vst [vmem:[#allocation34_spill] sm:$0xff] %v8089_v39  ;;  %v3726_v42 = vpop.f32.mrb[93].mxu1  ;;  %v630_v39 = vld [vmem:[%s8954_s2 + $0x320] sm:$0xff] }
 0x1f8   :  { %v8091_v54 = vpop.f32.mrb[94].mxu1  ;;  %v8111_v42 = vpop.permute.xlu1 %685 }
 0x1f9   :  { %8986 = vst [vmem:[#allocation35_spill] sm:$0xff] %v8091_v54  ;;  %v3729_v62 = vpop.f32.mrb[95].mxu1  ;;  %1155 = vperm.xlu1 %6652, %v629_v27   ;;  %v647_v54 = vld [vmem:[%s8954_s2 + $0x3a8] sm:$0xff] }
 0x1fb   :  { %3939 = vmatmul.mubr.bf16.gmra.mrb[200].mxu1 %v7005_v41  ;;  %v7011_v41 = vld [vmem:[#allocation3 + $0x990] ss:$24 sps:$4 sm:$0xff]  }
 0x1fc   :  { %4717 = vmatmul.mubr.bf16.gmra.mrb[44].mxu0 %v7006_v48  ;;  %3946 = vmatprep.mubr.bf16.mxu1 %v7007_v51  ;;  %v7012_v48 = vld [vmem:[#allocation3 + $0x250] ss:$24 sps:$4 sm:$0xff]   ;;  %v7013_v51 = vld [vmem:[#allocation3 + $0x9c4] ss:$24 sps:$4 sm:$0xff]   ;;  %v8123_v15 = vpop.permute.xlu1 %695 }
 0x1fd   :  { %4724 = vmatprep.mubr.bf16.mxu0 %v7009_v58  ;;  %v8115_v58 = vpop.permute.xlu0 %690  ;;  %1240 = vperm.xlu0 %6651, %v646_v28   ;;  %v631_v28 = vld [vmem:[%s8954_s2 + $0x328] sm:$0xff] }
 0x1fe   :  { %v8103_v18 = vpop.f32.mrb[96].mxu1  ;;  %1245 = vperm.xlu1 %6652, %v647_v54  }
 0x1ff   :  { %8987 = vst [vmem:[#allocation36_spill] sm:$0xff] %v8103_v18  ;;  %v3734_v62 = vpop.f32.mrb[97].mxu1 }
 0x200   :  { %v8113_v2 = vpop.f32.mrb[98].mxu1  ;;  %v648_v62 = vld [vmem:[%s8954_s2 + $0x3b0] sm:$0xff] }
 0x201   :  { %8988 = vst [vmem:[#allocation37_spill] sm:$0xff] %v8113_v2  ;;  %v3737_v18 = vpop.f32.mrb[99].mxu1  ;;  %v8125_v27 = vpop.permute.xlu0 %700  ;;  %1160 = vperm.xlu0 %6651, %v630_v39  }
 0x202   :  { %v8135_v2 = vpop.permute.xlu1 %705  ;;  %1165 = vperm.xlu1 %6652, %v631_v28  }
 0x203   :  { %3947 = vmatmul.mubr.bf16.gmra.mrb[204].mxu1 %v7011_v41  ;;  %v7017_v41 = vld [vmem:[#allocation3 + $0x9c0] ss:$24 sps:$4 sm:$0xff]  }
 0x204   :  { %4725 = vmatmul.mubr.bf16.gmra.mrb[48].mxu0 %v7012_v48  ;;  %3954 = vmatprep.mubr.bf16.mxu1 %v7013_v51  ;;  %v7018_v48 = vld [vmem:[#allocation3 + $0x280] ss:$24 sps:$4 sm:$0xff]   ;;  %v7019_v51 = vld [vmem:[#allocation3 + $0x9f4] ss:$24 sps:$4 sm:$0xff]  }
 0x205   :  { %4732 = vmatprep.mubr.bf16.mxu0 %v7015_v7  ;;  %v8139_v39 = vpop.permute.xlu0 %710  ;;  %v7021_v7 = vld [vmem:[#allocation3 + $0x2b4] ss:$24 sps:$4 sm:$0xff]   ;;  %1250 = vperm.xlu0 %6651, %v648_v62  }
 0x206   :  { %v8127_v18 = vpop.f32.mrb[100].mxu1  ;;  %v8147_v8 = vpop.permute.xlu1 %715  ;;  %1255 = vperm.xlu1 %6652, %v649_v40   ;;  %v633_v62 = vld [vmem:[%s8954_s2 + $0x338] sm:$0xff] }
 0x207   :  { %8989 = vst [vmem:[#allocation38_spill] sm:$0xff] %v8127_v18  ;;  %v3742_v54 = vpop.f32.mrb[101].mxu1 }
 0x208   :  { %v8137_v52 = vpop.f32.mrb[102].mxu1  ;;  %v650_v54 = vld [vmem:[%s8954_s2 + $0x3c0] sm:$0xff] }
 0x209   :  { %8990 = vst [vmem:[#allocation39_spill] sm:$0xff] %v8137_v52  ;;  %v3745_v18 = vpop.f32.mrb[103].mxu1  ;;  %v8149_v28 = vpop.permute.xlu0 %720  ;;  %1170 = vperm.xlu0 %6651, %v632_v24  }
 0x20a   :  { %v8159_v52 = vpop.permute.xlu1 %725  ;;  %1175 = vperm.xlu1 %6652, %v633_v62  }
 0x20b   :  { %3955 = vmatmul.mubr.bf16.gmra.mrb[208].mxu1 %v7017_v41  ;;  %v7023_v41 = vld [vmem:[#allocation3 + $0x9f0] ss:$24 sps:$4 sm:$0xff]  }
 0x20c   :  { %4733 = vmatmul.mubr.bf16.gmra.mrb[52].mxu0 %v7018_v48  ;;  %3962 = vmatprep.mubr.bf16.mxu1 %v7019_v51  ;;  %v7024_v48 = vld [vmem:[#allocation3 + $0x2b0] ss:$24 sps:$4 sm:$0xff]   ;;  %v7025_v51 = vld [vmem:[#allocation3 + $0xa24] ss:$24 sps:$4 sm:$0xff]  }
 0x20d   :  { %4740 = vmatprep.mubr.bf16.mxu0 %v7021_v7  ;;  %v8163_v24 = vpop.permute.xlu0 %730  ;;  %v7027_v7 = vld [vmem:[#allocation3 + $0x2e4] ss:$24 sps:$4 sm:$0xff]   ;;  %1260 = vperm.xlu0 %6651, %v650_v54  }
 0x20e   :  { %v8151_v18 = vpop.f32.mrb[104].mxu1  ;;  %v8171_v20 = vpop.permute.xlu1 %735  ;;  %1265 = vperm.xlu1 %6652, %v651_v50   ;;  %v635_v54 = vld [vmem:[%s8954_s2 + $0x348] sm:$0xff] }
 0x20f   :  { %8991 = vst [vmem:[#allocation40_spill] sm:$0xff] %v8151_v18  ;;  %v3750_v40 = vpop.f32.mrb[105].mxu1 }
 0x210   :  { %v8161_v60 = vpop.f32.mrb[106].mxu1  ;;  %v652_v40 = vld [vmem:[%s8954_s2 + $0x3d0] sm:$0xff] }
 0x211   :  { %8992 = vst [vmem:[#allocation41_spill] sm:$0xff] %v8161_v60  ;;  %v3753_v18 = vpop.f32.mrb[107].mxu1  ;;  %v8173_v62 = vpop.permute.xlu0 %740  ;;  %1180 = vperm.xlu0 %6651, %v634_v32  }
 0x212   :  { %v8183_v60 = vpop.permute.xlu1 %745  ;;  %1185 = vperm.xlu1 %6652, %v635_v54  }
 0x213   :  { %3963 = vmatmul.mubr.bf16.gmra.mrb[212].mxu1 %v7023_v41  ;;  %v7029_v41 = vld [vmem:[#allocation3 + $0xa20] ss:$24 sps:$4 sm:$0xff]  }
 0x214   :  { %4741 = vmatmul.mubr.bf16.gmra.mrb[56].mxu0 %v7024_v48  ;;  %3970 = vmatprep.mubr.bf16.mxu1 %v7025_v51  ;;  %v7030_v48 = vld [vmem:[#allocation3 + $0x2e0] ss:$24 sps:$4 sm:$0xff]   ;;  %v7031_v51 = vld [vmem:[#allocation3 + $0xa54] ss:$24 sps:$4 sm:$0xff]  }
 0x215   :  { %4748 = vmatprep.mubr.bf16.mxu0 %v7027_v7  ;;  %v8187_v32 = vpop.permute.xlu0 %750  ;;  %v7033_v7 = vld [vmem:[#allocation3 + $0x314] ss:$24 sps:$4 sm:$0xff]   ;;  %1270 = vperm.xlu0 %6651, %v652_v40  }
 0x216   :  { %v8175_v18 = vpop.f32.mrb[108].mxu1  ;;  %v8195_v35 = vpop.permute.xlu1 %755  ;;  %1275 = vperm.xlu1 %6652, %v653_v59   ;;  %v637_v40 = vld [vmem:[%s8954_s2 + $0x358] sm:$0xff] }
 0x217   :  { %8993 = vst [vmem:[#allocation42_spill] sm:$0xff] %v8175_v18  ;;  %v3758_v50 = vpop.f32.mrb[109].mxu1 }
 0x218   :  { %v8185_v6 = vpop.f32.mrb[110].mxu1  ;;  %v654_v50 = vld [vmem:[%s8954_s2 + $0x3e0] sm:$0xff] }
 0x219   :  { %8994 = vst [vmem:[#allocation43_spill] sm:$0xff] %v8185_v6  ;;  %v3761_v18 = vpop.f32.mrb[111].mxu1  ;;  %v8197_v54 = vpop.permute.xlu0 %760  ;;  %1190 = vperm.xlu0 %6651, %v636_v46  }
 0x21a   :  { %v8207_v6 = vpop.permute.xlu1 %765  ;;  %1195 = vperm.xlu1 %6652, %v637_v40  }
 0x21b   :  { %3971 = vmatmul.mubr.bf16.gmra.mrb[216].mxu1 %v7029_v41  ;;  %v7035_v41 = vld [vmem:[#allocation3 + $0xa50] ss:$24 sps:$4 sm:$0xff]  }
 0x21c   :  { %4749 = vmatmul.mubr.bf16.gmra.mrb[60].mxu0 %v7030_v48  ;;  %3978 = vmatprep.mubr.bf16.mxu1 %v7031_v51  ;;  %v7036_v48 = vld [vmem:[#allocation3 + $0x310] ss:$24 sps:$4 sm:$0xff]   ;;  %v7037_v51 = vld [vmem:[#allocation3 + $0xa84] ss:$24 sps:$4 sm:$0xff]  }
 0x21d   :  { %4756 = vmatprep.mubr.bf16.mxu0 %v7033_v7  ;;  %v8211_v46 = vpop.permute.xlu0 %770  ;;  %v7039_v7 = vld [vmem:[#allocation3 + $0x344] ss:$24 sps:$4 sm:$0xff]   ;;  %1280 = vperm.xlu0 %6651, %v654_v50  }
 0x21e   :  { %v8199_v18 = vpop.f32.mrb[112].mxu1  ;;  %v8219_v55 = vpop.permute.xlu1 %775  ;;  %1285 = vperm.xlu1 %6652, %v655_v12   ;;  %v639_v50 = vld [vmem:[%s8954_s2 + $0x368] sm:$0xff] }
 0x21f   :  { %8995 = vst [vmem:[#allocation44_spill] sm:$0xff] %v8199_v18  ;;  %v3766_v59 = vpop.f32.mrb[113].mxu1 }
 0x220   :  { %v8209_v23 = vpop.f32.mrb[114].mxu1  ;;  %v656_v59 = vld [vmem:[%s8954_s2 + $0x3f0] sm:$0xff] }
 0x221   :  { %8996 = vst [vmem:[#allocation45_spill] sm:$0xff] %v8209_v23  ;;  %v3769_v18 = vpop.f32.mrb[115].mxu1  ;;  %v8221_v40 = vpop.permute.xlu0 %780  ;;  %1200 = vperm.xlu0 %6651, %v638_v0  }
 0x222   :  { %8997 = vst [vmem:[#allocation46_spill] sm:$0xff] %v8221_v40  ;;  %v8231_v23 = vpop.permute.xlu1 %785  ;;  %1205 = vperm.xlu1 %6652, %v639_v50  }
 0x223   :  { %3979 = vmatmul.mubr.bf16.gmra.mrb[220].mxu1 %v7035_v41  ;;  %8999 = vst [vmem:[#allocation48_spill] sm:$0xff] %v8231_v23  ;;  %v7041_v41 = vld [vmem:[#allocation3 + $0xa80] ss:$24 sps:$4 sm:$0xff]  }
 0x224   :  { %4757 = vmatmul.mubr.bf16.gmra.mrb[64].mxu0 %v7036_v48  ;;  %3986 = vmatprep.mubr.bf16.mxu1 %v7037_v51  ;;  %v7042_v48 = vld [vmem:[#allocation3 + $0x340] ss:$24 sps:$4 sm:$0xff]   ;;  %v7043_v51 = vld [vmem:[#allocation3 + $0xab4] ss:$24 sps:$4 sm:$0xff]  }
 0x225   :  { %4764 = vmatprep.mubr.bf16.mxu0 %v7039_v7  ;;  %v8235_v0 = vpop.permute.xlu0 %790  ;;  %v7045_v7 = vld [vmem:[#allocation3 + $0x374] ss:$24 sps:$4 sm:$0xff]   ;;  %1290 = vperm.xlu0 %6651, %v656_v59  }
 0x226   :  { %v8223_v18 = vpop.f32.mrb[116].mxu1  ;;  %9001 = vst [vmem:[#allocation50_spill] sm:$0xff] %v8235_v0  ;;  %v8243_v22 = vpop.permute.xlu1 %795  ;;  %1295 = vperm.xlu1 %6652, %v657_v36   ;;  %v641_v59 = vld [vmem:[%s8954_s2 + $0x378] sm:$0xff]  ;;  %v7047_v0 = vld [vmem:[#allocation3 + $0xab0] ss:$24 sps:$4 sm:$0xff]   ;;  %s7356_s2 = smov [#allocation8]  }
 0x227   :  { %8998 = vst [vmem:[#allocation47_spill] sm:$0xff] %v8223_v18  ;;  %v3774_v12 = vpop.f32.mrb[117].mxu1  ;;  %9002 = vst [vmem:[#allocation51_spill] sm:$0xff] %v8243_v22  ;;  %v7049_v36 = vld [vmem:[#allocation3 + $0xae4] ss:$24 sps:$4 sm:$0xff]   ;;  %s5570_s27 = sshll.u32 %s7356_s2, 4  ;;  %s5571_s27 = int_to_ptr.vmem [resolvable:$true] %s5570_s27 }
 0x228   :  { %v8233_v45 = vpop.f32.mrb[118].mxu1  ;;  %v5334_v12 = vld [vmem:[#allocation2] sm:$0x1]  ;;  %v7054_v22 = vld [vmem:[#allocation3 + $0x3a0] ss:$24 sps:$4 sm:$0xff]   ;;  %s7322_s28 = scalar_lea.vmem %s5571_s27, 16  ;;  %p7327_p3 = scmp.lt.s32.totalorder %s5571_s27, %s5571_s27 }
 0x229   :  { %9000 = vst [vmem:[#allocation49_spill] sm:$0xff] %v8233_v45  ;;  %v3777_v18 = vpop.f32.mrb[119].mxu1  ;;  %v8245_v50 = vpop.permute.xlu0 %800  ;;  %1210 = vperm.xlu0 %6651, %v640_v30   ;;  %p7323_p2 = scmp.ne.s32.totalorder %s5571_s27, %s7322_s28  ;;  %s7326_s4 = scalar_lea.vmem %s5571_s27, 32 }
 0x22a   :  { %9003 = vst [vmem:[#allocation52_spill] sm:$0xff] %v8245_v50  ;;  %v8252_v45 = vpop.permute.xlu1 %805  ;;  %1215 = vperm.xlu1 %6652, %v641_v59   ;;  %v7053_v50 = vld [vmem:[#allocation3 + $0xae0] ss:$24 sps:$4 sm:$0xff]   ;;  %p7328_p4 = scmp.lt.s32.totalorder %s7326_s4, %s7322_s28 }
 0x22b   :  { %3987 = vmatmul.mubr.bf16.gmra.mrb[224].mxu1 %v7041_v41  ;;  %9005 = vst [vmem:[#allocation54_spill] sm:$0xff] %v8252_v45  ;;  %v7048_v41 = vld [vmem:[#allocation3 + $0x370] ss:$24 sps:$4 sm:$0xff]  }
 0x22c   :  { %4765 = vmatmul.mubr.bf16.gmra.mrb[68].mxu0 %v7042_v48  ;;  %3994 = vmatprep.mubr.bf16.mxu1 %v7043_v51  ;;  %p7329_p5 = por %p7328_p4, %p7327_p3 }
 0x22d   :  { %4772 = vmatprep.mubr.bf16.mxu0 %v7045_v7  ;;  %v8256_v51 = vpop.permute.xlu0 %810  ;;  %v7051_v7 = vld [vmem:[#allocation3 + $0x3a4] ss:$24 sps:$4 sm:$0xff]   ;;  %5337 = vperm.xlu0 %6651, %v5334_v12  }
 0x22e   :  { %v8247_v18 = vpop.f32.mrb[120].mxu1  ;;  %9007 = vst [vmem:[#allocation56_spill] sm:$0xff] %v8256_v51  ;;  %p7330_p6 = pnand %p7329_p5, %p7323_p2 }
 0x22f   :  { %9004 = vst [vmem:[#allocation53_spill] sm:$0xff] %v8247_v18  ;;  %v3782_v23 = vpop.f32.mrb[121].mxu1 }
 0x230   :  { %v8254_v48 = vpop.f32.mrb[122].mxu1  ;;  %v7055_v23 = vld [vmem:[#allocation3 + $0xb14] ss:$24 sps:$4 sm:$0xff]  }
 0x231   :  { %9006 = vst [vmem:[#allocation55_spill] sm:$0xff] %v8254_v48  ;;  %v3785_v30 = vpop.f32.mrb[123].mxu1 }
 0x233   :  { %3995 = vmatmul.mubr.bf16.gmra.mrb[228].mxu1 %v7047_v0  ;;  %v7059_v0 = vld [vmem:[#allocation3 + $0xb10] ss:$24 sps:$4 sm:$0xff]  }
 0x234   :  { %4773 = vmatmul.mubr.bf16.gmra.mrb[72].mxu0 %v7048_v41  ;;  %4002 = vmatprep.mubr.bf16.mxu1 %v7049_v36  ;;  %v7060_v41 = vld [vmem:[#allocation3 + $0x3d0] ss:$24 sps:$4 sm:$0xff]   ;;  %v7061_v36 = vld [vmem:[#allocation3 + $0xb44] ss:$24 sps:$4 sm:$0xff]  }
 0x235   :  { %4780 = vmatprep.mubr.bf16.mxu0 %v7051_v7 }
 0x236   :  { %v8258_v18 = vpop.f32.mrb[124].mxu1 }
 0x237   :  { %9008 = vst [vmem:[#allocation57_spill] sm:$0xff] %v8258_v18  ;;  %v3790_v45 = vpop.f32.mrb[125].mxu1  ;;  %v7063_v18 = vld [vmem:[#allocation3 + $0x404] ss:$24 sps:$4 sm:$0xff]  }
 0x238   :  { %v8260_v59 = vpop.f32.mrb[126].mxu1 }
 0x239   :  { %9009 = vst [vmem:[#allocation58_spill] sm:$0xff] %v8260_v59  ;;  %v3793_v40 = vpop.f32.mrb[127].mxu1 }
 0x23a   :  { %v7065_v40 = vld [vmem:[#allocation3 + $0xb40] ss:$24 sps:$4 sm:$0xff]  }
 0x23b   :  { %4003 = vmatmul.mubr.bf16.gmra.mrb[232].mxu1 %v7053_v50  ;;  %v7066_v50 = vld [vmem:[#allocation3 + $0x400] ss:$24 sps:$4 sm:$0xff]  }
 0x23c   :  { %4781 = vmatmul.mubr.bf16.gmra.mrb[76].mxu0 %v7054_v22  ;;  %4010 = vmatprep.mubr.bf16.mxu1 %v7055_v23 }
 0x23d   :  { %4788 = vmatprep.mubr.bf16.mxu0 %v7057_v13  ;;  %v7067_v13 = vld [vmem:[#allocation3 + $0xb74] ss:$24 sps:$4 sm:$0xff]  }
 0x23e   :  { %v8262_v30 = vpop.f32.mrb[128].mxu1 }
 0x23f   :  { %9010 = vst [vmem:[#allocation59_spill] sm:$0xff] %v8262_v30  ;;  %v3798_v12 = vpop.f32.mrb[129].mxu1  ;;  %v7069_v30 = vld [vmem:[#allocation3 + $0x434] ss:$24 sps:$4 sm:$0xff]  }
 0x240   :  { %v8264_v7 = vpop.f32.mrb[130].mxu1 }
 0x241   :  { %9011 = vst [vmem:[#allocation60_spill] sm:$0xff] %v8264_v7  ;;  %v3801_v45 = vpop.f32.mrb[131].mxu1 }
 0x243   :  { %4011 = vmatmul.mubr.bf16.gmra.mrb[236].mxu1 %v7059_v0  ;;  %v7071_v0 = vld [vmem:[#allocation3 + $0xb70] ss:$24 sps:$4 sm:$0xff]  }
 0x244   :  { %4789 = vmatmul.mubr.bf16.gmra.mrb[80].mxu0 %v7060_v41  ;;  %4018 = vmatprep.mubr.bf16.mxu1 %v7061_v36  ;;  %v7072_v36 = vld [vmem:[#allocation3 + $0x430] ss:$24 sps:$4 sm:$0xff]  }
 0x245   :  { %4796 = vmatprep.mubr.bf16.mxu0 %v7063_v18  ;;  %v7073_v18 = vld [vmem:[#allocation3 + $0xba4] ss:$24 sps:$4 sm:$0xff]  }
 0x246   :  { %v8266_v59 = vpop.f32.mrb[132].mxu1 }
 0x247   :  { %9012 = vst [vmem:[#allocation61_spill] sm:$0xff] %v8266_v59  ;;  %v3806_v22 = vpop.f32.mrb[133].mxu1  ;;  %v7075_v59 = vld [vmem:[#allocation3 + $0x464] ss:$24 sps:$4 sm:$0xff]  }
 0x248   :  { %v8268_v23 = vpop.f32.mrb[134].mxu1 }
 0x249   :  { %9013 = vst [vmem:[#allocation62_spill] sm:$0xff] %v8268_v23  ;;  %v3809_v12 = vpop.f32.mrb[135].mxu1 }
 0x24b   :  { %4019 = vmatmul.mubr.bf16.gmra.mrb[240].mxu1 %v7065_v40  ;;  %v7077_v40 = vld [vmem:[#allocation3 + $0xba0] ss:$24 sps:$4 sm:$0xff]  }
 0x24c   :  { %4797 = vmatmul.mubr.bf16.gmra.mrb[84].mxu0 %v7066_v50  ;;  %4026 = vmatprep.mubr.bf16.mxu1 %v7067_v13  ;;  %v7078_v13 = vld [vmem:[#allocation3 + $0x460] ss:$24 sps:$4 sm:$0xff]  }
 0x24d   :  { %4804 = vmatprep.mubr.bf16.mxu0 %v7069_v30  ;;  %v7079_v30 = vld [vmem:[#allocation3 + $0xbd4] ss:$24 sps:$4 sm:$0xff]  }
 0x24e   :  { %v8270_v7 = vpop.f32.mrb[136].mxu1 }
 0x24f   :  { %9014 = vst [vmem:[#allocation63_spill] sm:$0xff] %v8270_v7  ;;  %v3814_v41 = vpop.f32.mrb[137].mxu1  ;;  %v7081_v7 = vld [vmem:[#allocation3 + $0x494] ss:$24 sps:$4 sm:$0xff]  }
 0x250   :  { %v8272_v45 = vpop.f32.mrb[138].mxu1 }
 0x251   :  { %9015 = vst [vmem:[#allocation64_spill] sm:$0xff] %v8272_v45  ;;  %v3817_v22 = vpop.f32.mrb[139].mxu1 }
 0x253   :  { %4027 = vmatmul.mubr.bf16.gmra.mrb[244].mxu1 %v7071_v0  ;;  %v7083_v0 = vld [vmem:[#allocation3 + $0xbd0] ss:$24 sps:$4 sm:$0xff]  }
 0x254   :  { %4805 = vmatmul.mubr.bf16.gmra.mrb[88].mxu0 %v7072_v36  ;;  %4034 = vmatprep.mubr.bf16.mxu1 %v7073_v18  ;;  %v7084_v18 = vld [vmem:[#allocation3 + $0x490] ss:$24 sps:$4 sm:$0xff]  }
 0x255   :  { %4812 = vmatprep.mubr.bf16.mxu0 %v7075_v59  ;;  %v7087_v59 = vld [vmem:[#allocation3 + $0x75c] ss:$24 sps:$4 sm:$0xff]  }
 0x256   :  { %v8274_v23 = vpop.f32.mrb[140].mxu1 }
 0x257   :  { %9016 = vst [vmem:[#allocation65_spill] sm:$0xff] %v8274_v23  ;;  %v3822_v50 = vpop.f32.mrb[141].mxu1  ;;  %v7088_v23 = vld [vmem:[#allocation3 + $0x4c4] ss:$24 sps:$4 sm:$0xff]  }
 0x258   :  { %v8276_v12 = vpop.f32.mrb[142].mxu1 }
 0x259   :  { %9017 = vst [vmem:[#allocation66_spill] sm:$0xff] %v8276_v12  ;;  %v3825_v41 = vpop.f32.mrb[143].mxu1 }
 0x25b   :  { %4035 = vmatmul.mubr.bf16.gmra.mrb[248].mxu1 %v7077_v40  ;;  %v7085_v40 = vld [vmem:[#allocation3 + $0x758] ss:$24 sps:$4 sm:$0xff]  }
 0x25c   :  { %4813 = vmatmul.mubr.bf16.gmra.mrb[92].mxu0 %v7078_v13  ;;  %4042 = vmatprep.mubr.bf16.mxu1 %v7079_v30  ;;  %v7090_v30 = vld [vmem:[#allocation3 + $0x4c0] ss:$24 sps:$4 sm:$0xff]  }
 0x25d   :  { %4820 = vmatprep.mubr.bf16.mxu0 %v7081_v7  ;;  %v7091_v7 = vld [vmem:[#allocation3 + $0x78c] ss:$24 sps:$4 sm:$0xff]  }
 0x25e   :  { %v8278_v45 = vpop.f32.mrb[144].mxu1 }
 0x25f   :  { %9018 = vst [vmem:[#allocation67_spill] sm:$0xff] %v8278_v45  ;;  %v3830_v36 = vpop.f32.mrb[145].mxu1  ;;  %v7093_v45 = vld [vmem:[#allocation3 + $0x4f4] ss:$24 sps:$4 sm:$0xff]  }
 0x260   :  { %v8280_v22 = vpop.f32.mrb[146].mxu1 }
 0x261   :  { %9019 = vst [vmem:[#allocation68_spill] sm:$0xff] %v8280_v22  ;;  %v3833_v50 = vpop.f32.mrb[147].mxu1 }
 0x263   :  { %4043 = vmatmul.mubr.bf16.gmra.mrb[252].mxu1 %v7083_v0  ;;  %v7095_v0 = vld [vmem:[#allocation3 + $0x788] ss:$24 sps:$4 sm:$0xff]  }
 0x264   :  { %4821 = vmatmul.mubr.bf16.gmra.mrb[96].mxu0 %v7084_v18  ;;  %4395 = vmatprep.mubr.bf16.mxu1 %v7087_v59  ;;  %v7096_v59 = vld [vmem:[#allocation3 + $0x4f0] ss:$24 sps:$4 sm:$0xff]  }
 0x265   :  { %4828 = vmatprep.mubr.bf16.mxu0 %v7088_v23  ;;  %v7097_v23 = vld [vmem:[#allocation3 + $0x7bc] ss:$24 sps:$4 sm:$0xff]  }
 0x266   :  { %v8282_v12 = vpop.f32.mrb[148].mxu1 }
 0x267   :  { %9020 = vst [vmem:[#allocation69_spill] sm:$0xff] %v8282_v12  ;;  %v3838_v13 = vpop.f32.mrb[149].mxu1  ;;  %v7099_v12 = vld [vmem:[#allocation3 + $0x524] ss:$24 sps:$4 sm:$0xff]  }
 0x268   :  { %v8284_v41 = vpop.f32.mrb[150].mxu1 }
 0x269   :  { %9021 = vst [vmem:[#allocation70_spill] sm:$0xff] %v8284_v41  ;;  %v3841_v36 = vpop.f32.mrb[151].mxu1  ;;  %v7103_v41 = vld [vmem:[#allocation3 + $0x7ec] ss:$24 sps:$4 sm:$0xff]  }
 0x26b   :  { %4396 = vmatmul.mubr.bf16.vlgmr.msra.gmra.mrb[156].mxu1 %v7085_v40  ;;  %v3541_v40 = vadd.f32 %v7820_v14, %v8075_v4  ;;  %v3549_v4 = vadd.f32 %v7836_v26, %v8085_v31  ;;  %v3557_v26 = vadd.f32 %v7852_v37, %v8101_v17  ;;  %v3565_v37 = vadd.f32 %v7868_v49, %v8115_v58 }
 0x26c   :  { %4829 = vmatmul.mubr.bf16.gmra.mrb[100].mxu0 %v7090_v30  ;;  %4403 = vmatprep.mubr.bf16.mxu1 %v7091_v7  ;;  %v7101_v7 = vld [vmem:[#allocation3 + $0x7b8] ss:$24 sps:$4 sm:$0xff]   ;;  %v3573_v49 = vadd.f32 %v7884_v61, %v8125_v27  ;;  %v3581_v61 = vadd.f32 %v7900_v10, %v8139_v39  ;;  %v3589_v10 = vadd.f32 %v7904_v19, %v8149_v28 }
 0x26d   :  { %4836 = vmatprep.mubr.bf16.mxu0 %v7093_v45  ;;  %v3544_v45 = vadd.f32 %v7828_v21, %v8087_v33  ;;  %v7107_v33 = vld [vmem:[#allocation3 + $0x7e8] ss:$24 sps:$4 sm:$0xff]   ;;  %v3597_v19 = vadd.f32 %v7908_v29, %v8163_v24  ;;  %v3605_v29 = vadd.f32 %v7912_v38, %v8173_v62  ;;  %v3613_v62 = vadd.f32 %v7916_v47, %v8187_v32 }
 0x26e   :  { %v8286_v22 = vpop.f32.mrb[152].mxu1 }
 0x26f   :  { %9022 = vst [vmem:[#allocation71_spill] sm:$0xff] %v8286_v22  ;;  %v3846_v18 = vpop.f32.mrb[153].mxu1  ;;  %v7102_v22 = vld [vmem:[#allocation3 + $0x520] ss:$24 sps:$4 sm:$0xff]  }
 0x270   :  { %v8288_v50 = vpop.f32.mrb[154].mxu1 }
 0x271   :  { %9023 = vst [vmem:[#allocation72_spill] sm:$0xff] %v8288_v50  ;;  %v3849_v13 = vpop.f32.mrb[155].mxu1  ;;  %v7105_v50 = vld [vmem:[#allocation3 + $0x554] ss:$24 sps:$4 sm:$0xff]  }
 0x273   :  { %4404 = vmatmul.mubr.bf16.gmra.mrb[160].mxu1 %v7095_v0 }
 0x274   :  { %4837 = vmatmul.mubr.bf16.gmra.mrb[104].mxu0 %v7096_v59  ;;  %4411 = vmatprep.mubr.bf16.mxu1 %v7097_v23 }
 0x275   :  { %4844 = vmatprep.mubr.bf16.mxu0 %v7099_v12  ;;  %v3552_v12 = vadd.f32 %v7844_v1, %v8099_v11  ;;  %v7113_v11 = vld [vmem:[#allocation3 + $0x818] ss:$24 sps:$4 sm:$0xff]  }
 0x277   :  { %v4630_v30 = vpop.f32.mrb[0].mxu0 }
 0x278   :  { %v6133_v36 = vadd.f32 %v4630_v30, %v3541_v40  ;;  %v4632_v18 = vpop.f32.mrb[1].mxu0  ;;  %v7109_v30 = vld [vmem:[#allocation3 + $0x81c] ss:$24 sps:$4 sm:$0xff]  }
 0x279   :  { %v4633_v48 = vpop.f32.mrb[2].mxu0 }
 0x27a   :  { %v6135_v51 = vadd.f32 %v4633_v48, %v3544_v45  ;;  %v4635_v13 = vpop.f32.mrb[3].mxu0  ;;  %v5141_v0 = vmax.f32 %v6133_v36, 0.0  ;;  %v7108_v48 = vld [vmem:[#allocation3 + $0x550] ss:$24 sps:$4 sm:$0xff]   ;;  %v7111_v45 = vld [vmem:[#allocation3 + $0x584] ss:$24 sps:$4 sm:$0xff]   ;;  %v3560_v36 = vadd.f32 %v7860_v44, %v8111_v42 }
 0x27b   :  { %4412 = vmatmul.mubr.bf16.gmra.mrb[164].mxu1 %v7101_v7  ;;  %v7119_v42 = vld [vmem:[#allocation3 + $0x848] ss:$24 sps:$4 sm:$0xff]  }
 0x27c   :  { %v5142_v59 = vmax.f32 %v6135_v51, 0.0  ;;  %4845 = vmatmul.mubr.bf16.gmra.mrb[108].mxu0 %v7102_v22  ;;  %4419 = vmatprep.mubr.bf16.mxu1 %v7103_v41 }
 0x27d   :  { %4852 = vmatprep.mubr.bf16.mxu0 %v7105_v50 }
 0x27e   :  { %v8294_v14 = vpack.c.bf16 %v5142_v59, %v5141_v0  ;;  %v7114_v0 = vld [vmem:[#allocation3 + $0x580] ss:$24 sps:$4 sm:$0xff]   ;;  %v7115_v59 = vld [vmem:[#allocation3 + $0x84c] ss:$24 sps:$4 sm:$0xff]  }
 0x27f   :  { %v4638_v21 = vpop.f32.mrb[4].mxu0 }
 0x280   :  { %v6137_v23 = vadd.f32 %v4638_v21, %v3549_v4  ;;  %v4640_v40 = vpop.f32.mrb[5].mxu0  ;;  %v7117_v21 = vld [vmem:[#allocation3 + $0x5b4] ss:$24 sps:$4 sm:$0xff]  }
 0x281   :  { %v4641_v7 = vpop.f32.mrb[6].mxu0 }
 0x282   :  { %v6139_v51 = vadd.f32 %v4641_v7, %v3552_v12  ;;  %v4643_v22 = vpop.f32.mrb[7].mxu0  ;;  %v5143_v41 = vmax.f32 %v6137_v23, 0.0 }
 0x283   :  { %4420 = vmatmul.mubr.bf16.gmra.mrb[168].mxu1 %v7107_v33 }
 0x284   :  { %v5144_v50 = vmax.f32 %v6139_v51, 0.0  ;;  %4853 = vmatmul.mubr.bf16.gmra.mrb[112].mxu0 %v7108_v48  ;;  %4427 = vmatprep.mubr.bf16.mxu1 %v7109_v30  ;;  %v3568_v48 = vadd.f32 %v7876_v56, %v8123_v15  ;;  %v7121_v51 = vld [vmem:[#allocation3 + $0x87c] ss:$24 sps:$4 sm:$0xff]   ;;  %v7125_v15 = vld [vmem:[#allocation3 + $0x878] ss:$24 sps:$4 sm:$0xff]  }
 0x285   :  { %4860 = vmatprep.mubr.bf16.mxu0 %v7111_v45  ;;  %v7120_v45 = vld [vmem:[#allocation3 + $0x5b0] ss:$24 sps:$4 sm:$0xff]  }
 0x286   :  { %v8302_v31 = vpack.c.bf16 %v5144_v50, %v5143_v41  ;;  %v7123_v41 = vld [vmem:[#allocation3 + $0x5e4] ss:$24 sps:$4 sm:$0xff]  }
 0x287   :  { %v4646_v1 = vpop.f32.mrb[8].mxu0 }
 0x288   :  { %v6141_v18 = vadd.f32 %v4646_v1, %v3557_v26  ;;  %v4648_v13 = vpop.f32.mrb[9].mxu0 }
 0x289   :  { %v4649_v4 = vpop.f32.mrb[10].mxu0 }
 0x28a   :  { %v6143_v33 = vadd.f32 %v4649_v4, %v3560_v36  ;;  %v4651_v12 = vpop.f32.mrb[11].mxu0  ;;  %v5145_v23 = vmax.f32 %v6141_v18, 0.0  ;;  %v3576_v36 = vadd.f32 %v7892_v5, %v8135_v2  ;;  %v7131_v2 = vld [vmem:[#allocation3 + $0x8a8] ss:$24 sps:$4 sm:$0xff]  }
 0x28b   :  { %4428 = vmatmul.mubr.bf16.gmra.mrb[172].mxu1 %v7113_v11 }
 0x28c   :  { %v5146_v40 = vmax.f32 %v6143_v33, 0.0  ;;  %4861 = vmatmul.mubr.bf16.gmra.mrb[116].mxu0 %v7114_v0  ;;  %4435 = vmatprep.mubr.bf16.mxu1 %v7115_v59  ;;  %v7126_v0 = vld [vmem:[#allocation3 + $0x5e0] ss:$24 sps:$4 sm:$0xff]   ;;  %v7127_v59 = vld [vmem:[#allocation3 + $0x8ac] ss:$24 sps:$4 sm:$0xff]  }
 0x28d   :  { %4868 = vmatprep.mubr.bf16.mxu0 %v7117_v21  ;;  %v7129_v21 = vld [vmem:[#allocation3 + $0x614] ss:$24 sps:$4 sm:$0xff]  }
 0x28e   :  { %v8308_v17 = vpack.c.bf16 %v5146_v40, %v5145_v23 }
 0x28f   :  { %v4654_v44 = vpop.f32.mrb[12].mxu0 }
 0x290   :  { %v6145_v30 = vadd.f32 %v4654_v44, %v3565_v37  ;;  %v4656_v7 = vpop.f32.mrb[13].mxu0  ;;  %v3584_v37 = vadd.f32 %v7902_v16, %v8147_v8  ;;  %v7137_v8 = vld [vmem:[#allocation3 + $0x8d8] ss:$24 sps:$4 sm:$0xff]  }
 0x291   :  { %v4657_v22 = vpop.f32.mrb[14].mxu0 }
 0x292   :  { %v6147_v50 = vadd.f32 %v4657_v22, %v3568_v48  ;;  %v4659_v26 = vpop.f32.mrb[15].mxu0  ;;  %v5147_v1 = vmax.f32 %v6145_v30, 0.0  ;;  %v7132_v48 = vld [vmem:[#allocation3 + $0x610] ss:$24 sps:$4 sm:$0xff]   ;;  %v7133_v30 = vld [vmem:[#allocation3 + $0x8dc] ss:$24 sps:$4 sm:$0xff]  }
 0x293   :  { %4436 = vmatmul.mubr.bf16.gmra.mrb[176].mxu1 %v7119_v42  ;;  %v3592_v26 = vadd.f32 %v7906_v25, %v8159_v52  ;;  %v7143_v52 = vld [vmem:[#allocation3 + $0x908] ss:$24 sps:$4 sm:$0xff]  }
 0x294   :  { %v5148_v11 = vmax.f32 %v6147_v50, 0.0  ;;  %4869 = vmatmul.mubr.bf16.gmra.mrb[120].mxu0 %v7120_v45  ;;  %4443 = vmatprep.mubr.bf16.mxu1 %v7121_v51  ;;  %v7135_v45 = vld [vmem:[#allocation3 + $0x644] ss:$24 sps:$4 sm:$0xff]  }
 0x295   :  { %4876 = vmatprep.mubr.bf16.mxu0 %v7123_v41 }
 0x296   :  { %v8314_v58 = vpack.c.bf16 %v5148_v11, %v5147_v1 }
 0x297   :  { %v4662_v56 = vpop.f32.mrb[16].mxu0 }
 0x298   :  { %v6149_v18 = vadd.f32 %v4662_v56, %v3573_v49  ;;  %v4664_v13 = vpop.f32.mrb[17].mxu0  ;;  %v7138_v49 = vld [vmem:[#allocation3 + $0x640] ss:$24 sps:$4 sm:$0xff]   ;;  %v7139_v56 = vld [vmem:[#allocation3 + $0x90c] ss:$24 sps:$4 sm:$0xff]  }
 0x299   :  { %v4665_v4 = vpop.f32.mrb[18].mxu0 }
 0x29a   :  { %v6151_v33 = vadd.f32 %v4665_v4, %v3576_v36  ;;  %v4667_v12 = vpop.f32.mrb[19].mxu0  ;;  %v5149_v23 = vmax.f32 %v6149_v18, 0.0  ;;  %v7141_v36 = vld [vmem:[#allocation3 + $0x674] ss:$24 sps:$4 sm:$0xff]   ;;  %v3600_v4 = vadd.f32 %v7910_v34, %v8171_v20  ;;  %v7149_v20 = vld [vmem:[#allocation3 + $0x938] ss:$24 sps:$4 sm:$0xff]  }
 0x29b   :  { %4444 = vmatmul.mubr.bf16.gmra.mrb[180].mxu1 %v7125_v15  ;;  %v7144_v12 = vld [vmem:[#allocation3 + $0x670] ss:$24 sps:$4 sm:$0xff]  }
 0x29c   :  { %v5150_v40 = vmax.f32 %v6151_v33, 0.0  ;;  %4877 = vmatmul.mubr.bf16.gmra.mrb[124].mxu0 %v7126_v0  ;;  %4451 = vmatprep.mubr.bf16.mxu1 %v7127_v59 }
 0x29d   :  { %4884 = vmatprep.mubr.bf16.mxu0 %v7129_v21 }
 0x29e   :  { %v8320_v27 = vpack.c.bf16 %v5150_v40, %v5149_v23  ;;  %v7145_v23 = vld [vmem:[#allocation3 + $0x93c] ss:$24 sps:$4 sm:$0xff]  }
 0x29f   :  { %v4670_v5 = vpop.f32.mrb[20].mxu0 }
 0x2a0   :  { %v6153_v44 = vadd.f32 %v4670_v5, %v3581_v61  ;;  %v4672_v42 = vpop.f32.mrb[21].mxu0  ;;  %v7147_v61 = vld [vmem:[#allocation3 + $0x6a4] ss:$24 sps:$4 sm:$0xff]  }
 0x2a1   :  { %v4673_v7 = vpop.f32.mrb[22].mxu0  ;;  %v3608_v42 = vadd.f32 %v7914_v43, %v8183_v60 }
 0x2a2   :  { %v6155_v51 = vadd.f32 %v4673_v7, %v3584_v37  ;;  %v4675_v22 = vpop.f32.mrb[23].mxu0  ;;  %v5151_v41 = vmax.f32 %v6153_v44, 0.0  ;;  %v7150_v7 = vld [vmem:[#allocation3 + $0x6a0] ss:$24 sps:$4 sm:$0xff]  }
 0x2a3   :  { %4452 = vmatmul.mubr.bf16.gmra.mrb[184].mxu1 %v7131_v2  ;;  %v7153_v22 = vld [vmem:[#allocation3 + $0x6d4] ss:$24 sps:$4 sm:$0xff]  }
 0x2a4   :  { %v5152_v50 = vmax.f32 %v6155_v51, 0.0  ;;  %4885 = vmatmul.mubr.bf16.gmra.mrb[128].mxu0 %v7132_v48  ;;  %4459 = vmatprep.mubr.bf16.mxu1 %v7133_v30 }
 0x2a5   :  { %4892 = vmatprep.mubr.bf16.mxu0 %v7135_v45  ;;  %v7151_v45 = vld [vmem:[#allocation3 + $0x96c] ss:$24 sps:$4 sm:$0xff]  }
 0x2a6   :  { %v8326_v39 = vpack.c.bf16 %v5152_v50, %v5151_v41 }
 0x2a7   :  { %v4678_v16 = vpop.f32.mrb[24].mxu0 }
 0x2a8   :  { %v6157_v1 = vadd.f32 %v4678_v16, %v3589_v10  ;;  %v4680_v11 = vpop.f32.mrb[25].mxu0  ;;  %v8342_v10 = vpop.permute.xlu0 %820 }
 0x2a9   :  { %v4681_v15 = vpop.f32.mrb[26].mxu0 }
 0x2aa   :  { %v6159_v18 = vadd.f32 %v4681_v15, %v3592_v26  ;;  %v4683_v13 = vpop.f32.mrb[27].mxu0  ;;  %v5153_v0 = vmax.f32 %v6157_v1, 0.0  ;;  %v3616_v26 = vadd.f32 %v7918_v53, %v8195_v35  ;;  %v3621_v53 = vadd.f32 %v7920_v57, %v8197_v54 }
 0x2ab   :  { %4460 = vmatmul.mubr.bf16.gmra.mrb[188].mxu1 %v7137_v8  ;;  %v7155_v8 = vld [vmem:[#allocation3 + $0x968] ss:$24 sps:$4 sm:$0xff]  }
 0x2ac   :  { %v5154_v59 = vmax.f32 %v6159_v18, 0.0  ;;  %4893 = vmatmul.mubr.bf16.gmra.mrb[132].mxu0 %v7138_v49  ;;  %4467 = vmatprep.mubr.bf16.mxu1 %v7139_v56  ;;  %v7156_v49 = vld [vmem:[#allocation3 + $0x6d0] ss:$24 sps:$4 sm:$0xff]   ;;  %v7157_v56 = vld [vmem:[#allocation3 + $0x99c] ss:$24 sps:$4 sm:$0xff]   ;;  %v8349_v18 = vpop.permute.xlu0 %905 }
 0x2ad   :  { %4900 = vmatprep.mubr.bf16.mxu0 %v7141_v36  ;;  %v7159_v36 = vld [vmem:[#allocation3 + $0x704] ss:$24 sps:$4 sm:$0xff]  }
 0x2ae   :  { %v8332_v28 = vpack.c.bf16 %v5154_v59, %v5153_v0 }
 0x2af   :  { %v4686_v25 = vpop.f32.mrb[28].mxu0 }
 0x2b0   :  { %v6161_v21 = vadd.f32 %v4686_v25, %v3597_v19  ;;  %v4688_v33 = vpop.f32.mrb[29].mxu0  ;;  %v7161_v19 = vld [vmem:[#allocation3 + $0x998] ss:$24 sps:$4 sm:$0xff]   ;;  %v8355_v25 = vpop.permute.xlu0 %910 }
 0x2b1   :  { %v4689_v40 = vpop.f32.mrb[30].mxu0  ;;  %v7163_v33 = vld [vmem:[#allocation3 + $0x9cc] ss:$24 sps:$4 sm:$0xff]  }
 0x2b2   :  { %v6163_v5 = vadd.f32 %v4689_v40, %v3600_v4  ;;  %v4691_v2 = vpop.f32.mrb[31].mxu0  ;;  %v5155_v37 = vmax.f32 %v6161_v21, 0.0  ;;  %v7162_v21 = vld [vmem:[#allocation3 + $0x700] ss:$24 sps:$4 sm:$0xff]  }
 0x2b3   :  { %4468 = vmatmul.mubr.bf16.gmra.mrb[192].mxu1 %v7143_v52 }
 0x2b4   :  { %v5156_v44 = vmax.f32 %v6163_v5, 0.0  ;;  %4901 = vmatmul.mubr.bf16.gmra.mrb[136].mxu0 %v7144_v12  ;;  %4475 = vmatprep.mubr.bf16.mxu1 %v7145_v23  ;;  %v7165_v23 = vld [vmem:[#allocation3 + $0x734] ss:$24 sps:$4 sm:$0xff]   ;;  %v8358_v5 = vpop.permute.xlu1 %815 }
 0x2b5   :  { %4908 = vmatprep.mubr.bf16.mxu0 %v7147_v61 }
 0x2b6   :  { %v8338_v24 = vpack.c.bf16 %v5156_v44, %v5155_v37  ;;  %v7167_v44 = vld [vmem:[#allocation3 + $0x9c8] ss:$24 sps:$4 sm:$0xff]  }
 0x2b7   :  { %v4694_v34 = vpop.f32.mrb[32].mxu0 }
 0x2b8   :  { %v6165_v48 = vadd.f32 %v4694_v34, %v3605_v29  ;;  %v4696_v30 = vpop.f32.mrb[33].mxu0 }
 0x2b9   :  { %v4697_v51 = vpop.f32.mrb[34].mxu0  ;;  %v7171_v30 = vld [vmem:[#allocation3 + $0x764] ss:$24 sps:$4 sm:$0xff]  }
 0x2ba   :  { %v6167_v41 = vadd.f32 %v4697_v51, %v3608_v42  ;;  %v4699_v50 = vpop.f32.mrb[35].mxu0  ;;  %v5157_v16 = vmax.f32 %v6165_v48, 0.0  ;;  %v7169_v42 = vld [vmem:[#allocation3 + $0x9fc] ss:$24 sps:$4 sm:$0xff]  }
 0x2bb   :  { %4476 = vmatmul.mubr.bf16.gmra.mrb[196].mxu1 %v7149_v20  ;;  %v7168_v20 = vld [vmem:[#allocation3 + $0x730] ss:$24 sps:$4 sm:$0xff]  }
 0x2bc   :  { %v5158_v38 = vmax.f32 %v6167_v41, 0.0  ;;  %4909 = vmatmul.mubr.bf16.gmra.mrb[140].mxu0 %v7150_v7  ;;  %4483 = vmatprep.mubr.bf16.mxu1 %v7151_v45 }
 0x2bd   :  { %4916 = vmatprep.mubr.bf16.mxu0 %v7153_v22 }
 0x2be   :  { %v5278_v43 = vpack.c.bf16 %v5158_v38, %v5157_v16  ;;  %v7173_v38 = vld [vmem:[#allocation3 + $0x9f8] ss:$24 sps:$4 sm:$0xff]  }
 0x2bf   :  { %v4702_v60 = vpop.f32.mrb[36].mxu0 }
 0x2c0   :  { %v6169_v1 = vadd.f32 %v4702_v60, %v3613_v62  ;;  %v4704_v11 = vpop.f32.mrb[37].mxu0  ;;  %6012 = vmatprep.subr.bf16.mxu1 %v5278_v43  ;;  %v9027_v62 = vld [vmem:[#allocation13_spill] sm:$0xff] }
 0x2c1   :  { %v4705_v15 = vpop.f32.mrb[38].mxu0  ;;  %6013 = vmatpush3.bf16.msra.mxu1 %v8294_v14  ;;  %v3624_v14 = vadd.f32 %v7922_v63, %v8207_v6  ;;  %v3629_v63 = vadd.f32 %v7924_v3, %v8211_v46  ;;  %v8362_v6 = vpop.permute.xlu0 %830 }
 0x2c2   :  { %v6171_v13 = vadd.f32 %v4705_v15, %v3616_v26  ;;  %v4707_v0 = vpop.f32.mrb[39].mxu0  ;;  %v5159_v47 = vmax.f32 %v6169_v1, 0.0  ;;  %v8367_v3 = vpop.permute.xlu1 %900  ;;  %v7174_v26 = vld [vmem:[#allocation3 + $0x760] ss:$24 sps:$4 sm:$0xff]   ;;  %v7175_v1 = vld [vmem:[#allocation3 + $0xa2c] ss:$24 sps:$4 sm:$0xff]  }
 0x2c3   :  { %4484 = vmatmul.mubr.bf16.gmra.mrb[200].mxu1 %v7155_v8 }
 0x2c4   :  { %v5160_v32 = vmax.f32 %v6171_v13, 0.0  ;;  %4917 = vmatmul.mubr.bf16.gmra.mrb[144].mxu0 %v7156_v49  ;;  %4491 = vmatprep.mubr.bf16.mxu1 %v7157_v56  ;;  %v7177_v56 = vld [vmem:[#allocation3 + $0x794] ss:$24 sps:$4 sm:$0xff]  }
 0x2c5   :  { %4924 = vmatprep.mubr.bf16.mxu0 %v7159_v36  ;;  %v8369_v46 = vpop.permute.xlu0 %920 }
 0x2c6   :  { %v5279_v35 = vpack.c.bf16 %v5160_v32, %v5159_v47  ;;  %v8375_v11 = vpop.permute.xlu1 %825  ;;  %v9028_v32 = vld [vmem:[#allocation50_spill] sm:$0xff] }
 0x2c7   :  { %v4710_v59 = vpop.f32.mrb[40].mxu0 }
 0x2c8   :  { %v6173_v52 = vadd.f32 %v4710_v59, %v3621_v53  ;;  %v4712_v4 = vpop.f32.mrb[41].mxu0  ;;  %6014 = vmatprep.subr.bf16.mxu1 %v5279_v35  ;;  %v9029_v53 = vld [vmem:[#allocation14_spill] sm:$0xff] }
 0x2c9   :  { %v4713_v12 = vpop.f32.mrb[42].mxu0  ;;  %6015 = vmatpush3.bf16.msra.mxu1 %v8302_v31  ;;  %v3632_v31 = vadd.f32 %v7926_v9, %v8219_v55  ;;  %v9024_v9 = vld [vmem:[#allocation46_spill] sm:$0xff]  ;;  %v9025_v55 = vld [vmem:[#allocation12_spill] sm:$0xff]  ;;  %v8378_v15 = vpop.permute.xlu0 %840  ;;  %v3645_v35 = vadd.f32 %v9029_v53, %v9028_v32  ;;  %v9031_v4 = vld [vmem:[#allocation15_spill] sm:$0xff] }
 0x2ca   :  { %v6175_v40 = vadd.f32 %v4713_v12, %v3624_v14  ;;  %v4715_v61 = vpop.f32.mrb[43].mxu0  ;;  %v5161_v57 = vmax.f32 %v6173_v52, 0.0  ;;  %v3637_v41 = vadd.f32 %v9025_v55, %v9024_v9  ;;  %v7179_v52 = vld [vmem:[#allocation3 + $0xa28] ss:$24 sps:$4 sm:$0xff]  }
 0x2cb   :  { %4492 = vmatmul.mubr.bf16.gmra.mrb[204].mxu1 %v7161_v19  ;;  %v8382_v19 = vpop.permute.xlu1 %915  ;;  %v7181_v61 = vld [vmem:[#allocation3 + $0xa5c] ss:$24 sps:$4 sm:$0xff]   ;;  %v7186_v55 = vld [vmem:[#allocation3 + $0x7c0] ss:$24 sps:$4 sm:$0xff]   ;;  %v7192_v53 = vld [vmem:[#allocation3 + $0x7f0] ss:$24 sps:$4 sm:$0xff]  }
 0x2cc   :  { %v5162_v54 = vmax.f32 %v6175_v40, 0.0  ;;  %4925 = vmatmul.mubr.bf16.gmra.mrb[148].mxu0 %v7162_v21  ;;  %4499 = vmatprep.mubr.bf16.mxu1 %v7163_v33  ;;  %v7180_v40 = vld [vmem:[#allocation3 + $0x790] ss:$24 sps:$4 sm:$0xff]  }
 0x2cd   :  { %4932 = vmatprep.mubr.bf16.mxu0 %v7165_v23  ;;  %v8386_v33 = vpop.permute.xlu0 %930 }
 0x2ce   :  { %v5280_v2 = vpack.c.bf16 %v5162_v54, %v5161_v57  ;;  %v7183_v54 = vld [vmem:[#allocation3 + $0x7c4] ss:$24 sps:$4 sm:$0xff]  }
 0x2cf   :  { %v4718_v37 = vpop.f32.mrb[44].mxu0 }
 0x2d0   :  { %v6177_v29 = vadd.f32 %v4718_v37, %v3629_v63  ;;  %v4720_v34 = vpop.f32.mrb[45].mxu0  ;;  %6016 = vmatprep.subr.bf16.mxu1 %v5280_v2 }
 0x2d1   :  { %v4721_v48 = vpop.f32.mrb[46].mxu0  ;;  %6017 = vmatpush3.bf16.msra.mxu1 %v8308_v17  ;;  %v9026_v17 = vld [vmem:[#allocation48_spill] sm:$0xff] }
 0x2d2   :  { %v6179_v7 = vadd.f32 %v4721_v48, %v3632_v31  ;;  %v4723_v45 = vpop.f32.mrb[47].mxu0  ;;  %v5163_v51 = vmax.f32 %v6177_v29, 0.0  ;;  %v3640_v43 = vadd.f32 %v9027_v62, %v9026_v17  ;;  %v8389_v31 = vpop.permute.xlu1 %835  ;;  %v9032_v29 = vld [vmem:[#allocation52_spill] sm:$0xff] }
 0x2d3   :  { %4500 = vmatmul.mubr.bf16.gmra.mrb[208].mxu1 %v7167_v44  ;;  %v9033_v34 = vld [vmem:[#allocation16_spill] sm:$0xff]  ;;  %v9035_v45 = vld [vmem:[#allocation17_spill] sm:$0xff] }
 0x2d4   :  { %v5164_v22 = vmax.f32 %v6179_v7, 0.0  ;;  %4933 = vmatmul.mubr.bf16.gmra.mrb[152].mxu0 %v7168_v20  ;;  %4507 = vmatprep.mubr.bf16.mxu1 %v7169_v42  ;;  %v3653_v20 = vadd.f32 %v9033_v34, %v9032_v29  ;;  %v8393_v42 = vpop.permute.xlu0 %850  ;;  %v7185_v7 = vld [vmem:[#allocation3 + $0xa58] ss:$24 sps:$4 sm:$0xff]  }
 0x2d5   :  { %4940 = vmatprep.mubr.bf16.mxu0 %v7171_v30  ;;  %v7198_v34 = vld [vmem:[#allocation3 + $0x820] ss:$24 sps:$4 sm:$0xff]  }
 0x2d6   :  { %v5281_v50 = vpack.c.bf16 %v5164_v22, %v5163_v51  ;;  %v8398_v62 = vpop.permute.xlu1 %925 }
 0x2d7   :  { %v4726_v16 = vpop.f32.mrb[48].mxu0 }
 0x2d8   :  { %v6181_v60 = vadd.f32 %v4726_v16, %v3637_v41  ;;  %v4728_v8 = vpop.f32.mrb[49].mxu0  ;;  %6018 = vmatprep.subr.bf16.mxu1 %v5281_v50  ;;  %v7187_v41 = vld [vmem:[#allocation3 + $0xa8c] ss:$24 sps:$4 sm:$0xff]  }
 0x2d9   :  { %v4729_v49 = vpop.f32.mrb[50].mxu0  ;;  %6019 = vmatpush3.bf16.msra.mxu1 %v8314_v58  ;;  %v9030_v58 = vld [vmem:[#allocation51_spill] sm:$0xff]  ;;  %v7189_v16 = vld [vmem:[#allocation3 + $0x7f4] ss:$24 sps:$4 sm:$0xff]  }
 0x2da   :  { %v6183_v36 = vadd.f32 %v4729_v49, %v3640_v43  ;;  %v4731_v13 = vpop.f32.mrb[51].mxu0  ;;  %v5165_v0 = vmax.f32 %v6181_v60, 0.0  ;;  %v3648_v21 = vadd.f32 %v9031_v4, %v9030_v58  ;;  %v8400_v43 = vpop.permute.xlu0 %940 }
 0x2db   :  { %4508 = vmatmul.mubr.bf16.gmra.mrb[212].mxu1 %v7173_v38  ;;  %v7191_v13 = vld [vmem:[#allocation3 + $0xa88] ss:$24 sps:$4 sm:$0xff]  }
 0x2dc   :  { %v5166_v47 = vmax.f32 %v6183_v36, 0.0  ;;  %4941 = vmatmul.mubr.bf16.gmra.mrb[156].mxu0 %v7174_v26  ;;  %4515 = vmatprep.mubr.bf16.mxu1 %v7175_v1  ;;  %v9036_v26 = vld [vmem:[#allocation56_spill] sm:$0xff]  ;;  %v9037_v1 = vld [vmem:[#allocation18_spill] sm:$0xff] }
 0x2dd   :  { %4948 = vmatprep.mubr.bf16.mxu0 %v7177_v56  ;;  %v3661_v49 = vadd.f32 %v9037_v1, %v9036_v26  ;;  %v7207_v1 = vld [vmem:[#allocation3 + $0x884] ss:$24 sps:$4 sm:$0xff]  }
 0x2de   :  { %v5282_v59 = vpack.c.bf16 %v5166_v47, %v5165_v0  ;;  %v8409_v58 = vpop.permute.xlu0 %860 }
 0x2df   :  { %v4734_v14 = vpop.f32.mrb[52].mxu0 }
 0x2e0   :  { %v6185_v12 = vadd.f32 %v4734_v14, %v3645_v35  ;;  %v4736_v23 = vpop.f32.mrb[53].mxu0  ;;  %6020 = vmatprep.subr.bf16.mxu1 %v5282_v59  ;;  %v7193_v35 = vld [vmem:[#allocation3 + $0xabc] ss:$24 sps:$4 sm:$0xff]   ;;  %v8406_v59 = vpop.permute.xlu1 %845 }
 0x2e1   :  { %v4737_v57 = vpop.f32.mrb[54].mxu0  ;;  %6021 = vmatpush3.bf16.msra.mxu1 %v8320_v27  ;;  %v9034_v27 = vld [vmem:[#allocation54_spill] sm:$0xff] }
 0x2e2   :  { %v6187_v63 = vadd.f32 %v4737_v57, %v3648_v21  ;;  %v4739_v2 = vpop.f32.mrb[55].mxu0  ;;  %v5167_v37 = vmax.f32 %v6185_v12, 0.0  ;;  %v3656_v51 = vadd.f32 %v9035_v45, %v9034_v27 }
 0x2e3   :  { %4516 = vmatmul.mubr.bf16.gmra.mrb[216].mxu1 %v7179_v52  ;;  %v7195_v52 = vld [vmem:[#allocation3 + $0x824] ss:$24 sps:$4 sm:$0xff]  }
 0x2e4   :  { %v5168_v44 = vmax.f32 %v6187_v63, 0.0  ;;  %4949 = vmatmul.mubr.bf16.gmra.mrb[160].mxu0 %v7180_v40  ;;  %4523 = vmatprep.mubr.bf16.mxu1 %v7181_v61  ;;  %v8413_v57 = vpop.permute.xlu1 %935  ;;  %v7197_v63 = vld [vmem:[#allocation3 + $0xab8] ss:$24 sps:$4 sm:$0xff]  }
 0x2e5   :  { %4956 = vmatprep.mubr.bf16.mxu0 %v7183_v54 }
 0x2e6   :  { %v5283_v48 = vpack.c.bf16 %v5168_v44, %v5167_v37  ;;  %v8417_v37 = vpop.permute.xlu0 %950 }
 0x2e7   :  { %v4742_v30 = vpop.f32.mrb[56].mxu0 }
 0x2e8   :  { %v6189_v22 = vadd.f32 %v4742_v30, %v3653_v20  ;;  %v4744_v9 = vpop.f32.mrb[57].mxu0  ;;  %6022 = vmatprep.subr.bf16.mxu1 %v5283_v48  ;;  %v7199_v20 = vld [vmem:[#allocation3 + $0xaec] ss:$24 sps:$4 sm:$0xff]  }
 0x2e9   :  { %v4745_v50 = vpop.f32.mrb[58].mxu0  ;;  %6023 = vmatpush3.bf16.msra.mxu1 %v8326_v39  ;;  %v9038_v39 = vld [vmem:[#allocation19_spill] sm:$0xff]  ;;  %v7201_v30 = vld [vmem:[#allocation3 + $0x854] ss:$24 sps:$4 sm:$0xff]  }
 0x2ea   :  { %v6191_v38 = vadd.f32 %v4745_v50, %v3656_v51  ;;  %v4747_v17 = vpop.f32.mrb[59].mxu0  ;;  %v5169_v60 = vmax.f32 %v6189_v22, 0.0  ;;  %v3664_v0 = vadd.f32 %v9038_v39, %v8358_v5  ;;  %v9039_v5 = vld [vmem:[#allocation20_spill] sm:$0xff]  ;;  %v856_v51 = vpop.permute.xlu1 %855 }
 0x2eb   :  { %4524 = vmatmul.mubr.bf16.gmra.mrb[220].mxu1 %v7185_v7  ;;  %v3669_v40 = vadd.f32 %v9039_v5, %v8342_v10  ;;  %v8422_v9 = vpop.permute.xlu0 %870  ;;  %v7203_v50 = vld [vmem:[#allocation3 + $0xae8] ss:$24 sps:$4 sm:$0xff]  }
 0x2ec   :  { %v5170_v8 = vmax.f32 %v6191_v38, 0.0  ;;  %4957 = vmatmul.mubr.bf16.gmra.mrb[164].mxu0 %v7186_v55  ;;  %4531 = vmatprep.mubr.bf16.mxu1 %v7187_v41 }
 0x2ed   :  { %4964 = vmatprep.mubr.bf16.mxu0 %v7189_v16 }
 0x2ee   :  { %v5284_v56 = vpack.c.bf16 %v5170_v8, %v5169_v60  ;;  %v7204_v60 = vld [vmem:[#allocation3 + $0x850] ss:$24 sps:$4 sm:$0xff]   ;;  %v7205_v8 = vld [vmem:[#allocation3 + $0xb1c] ss:$24 sps:$4 sm:$0xff]  }
 0x2ef   :  { %v4750_v36 = vpop.f32.mrb[60].mxu0 }
 0x2f0   :  { %v6193_v47 = vadd.f32 %v4750_v36, %v3661_v49  ;;  %v4752_v32 = vpop.f32.mrb[61].mxu0  ;;  %6024 = vmatprep.subr.bf16.mxu1 %v5284_v56  ;;  %v8428_v36 = vpop.permute.xlu1 %945 }
 0x2f1   :  { %v4753_v14 = vpop.f32.mrb[62].mxu0  ;;  %6025 = vmatpush3.bf16.msra.mxu1 %v8332_v28  ;;  %v9040_v28 = vld [vmem:[#allocation21_spill] sm:$0xff] }
 0x2f2   :  { %v6195_v4 = vadd.f32 %v4753_v14, %v3664_v0  ;;  %v4755_v21 = vpop.f32.mrb[63].mxu0  ;;  %v5171_v12 = vmax.f32 %v6193_v47, 0.0  ;;  %v3672_v2 = vadd.f32 %v9040_v28, %v8375_v11  ;;  %v9041_v11 = vld [vmem:[#allocation22_spill] sm:$0xff] }
 0x2f3   :  { %4532 = vmatmul.mubr.bf16.gmra.mrb[224].mxu1 %v7191_v13  ;;  %v3677_v22 = vadd.f32 %v9041_v11, %v8362_v6  ;;  %v8430_v6 = vpop.permute.xlu0 %960  ;;  %v7210_v21 = vld [vmem:[#allocation3 + $0x880] ss:$24 sps:$4 sm:$0xff]   ;;  %v7217_v11 = vld [vmem:[#allocation3 + $0xb7c] ss:$24 sps:$4 sm:$0xff]  }
 0x2f4   :  { %v5172_v23 = vmax.f32 %v6195_v4, 0.0  ;;  %4965 = vmatmul.mubr.bf16.gmra.mrb[168].mxu0 %v7192_v53  ;;  %4539 = vmatprep.mubr.bf16.mxu1 %v7193_v35  ;;  %v7209_v53 = vld [vmem:[#allocation3 + $0xb18] ss:$24 sps:$4 sm:$0xff]  }
 0x2f5   :  { %4972 = vmatprep.mubr.bf16.mxu0 %v7195_v52  ;;  %v9044_v35 = vld [vmem:[#allocation25_spill] sm:$0xff] }
 0x2f6   :  { %v5285_v61 = vpack.c.bf16 %v5172_v23, %v5171_v12  ;;  %v3688_v14 = vadd.f32 %v9044_v35, %v8406_v59  ;;  %v7211_v12 = vld [vmem:[#allocation3 + $0xb4c] ss:$24 sps:$4 sm:$0xff]   ;;  %v866_v23 = vpop.permute.xlu1 %865 }
 0x2f7   :  { %v4758_v54 = vpop.f32.mrb[64].mxu0  ;;  %v7223_v35 = vld [vmem:[#allocation3 + $0xbac] ss:$24 sps:$4 sm:$0xff]  }
 0x2f8   :  { %v6197_v44 = vadd.f32 %v4758_v54, %v3669_v40  ;;  %v4760_v29 = vpop.f32.mrb[65].mxu0  ;;  %6026 = vmatprep.subr.bf16.mxu1 %v5285_v61  ;;  %v7213_v40 = vld [vmem:[#allocation3 + $0x8b4] ss:$24 sps:$4 sm:$0xff]   ;;  %v8438_v61 = vpop.permute.xlu0 %880 }
 0x2f9   :  { %v4761_v48 = vpop.f32.mrb[66].mxu0  ;;  %6027 = vmatpush3.bf16.msra.mxu1 %v8338_v24  ;;  %v9042_v24 = vld [vmem:[#allocation23_spill] sm:$0xff] }
 0x2fa   :  { %v6199_v10 = vadd.f32 %v4761_v48, %v3672_v2  ;;  %v4763_v7 = vpop.f32.mrb[67].mxu0  ;;  %v5173_v27 = vmax.f32 %v6197_v44, 0.0  ;;  %v3680_v16 = vadd.f32 %v9042_v24, %v8389_v31  ;;  %v9043_v31 = vld [vmem:[#allocation24_spill] sm:$0xff]  ;;  %v9045_v2 = vld [vmem:[#allocation26_spill] sm:$0xff]  ;;  %v8444_v29 = vpop.permute.xlu1 %955  ;;  %v9046_v48 = vld [vmem:[#allocation27_spill] sm:$0xff] }
 0x2fb   :  { %4540 = vmatmul.mubr.bf16.gmra.mrb[228].mxu1 %v7197_v63  ;;  %v3685_v0 = vadd.f32 %v9043_v31, %v8378_v15  ;;  %v3693_v59 = vadd.f32 %v9045_v2, %v8393_v42 }
 0x2fc   :  { %v5174_v45 = vmax.f32 %v6199_v10, 0.0  ;;  %4973 = vmatmul.mubr.bf16.gmra.mrb[172].mxu0 %v7198_v34  ;;  %4547 = vmatprep.mubr.bf16.mxu1 %v7199_v20  ;;  %v7215_v20 = vld [vmem:[#allocation3 + $0xb48] ss:$24 sps:$4 sm:$0xff]   ;;  %v8447_v10 = vpop.permute.xlu0 %970 }
 0x2fd   :  { %4980 = vmatprep.mubr.bf16.mxu0 %v7201_v30  ;;  %v3696_v30 = vadd.f32 %v9046_v48, %v856_v51  ;;  %v9047_v51 = vld [vmem:[#allocation28_spill] sm:$0xff]  ;;  %v9052_v48 = vld [vmem:[#allocation31_spill] sm:$0xff] }
 0x2fe   :  { %v8424_v55 = vpack.c.bf16 %v5174_v45, %v5173_v27  ;;  %v7216_v45 = vld [vmem:[#allocation3 + $0x8b0] ss:$24 sps:$4 sm:$0xff]  }
 0x2ff   :  { %v4766_v41 = vpop.f32.mrb[68].mxu0 }
 0x300   :  { %v6201_v38 = vadd.f32 %v4766_v41, %v3677_v22  ;;  %v4768_v17 = vpop.f32.mrb[69].mxu0  ;;  %v7219_v41 = vld [vmem:[#allocation3 + $0x8e4] ss:$24 sps:$4 sm:$0xff]  }
 0x301   :  { %v4769_v26 = vpop.f32.mrb[70].mxu0  ;;  %v7355_v17 = vmov 1966171168  }
 0x302   :  { %v6203_v49 = vadd.f32 %v4769_v26, %v3680_v16  ;;  %v4771_v56 = vpop.f32.mrb[71].mxu0  ;;  %v5175_v13 = vmax.f32 %v6201_v38, 0.0  ;;  %v5340_v38 = vlaneseq  ;;  %v3701_v26 = vadd.f32 %v9047_v51, %v8409_v58 }
 0x303   :  { %4548 = vmatmul.mubr.bf16.gmra.mrb[232].mxu1 %v7203_v50 }
 0x304   :  { %v5176_v39 = vmax.f32 %v6203_v49, 0.0  ;;  %4981 = vmatmul.mubr.bf16.gmra.mrb[176].mxu0 %v7204_v60  ;;  %4555 = vmatprep.mubr.bf16.mxu1 %v7205_v8  ;;  %v5347_v60 = vunpack.c.l.s4 %v7355_v17  ;;  %v876_v8 = vpop.permute.xlu1 %875 }
 0x305   :  { %4988 = vmatprep.mubr.bf16.mxu0 %v7207_v1  ;;  %v8451_v1 = vpop.permute.xlu0 %890 }
 0x306   :  { %v8434_v47 = vpack.c.bf16 %v5176_v39, %v5175_v13  ;;  %v7221_v13 = vld [vmem:[#allocation3 + $0xb78] ss:$24 sps:$4 sm:$0xff]  }
 0x307   :  { %v4774_v32 = vpop.f32.mrb[72].mxu0  ;;  %v9048_v39 = vld [vmem:[#allocation29_spill] sm:$0xff] }
 0x308   :  { %v6205_v52 = vadd.f32 %v4774_v32, %v3685_v0  ;;  %v4776_v4 = vpop.f32.mrb[73].mxu0  ;;  %v3704_v31 = vadd.f32 %v9048_v39, %v866_v23 }
 0x309   :  { %v4777_v5 = vpop.f32.mrb[74].mxu0 }
 0x30a   :  { %v6207_v54 = vadd.f32 %v4777_v5, %v3688_v14  ;;  %v4779_v63 = vpop.f32.mrb[75].mxu0  ;;  %v5177_v15 = vmax.f32 %v6205_v52, 0.0  ;;  %v8456_v14 = vshrl.u32 %v5340_v38, 7  ;;  %v5348_v52 = vunpack.c.0.s8 %v5347_v60 }
 0x30b   :  { %4556 = vmatmul.mubr.bf16.gmra.mrb[236].mxu1 %v7209_v53  ;;  %v7222_v53 = vld [vmem:[#allocation3 + $0x8e0] ss:$24 sps:$4 sm:$0xff]  }
 0x30c   :  { %v5178_v28 = vmax.f32 %v6207_v54, 0.0  ;;  %4989 = vmatmul.mubr.bf16.gmra.mrb[180].mxu0 %v7210_v21  ;;  %4563 = vmatprep.mubr.bf16.mxu1 %v7211_v12  ;;  %9049 = vst [vmem:[#allocation46_spill] sm:$0xff] %v8456_v14  ;;  %v7225_v21 = vld [vmem:[#allocation3 + $0x914] ss:$24 sps:$4 sm:$0xff]   ;;  %v8458_v12 = vpop.permute.xlu0 %1060  ;;  %v8463_v23 = vsub.s32 %v5348_v52, %v8456_v14  ;;  %v7234_v52 = vld [vmem:[#allocation3 + $0x940] ss:$24 sps:$4 sm:$0xff]  }
 0x30d   :  { %4996 = vmatprep.mubr.bf16.mxu0 %v7213_v40  ;;  %v8460_v40 = vpop.permute.xlu1 %965 }
 0x30e   :  { %v8442_v44 = vpack.c.bf16 %v5178_v28, %v5177_v15  ;;  %9050 = vst [vmem:[#allocation12_spill] sm:$0xff] %v8463_v23  ;;  %v8465_v15 = vld [vmem:[#allocation6] sm:$0xff] }
 0x30f   :  { %v4782_v34 = vpop.f32.mrb[76].mxu0  ;;  %v9051_v28 = vld [vmem:[#allocation30_spill] sm:$0xff] }
 0x310   :  { %v6209_v7 = vadd.f32 %v4782_v34, %v3693_v59  ;;  %v4784_v27 = vpop.f32.mrb[77].mxu0  ;;  %v3709_v2 = vadd.f32 %v9051_v28, %v8422_v9 }
 0x311   :  { %v4785_v22 = vpop.f32.mrb[78].mxu0 }
 0x312   :  { %v6211_v50 = vadd.f32 %v4785_v22, %v3696_v30  ;;  %v4787_v24 = vpop.f32.mrb[79].mxu0  ;;  %v5179_v42 = vmax.f32 %v6209_v7, 0.0  ;;  %v3712_v30 = vadd.f32 %v9052_v48, %v876_v8  ;;  %v8472_v7 = vpop.permute.xlu0 %980  ;;  %v7229_v22 = vld [vmem:[#allocation3 + $0xbdc] ss:$24 sps:$4 sm:$0xff]   ;;  %v9053_v8 = vld [vmem:[#allocation32_spill] sm:$0xff] }
 0x313   :  { %4564 = vmatmul.mubr.bf16.gmra.mrb[240].mxu1 %v7215_v20  ;;  %v7227_v20 = vld [vmem:[#allocation3 + $0xba8] ss:$24 sps:$4 sm:$0xff]   ;;  %v3717_v51 = vadd.f32 %v9053_v8, %v8438_v61 }
 0x314   :  { %v5180_v16 = vmax.f32 %v6211_v50, 0.0  ;;  %4997 = vmatmul.mubr.bf16.gmra.mrb[184].mxu0 %v7216_v45  ;;  %4571 = vmatprep.mubr.bf16.mxu1 %v7217_v11  ;;  %v7228_v11 = vld [vmem:[#allocation3 + $0x910] ss:$24 sps:$4 sm:$0xff]   ;;  %v886_v50 = vpop.permute.xlu1 %885 }
 0x315   :  { %5004 = vmatprep.mubr.bf16.mxu0 %v7219_v41  ;;  %v5352_v41 = vrot.slane %v8465_v15, %v8463_v23 }
 0x316   :  { %v8453_v49 = vpack.c.bf16 %v5180_v16, %v5179_v42  ;;  %v7231_v42 = vld [vmem:[#allocation3 + $0x944] ss:$24 sps:$4 sm:$0xff]  }
 0x317   :  { %v4790_v56 = vpop.f32.mrb[80].mxu0  ;;  %v5360_v60 = vcombine.high %v5352_v41, %v5352_v41 }
 0x318   :  { %v6213_v0 = vadd.f32 %v4790_v56, %v3701_v26  ;;  %v4792_v32 = vpop.f32.mrb[81].mxu0  ;;  %v8478_v26 = vpop.permute.xlu0 %1070 }
 0x319   :  { %v4793_v4 = vpop.f32.mrb[82].mxu0 }
 0x31a   :  { %v6215_v58 = vadd.f32 %v4793_v4, %v3704_v31  ;;  %v4795_v5 = vpop.f32.mrb[83].mxu0  ;;  %v5181_v54 = vmax.f32 %v6213_v0, 0.0  ;;  %v7233_v31 = vld [vmem:[#allocation3 + $0xbd8] ss:$24 sps:$4 sm:$0xff]   ;;  %v5382_v4 = vrot.slane %v5360_v60, %v8463_v23 }
 0x31b   :  { %4572 = vmatmul.mubr.bf16.gmra.mrb[244].mxu1 %v7221_v13  ;;  %v8482_v13 = vpop.permute.xlu1 %975  ;;  %v9054_v0 = vld [vmem:[#allocation33_spill] sm:$0xff] }
 0x31c   :  { %v5182_v63 = vmax.f32 %v6215_v58, 0.0  ;;  %5005 = vmatmul.mubr.bf16.gmra.mrb[188].mxu0 %v7222_v53  ;;  %4579 = vmatprep.mubr.bf16.mxu1 %v7223_v35  ;;  %v3720_v32 = vadd.f32 %v9054_v0, %v886_v50  ;;  %v7235_v58 = vld [vmem:[#allocation3 + $0x974] ss:$24 sps:$4 sm:$0xff]   ;;  %v8486_v61 = vpop.permute.xlu0 %990 }
 0x31d   :  { %5012 = vmatprep.mubr.bf16.mxu0 %v7225_v21 }
 0x31e   :  { %v8469_v59 = vpack.c.bf16 %v5182_v63, %v5181_v54 }
 0x31f   :  { %v4798_v34 = vpop.f32.mrb[84].mxu0 }
 0x320   :  { %v6217_v27 = vadd.f32 %v4798_v34, %v3709_v2  ;;  %v4800_v45 = vpop.f32.mrb[85].mxu0  ;;  %v896_v2 = vpop.permute.xlu1 %895  ;;  %v9055_v34 = vld [vmem:[#allocation34_spill] sm:$0xff] }
 0x321   :  { %v4801_v24 = vpop.f32.mrb[86].mxu0  ;;  %v9056_v45 = vld [vmem:[#allocation35_spill] sm:$0xff] }
 0x322   :  { %v6219_v16 = vadd.f32 %v4801_v24, %v3712_v30  ;;  %v4803_v9 = vpop.f32.mrb[87].mxu0  ;;  %v5183_v38 = vmax.f32 %v6217_v27, 0.0  ;;  %v8493_v27 = vrot.slane %v5352_v41, %v8463_v23  ;;  %v7237_v24 = vld [vmem:[#allocation3 + $0x970] ss:$24 sps:$4 sm:$0xff]  }
 0x323   :  { %4580 = vmatmul.mubr.bf16.gmra.mrb[248].mxu1 %v7227_v20  ;;  %v3725_v20 = vadd.f32 %v9055_v34, %v8451_v1  ;;  %v7238_v9 = vld [vmem:[#allocation3 + $0x9a4] ss:$24 sps:$4 sm:$0xff]   ;;  %v9057_v41 = vld [vmem:[#allocation36_spill] sm:$0xff] }
 0x324   :  { %v5184_v17 = vmax.f32 %v6219_v16, 0.0  ;;  %5013 = vmatmul.mubr.bf16.gmra.mrb[192].mxu0 %v7228_v11  ;;  %4587 = vmatprep.mubr.bf16.mxu1 %v7229_v22  ;;  %v3728_v11 = vadd.f32 %v9056_v45, %v896_v2  ;;  %v9059_v34 = vld [vmem:[#allocation38_spill] sm:$0xff] }
 0x325   :  { %5020 = vmatprep.mubr.bf16.mxu0 %v7231_v42  ;;  %v5392_v42 = vcombine.high %v5382_v4, %v5382_v4 }
 0x326   :  { %v8480_v56 = vpack.c.bf16 %v5184_v17, %v5183_v38  ;;  %v8496_v38 = vpop.permute.xlu0 %1080 }
 0x327   :  { %v4806_v39 = vpop.f32.mrb[88].mxu0 }
 0x328   :  { %v6221_v53 = vadd.f32 %v4806_v39, %v3717_v51  ;;  %v4808_v35 = vpop.f32.mrb[89].mxu0  ;;  %v3733_v51 = vadd.f32 %v9057_v41, %v8367_v3 }
 0x329   :  { %v4809_v21 = vpop.f32.mrb[90].mxu0 }
 0x32a   :  { %v6223_v5 = vadd.f32 %v4809_v21, %v3720_v32  ;;  %v4811_v54 = vpop.f32.mrb[91].mxu0  ;;  %v5185_v63 = vmax.f32 %v6221_v53, 0.0  ;;  %v9058_v32 = vld [vmem:[#allocation37_spill] sm:$0xff]  ;;  %v8507_v35 = vpop.permute.xlu0 %1000 }
 0x32b   :  { %4588 = vmatmul.mubr.bf16.gmra.mrb[252].mxu1 %v7233_v31  ;;  %v8503_v31 = vpop.permute.xlu1 %1065  ;;  %v3736_v53 = vadd.f32 %v9058_v32, %v8349_v18  ;;  %v7240_v21 = vld [vmem:[#allocation3 + $0x9a0] ss:$24 sps:$4 sm:$0xff]  }
 0x32c   :  { %v5186_v28 = vmax.f32 %v6223_v5, 0.0  ;;  %5021 = vmatmul.mubr.bf16.gmra.mrb[196].mxu0 %v7234_v52  ;;  %5434 = vmatprep.mubr.bf16.mxu1 %v5382_v4  ;;  %v7241_v5 = vld [vmem:[#allocation3 + $0x9d4] ss:$24 sps:$4 sm:$0xff]  }
 0x32d   :  { %5028 = vmatprep.mubr.bf16.mxu0 %v7235_v58 }
 0x32e   :  { %v8490_v48 = vpack.c.bf16 %v5186_v28, %v5185_v63 }
 0x32f   :  { %v4814_v30 = vpop.f32.mrb[92].mxu0  ;;  %v8509_v3 = vpop.permute.xlu1 %985 }
 0x330   :  { %v6225_v22 = vadd.f32 %v4814_v30, %v3725_v20  ;;  %v4816_v50 = vpop.f32.mrb[93].mxu0  ;;  %v3741_v20 = vadd.f32 %v9059_v34, %v8355_v25  ;;  %v8513_v30 = vpop.permute.xlu0 %1090  ;;  %v7246_v34 = vld [vmem:[#allocation3 + $0xa00] ss:$24 sps:$4 sm:$0xff]  }
 0x331   :  { %v4817_v16 = vpop.f32.mrb[94].mxu0  ;;  %v9060_v50 = vld [vmem:[#allocation39_spill] sm:$0xff] }
 0x332   :  { %v6227_v17 = vadd.f32 %v4817_v16, %v3728_v11  ;;  %v4819_v60 = vpop.f32.mrb[95].mxu0  ;;  %v5187_v1 = vmax.f32 %v6225_v22, 0.0 }
 0x333   :  { %5435 = vmatmul.mubr.bf16.vlgmr.msra.gmra.mrb[0].mxu1 %v8493_v27  ;;  %v8522_v32 = vpop.permute.xlu1 %1075 }
 0x334   :  { %v5188_v8 = vmax.f32 %v6227_v17, 0.0  ;;  %5029 = vmatmul.mubr.bf16.gmra.mrb[200].mxu0 %v7237_v24  ;;  %5474 = vmatprep.mubr.bf16.mxu1 %v5392_v42  ;;  %v3744_v24 = vadd.f32 %v9060_v50, %v8382_v19  ;;  %v7243_v17 = vld [vmem:[#allocation3 + $0x9d0] ss:$24 sps:$4 sm:$0xff]  }
 0x335   :  { %5036 = vmatprep.mubr.bf16.mxu0 %v7238_v9  ;;  %v9061_v19 = vld [vmem:[#allocation40_spill] sm:$0xff] }
 0x336   :  { %v8501_v39 = vpack.c.bf16 %v5188_v8, %v5187_v1  ;;  %v7244_v1 = vld [vmem:[#allocation3 + $0xa04] ss:$24 sps:$4 sm:$0xff]  }
 0x337   :  { %v4822_v0 = vpop.f32.mrb[96].mxu0 }
 0x338   :  { %v6229_v52 = vadd.f32 %v4822_v0, %v3733_v51  ;;  %v4824_v4 = vpop.f32.mrb[97].mxu0 }
 0x339   :  { %v4825_v58 = vpop.f32.mrb[98].mxu0 }
 0x33a   :  { %v6231_v54 = vadd.f32 %v4825_v58, %v3736_v53  ;;  %v4827_v63 = vpop.f32.mrb[99].mxu0  ;;  %v5189_v28 = vmax.f32 %v6229_v52, 0.0  ;;  %v3749_v53 = vadd.f32 %v9061_v19, %v8369_v46  ;;  %v8526_v52 = vpop.permute.xlu0 %1010 }
 0x33c   :  { %v5190_v2 = vmax.f32 %v6231_v54, 0.0  ;;  %5037 = vmatmul.mubr.bf16.gmra.mrb[204].mxu0 %v7240_v21 }
 0x33d   :  { %5044 = vmatprep.mubr.bf16.mxu0 %v7241_v5  ;;  %v9062_v5 = vld [vmem:[#allocation41_spill] sm:$0xff] }
 0x33e   :  { %v5294_v18 = vpack.c.bf16 %v5190_v2, %v5189_v28  ;;  %v8515_v45 = vpop.f32.mrb[156].mxu1  ;;  %v3752_v54 = vadd.f32 %v9062_v5, %v8398_v62  ;;  %v9063_v62 = vld [vmem:[#allocation42_spill] sm:$0xff] }
 0x33f   :  { %v4830_v11 = vpop.f32.mrb[100].mxu0  ;;  %v4399_v22 = vpop.f32.mrb[157].mxu1 }
 0x340   :  { %v6233_v42 = vadd.f32 %v4830_v11, %v3741_v20  ;;  %v4832_v16 = vpop.f32.mrb[101].mxu0  ;;  %6034 = vmatprep.subr.bf16.mxu1 %v5294_v18  ;;  %v8519_v9 = vpop.f32.mrb[158].mxu1  ;;  %v7247_v18 = vld [vmem:[#allocation3 + $0xa34] ss:$24 sps:$4 sm:$0xff]  }
 0x341   :  { %v4833_v60 = vpop.f32.mrb[102].mxu0  ;;  %6035 = vmatpush3.bf16.msra.mxu1 %v8424_v55  ;;  %v4402_v25 = vpop.f32.mrb[159].mxu1  ;;  %v3757_v16 = vadd.f32 %v9063_v62, %v8386_v33 }
 0x342   :  { %v6235_v8 = vadd.f32 %v4833_v60, %v3744_v24  ;;  %v4835_v41 = vpop.f32.mrb[103].mxu0  ;;  %v5191_v51 = vmax.f32 %v6233_v42, 0.0  ;;  %v8535_v42 = vpop.permute.xlu1 %995 }
 0x344   :  { %v5192_v0 = vmax.f32 %v6235_v8, 0.0  ;;  %5045 = vmatmul.mubr.bf16.gmra.mrb[208].mxu0 %v7243_v17  ;;  %v8539_v17 = vpop.permute.xlu0 %1100  ;;  %v9064_v8 = vld [vmem:[#allocation43_spill] sm:$0xff] }
 0x345   :  { %5052 = vmatprep.mubr.bf16.mxu0 %v7244_v1  ;;  %v3760_v41 = vadd.f32 %v9064_v8, %v8413_v57  ;;  %v9065_v57 = vld [vmem:[#allocation44_spill] sm:$0xff] }
 0x346   :  { %v5295_v4 = vpack.c.bf16 %v5192_v0, %v5191_v51  ;;  %v8528_v21 = vpop.f32.mrb[160].mxu1 }
 0x347   :  { %v4838_v58 = vpop.f32.mrb[104].mxu0  ;;  %v4407_v55 = vpop.f32.mrb[161].mxu1 }
 0x348   :  { %v6237_v63 = vadd.f32 %v4838_v58, %v3749_v53  ;;  %v4840_v28 = vpop.f32.mrb[105].mxu0  ;;  %6036 = vmatprep.subr.bf16.mxu1 %v5295_v4  ;;  %v8532_v2 = vpop.f32.mrb[162].mxu1  ;;  %v7249_v53 = vld [vmem:[#allocation3 + $0xa30] ss:$24 sps:$4 sm:$0xff]   ;;  %v7250_v58 = vld [vmem:[#allocation3 + $0xa64] ss:$24 sps:$4 sm:$0xff]  }
 0x349   :  { %v4841_v20 = vpop.f32.mrb[106].mxu0  ;;  %6037 = vmatpush3.bf16.msra.mxu1 %v8434_v47  ;;  %v4410_v46 = vpop.f32.mrb[163].mxu1 }
 0x34a   :  { %v6239_v11 = vadd.f32 %v4841_v20, %v3752_v54  ;;  %v4843_v22 = vpop.f32.mrb[107].mxu0  ;;  %v5193_v50 = vmax.f32 %v6237_v63, 0.0  ;;  %v8548_v28 = vpop.permute.xlu1 %1085 }
 0x34b   :  { %v8552_v20 = vpop.permute.xlu0 %1020  ;;  %v9066_v22 = vld [vmem:[#allocation45_spill] sm:$0xff] }
 0x34c   :  { %v5194_v24 = vmax.f32 %v6239_v11, 0.0  ;;  %5053 = vmatmul.mubr.bf16.gmra.mrb[212].mxu0 %v7246_v34  ;;  %v3765_v34 = vadd.f32 %v9065_v57, %v8400_v43 }
 0x34d   :  { %5060 = vmatprep.mubr.bf16.mxu0 %v7247_v18 }
 0x34e   :  { %v5296_v60 = vpack.c.bf16 %v5194_v24, %v5193_v50  ;;  %v8541_v25 = vpop.f32.mrb[164].mxu1  ;;  %v3768_v50 = vadd.f32 %v9066_v22, %v8428_v36  ;;  %v9067_v36 = vld [vmem:[#allocation47_spill] sm:$0xff] }
 0x34f   :  { %v4846_v1 = vpop.f32.mrb[108].mxu0  ;;  %v4415_v47 = vpop.f32.mrb[165].mxu1  ;;  %v7256_v22 = vld [vmem:[#allocation3 + $0xac4] ss:$24 sps:$4 sm:$0xff]  }
 0x350   :  { %v6241_v51 = vadd.f32 %v4846_v1, %v3757_v16  ;;  %v4848_v0 = vpop.f32.mrb[109].mxu0  ;;  %6038 = vmatprep.subr.bf16.mxu1 %v5296_v60  ;;  %v8545_v19 = vpop.f32.mrb[166].mxu1  ;;  %v7252_v60 = vld [vmem:[#allocation3 + $0xa60] ss:$24 sps:$4 sm:$0xff]   ;;  %v7253_v47 = vld [vmem:[#allocation3 + $0xa94] ss:$24 sps:$4 sm:$0xff]  }
 0x351   :  { %v4849_v4 = vpop.f32.mrb[110].mxu0  ;;  %6039 = vmatpush3.bf16.msra.mxu1 %v8442_v44  ;;  %v4418_v33 = vpop.f32.mrb[167].mxu1 }
 0x352   :  { %v6243_v55 = vadd.f32 %v4849_v4, %v3760_v41  ;;  %v4851_v5 = vpop.f32.mrb[111].mxu0  ;;  %v5195_v54 = vmax.f32 %v6241_v51, 0.0  ;;  %v3773_v4 = vadd.f32 %v9067_v36, %v8417_v37  ;;  %v8565_v33 = vpop.permute.xlu0 %1110 }
 0x354   :  { %v5196_v63 = vmax.f32 %v6243_v55, 0.0  ;;  %5061 = vmatmul.mubr.bf16.gmra.mrb[216].mxu0 %v7249_v53  ;;  %v8561_v53 = vpop.permute.xlu1 %1005 }
 0x355   :  { %5068 = vmatprep.mubr.bf16.mxu0 %v7250_v58 }
 0x356   :  { %v5297_v46 = vpack.c.bf16 %v5196_v63, %v5195_v54  ;;  %v8554_v18 = vpop.f32.mrb[168].mxu1  ;;  %v9068_v54 = vld [vmem:[#allocation49_spill] sm:$0xff] }
 0x357   :  { %v4854_v11 = vpop.f32.mrb[112].mxu0  ;;  %v4423_v44 = vpop.f32.mrb[169].mxu1  ;;  %v3776_v63 = vadd.f32 %v9068_v54, %v8444_v29  ;;  %v9069_v29 = vld [vmem:[#allocation53_spill] sm:$0xff] }
 0x358   :  { %v6245_v24 = vadd.f32 %v4854_v11, %v3765_v34  ;;  %v4856_v62 = vpop.f32.mrb[113].mxu0  ;;  %6040 = vmatprep.subr.bf16.mxu1 %v5297_v46  ;;  %v8558_v16 = vpop.f32.mrb[170].mxu1  ;;  %v7255_v11 = vld [vmem:[#allocation3 + $0xa90] ss:$24 sps:$4 sm:$0xff]  }
 0x359   :  { %v4857_v1 = vpop.f32.mrb[114].mxu0  ;;  %6041 = vmatpush3.bf16.msra.mxu1 %v8453_v49  ;;  %v4426_v43 = vpop.f32.mrb[171].mxu1 }
 0x35a   :  { %v6247_v8 = vadd.f32 %v4857_v1, %v3768_v50  ;;  %v4859_v41 = vpop.f32.mrb[115].mxu0  ;;  %v5197_v51 = vmax.f32 %v6245_v24, 0.0  ;;  %v8574_v1 = vpop.permute.xlu1 %1095  ;;  %v3781_v43 = vadd.f32 %v9069_v29, %v8430_v6  ;;  %v9072_v29 = vld [vmem:[#allocation58_spill] sm:$0xff] }
 0x35c   :  { %v5198_v0 = vmax.f32 %v6247_v8, 0.0  ;;  %5069 = vmatmul.mubr.bf16.gmra.mrb[220].mxu0 %v7252_v60 }
 0x35d   :  { %5076 = vmatprep.mubr.bf16.mxu0 %v7253_v47  ;;  %v8578_v47 = vpop.permute.xlu0 %1030 }
 0x35e   :  { %v5298_v58 = vpack.c.bf16 %v5198_v0, %v5197_v51  ;;  %v8567_v55 = vpop.f32.mrb[172].mxu1  ;;  %v9070_v0 = vld [vmem:[#allocation55_spill] sm:$0xff] }
 0x35f   :  { %v4862_v5 = vpop.f32.mrb[116].mxu0  ;;  %v4431_v49 = vpop.f32.mrb[173].mxu1  ;;  %v3784_v36 = vadd.f32 %v9070_v0, %v8460_v40  ;;  %v9071_v40 = vld [vmem:[#allocation57_spill] sm:$0xff] }
 0x360   :  { %v6249_v57 = vadd.f32 %v4862_v5, %v3773_v4  ;;  %v4864_v34 = vpop.f32.mrb[117].mxu0  ;;  %6042 = vmatprep.subr.bf16.mxu1 %v5298_v58  ;;  %v8571_v46 = vpop.f32.mrb[174].mxu1  ;;  %v7258_v49 = vld [vmem:[#allocation3 + $0xac0] ss:$24 sps:$4 sm:$0xff]   ;;  %v7261_v0 = vld [vmem:[#allocation3 + $0xaf0] ss:$24 sps:$4 sm:$0xff]  }
 0x361   :  { %v4865_v44 = vpop.f32.mrb[118].mxu0  ;;  %6043 = vmatpush3.bf16.msra.mxu1 %v8469_v59  ;;  %v4434_v37 = vpop.f32.mrb[175].mxu1 }
 0x362   :  { %v6251_v50 = vadd.f32 %v4865_v44, %v3776_v63  ;;  %v4867_v24 = vpop.f32.mrb[119].mxu0  ;;  %v5199_v62 = vmax.f32 %v6249_v57, 0.0  ;;  %v7259_v63 = vld [vmem:[#allocation3 + $0xaf4] ss:$24 sps:$4 sm:$0xff]  }
 0x364   :  { %v5200_v60 = vmax.f32 %v6251_v50, 0.0  ;;  %5077 = vmatmul.mubr.bf16.gmra.mrb[224].mxu0 %v7255_v11  ;;  %v8587_v11 = vpop.permute.xlu0 %1120  ;;  %v8591_v50 = vpop.permute.xlu1 %1015 }
 0x365   :  { %5084 = vmatprep.mubr.bf16.mxu0 %v7256_v22  ;;  %v3789_v22 = vadd.f32 %v9071_v40, %v8447_v10 }
 0x366   :  { %v5299_v8 = vpack.c.bf16 %v5200_v60, %v5199_v62  ;;  %v8580_v41 = vpop.f32.mrb[176].mxu1 }
 0x367   :  { %v4870_v51 = vpop.f32.mrb[120].mxu0  ;;  %v4439_v59 = vpop.f32.mrb[177].mxu1 }
 0x368   :  { %v6253_v4 = vadd.f32 %v4870_v51, %v3781_v43  ;;  %v4872_v58 = vpop.f32.mrb[121].mxu0  ;;  %6044 = vmatprep.subr.bf16.mxu1 %v5299_v8  ;;  %v8584_v5 = vpop.f32.mrb[178].mxu1  ;;  %v3792_v43 = vadd.f32 %v9072_v29, %v8482_v13 }
 0x369   :  { %v4873_v54 = vpop.f32.mrb[122].mxu0  ;;  %6045 = vmatpush3.bf16.msra.mxu1 %v8480_v56  ;;  %v4442_v6 = vpop.f32.mrb[179].mxu1 }
 0x36a   :  { %v6255_v57 = vadd.f32 %v4873_v54, %v3784_v36  ;;  %v4875_v34 = vpop.f32.mrb[123].mxu0  ;;  %v5201_v44 = vmax.f32 %v6253_v4, 0.0  ;;  %v7262_v4 = vld [vmem:[#allocation3 + $0xb24] ss:$24 sps:$4 sm:$0xff]   ;;  %v8600_v58 = vpop.permute.xlu0 %1040  ;;  %v5345_v6 = vcombine.high %v8465_v15, %v8465_v15 }
 0x36c   :  { %v5202_v37 = vmax.f32 %v6255_v57, 0.0  ;;  %5085 = vmatmul.mubr.bf16.gmra.mrb[228].mxu0 %v7258_v49  ;;  %v8604_v57 = vpop.permute.xlu1 %1105  ;;  %v8607_v34 = vrot.slane %v5345_v6, %v8463_v23 }
 0x36d   :  { %5092 = vmatprep.mubr.bf16.mxu0 %v7259_v63 }
 0x36e   :  { %v5300_v24 = vpack.c.bf16 %v5202_v37, %v5201_v44  ;;  %v8593_v62 = vpop.f32.mrb[180].mxu1  ;;  %9073 = vst [vmem:[#allocation48_spill] sm:$0xff] %v8607_v34  ;;  %v8611_v37 = vpop.permute.xlu0 %1130  ;;  %v5361_v15 = vcombine.high %v8607_v34, %v8607_v34 }
 0x36f   :  { %v4878_v60 = vpop.f32.mrb[124].mxu0  ;;  %v4447_v56 = vpop.f32.mrb[181].mxu1 }
 0x370   :  { %v6257_v8 = vadd.f32 %v4878_v60, %v3789_v22  ;;  %v4880_v51 = vpop.f32.mrb[125].mxu0  ;;  %6046 = vmatprep.subr.bf16.mxu1 %v5300_v24  ;;  %v8597_v59 = vpop.f32.mrb[182].mxu1  ;;  %v9075_v56 = vld [vmem:[#allocation60_spill] sm:$0xff] }
 0x371   :  { %v4881_v36 = vpop.f32.mrb[126].mxu0  ;;  %6047 = vmatpush3.bf16.msra.mxu1 %v8490_v48  ;;  %v4450_v10 = vpop.f32.mrb[183].mxu1  ;;  %v9074_v48 = vld [vmem:[#allocation59_spill] sm:$0xff]  ;;  %v3800_v29 = vadd.f32 %v9075_v56, %v8509_v3 }
 0x372   :  { %v6259_v49 = vadd.f32 %v4881_v36, %v3792_v43  ;;  %v4883_v54 = vpop.f32.mrb[127].mxu0  ;;  %v5203_v63 = vmax.f32 %v6257_v8, 0.0  ;;  %v3797_v44 = vadd.f32 %v9074_v48, %v8472_v7  ;;  %v5390_v43 = vcombine.high %v8493_v27, %v8493_v27  ;;  %v8627_v27 = vpop.permute.xlu1 %1025 }
 0x374   :  { %v5204_v13 = vmax.f32 %v6259_v49, 0.0  ;;  %5093 = vmatmul.mubr.bf16.gmra.mrb[232].mxu0 %v7261_v0  ;;  %v7264_v0 = vld [vmem:[#allocation3 + $0xb20] ss:$24 sps:$4 sm:$0xff]   ;;  %v8625_v49 = vrot.slane %v5361_v15, %v8463_v23 }
 0x375   :  { %5100 = vmatprep.mubr.bf16.mxu0 %v7262_v4  ;;  %v7265_v4 = vld [vmem:[#allocation3 + $0xb54] ss:$24 sps:$4 sm:$0xff]   ;;  %v9078_v15 = vld [vmem:[#allocation62_spill] sm:$0xff] }
 0x376   :  { %v5301_v40 = vpack.c.bf16 %v5204_v13, %v5203_v63  ;;  %v8613_v22 = vpop.f32.mrb[184].mxu1  ;;  %9076 = vst [vmem:[#allocation13_spill] sm:$0xff] %v8625_v49  ;;  %v9077_v13 = vld [vmem:[#allocation61_spill] sm:$0xff]  ;;  %v3808_v56 = vadd.f32 %v9078_v15, %v8535_v42 }
 0x377   :  { %v4886_v24 = vpop.f32.mrb[128].mxu0  ;;  %v4455_v60 = vpop.f32.mrb[185].mxu1  ;;  %v3805_v48 = vadd.f32 %v9077_v13, %v8486_v61 }
 0x378   :  { %v6261_v8 = vadd.f32 %v4886_v24, %v3797_v44  ;;  %v4888_v51 = vpop.f32.mrb[129].mxu0  ;;  %6048 = vmatprep.subr.bf16.mxu1 %v5301_v40  ;;  %v8621_v7 = vpop.f32.mrb[186].mxu1 }
 0x379   :  { %v4889_v36 = vpop.f32.mrb[130].mxu0  ;;  %6049 = vmatpush3.bf16.msra.mxu1 %v8501_v39  ;;  %v4458_v10 = vpop.f32.mrb[187].mxu1  ;;  %v7267_v51 = vld [vmem:[#allocation3 + $0xb50] ss:$24 sps:$4 sm:$0xff]  }
 0x37a   :  { %v6263_v54 = vadd.f32 %v4889_v36, %v3800_v29  ;;  %v4891_v6 = vpop.f32.mrb[131].mxu0  ;;  %v5205_v3 = vmax.f32 %v6261_v8, 0.0  ;;  %v8632_v39 = vpop.permute.xlu0 %1050  ;;  %v7268_v10 = vld [vmem:[#allocation3 + $0xb84] ss:$24 sps:$4 sm:$0xff]  }
 0x37c   :  { %v5206_v63 = vmax.f32 %v6263_v54, 0.0  ;;  %5101 = vmatmul.mubr.bf16.gmra.mrb[236].mxu0 %v7264_v0  ;;  %5475 = vmatmul.mubr.bf16.vlgmr.msra.gmra.mrb[4].mxu1 %v5390_v43 }
 0x37d   :  { %5108 = vmatprep.mubr.bf16.mxu0 %v7265_v4  ;;  %5514 = vmatprep.mubr.bf16.mxu1 %v8625_v49 }
 0x37e   :  { %v8634_v44 = vpack.c.bf16 %v5206_v63, %v5205_v3  ;;  %v8636_v40 = vpop.f32.mrb[188].mxu1  ;;  %v8642_v3 = vpop.permute.xlu1 %1115  ;;  %v9079_v63 = vld [vmem:[#allocation63_spill] sm:$0xff] }
 0x37f   :  { %v4894_v24 = vpop.f32.mrb[132].mxu0  ;;  %v4463_v60 = vpop.f32.mrb[189].mxu1  ;;  %v3813_v13 = vadd.f32 %v9079_v63, %v8507_v35 }
 0x380   :  { %v6265_v29 = vadd.f32 %v4894_v24, %v3805_v48  ;;  %v4896_v43 = vpop.f32.mrb[133].mxu0  ;;  %v8640_v8 = vpop.f32.mrb[190].mxu1 }
 0x381   :  { %v4897_v0 = vpop.f32.mrb[134].mxu0  ;;  %v4466_v36 = vpop.f32.mrb[191].mxu1 }
 0x382   :  { %v6267_v61 = vadd.f32 %v4897_v0, %v3808_v56  ;;  %v4899_v4 = vpop.f32.mrb[135].mxu0  ;;  %v5207_v54 = vmax.f32 %v6265_v29, 0.0  ;;  %v8646_v42 = vpop.permute.xlu0 %1220  ;;  %v9081_v56 = vld [vmem:[#allocation64_spill] sm:$0xff]  ;;  %v7270_v36 = vld [vmem:[#allocation3 + $0xb80] ss:$24 sps:$4 sm:$0xff]  }
 0x383   :  { %9080 = vst [vmem:[#allocation50_spill] sm:$0xff] %v8646_v42  ;;  %v3816_v43 = vadd.f32 %v9081_v56, %v8561_v53  ;;  %v7271_v4 = vld [vmem:[#allocation3 + $0xbb4] ss:$24 sps:$4 sm:$0xff]  }
 0x384   :  { %v5208_v6 = vmax.f32 %v6267_v61, 0.0  ;;  %5109 = vmatmul.mubr.bf16.gmra.mrb[240].mxu0 %v7267_v51 }
 0x385   :  { %5116 = vmatprep.mubr.bf16.mxu0 %v7268_v10 }
 0x386   :  { %v8648_v48 = vpack.c.bf16 %v5208_v6, %v5207_v54  ;;  %v8650_v24 = vpop.f32.mrb[192].mxu1  ;;  %v1036_v6 = vpop.permute.xlu1 %1035 }
 0x387   :  { %v4902_v60 = vpop.f32.mrb[136].mxu0  ;;  %v4471_v15 = vpop.f32.mrb[193].mxu1 }
 0x388   :  { %v6269_v29 = vadd.f32 %v4902_v60, %v3813_v13  ;;  %v4904_v0 = vpop.f32.mrb[137].mxu0  ;;  %v8654_v51 = vpop.f32.mrb[194].mxu1  ;;  %v9082_v15 = vld [vmem:[#allocation65_spill] sm:$0xff] }
 0x389   :  { %v4905_v10 = vpop.f32.mrb[138].mxu0  ;;  %v4474_v61 = vpop.f32.mrb[195].mxu1  ;;  %v3821_v14 = vadd.f32 %v9082_v15, %v8526_v52  ;;  %v9084_v0 = vld [vmem:[#allocation66_spill] sm:$0xff] }
 0x38a   :  { %v6271_v35 = vadd.f32 %v4905_v10, %v3816_v43  ;;  %v4907_v63 = vpop.f32.mrb[139].mxu0  ;;  %v5209_v42 = vmax.f32 %v6269_v29, 0.0  ;;  %v8658_v49 = vpop.permute.xlu0 %1140  ;;  %v3824_v43 = vadd.f32 %v9084_v0, %v8591_v50 }
 0x38b   :  { %v7274_v63 = vld [vmem:[#allocation3 + $0xbe4] ss:$24 sps:$4 sm:$0xff]  }
 0x38c   :  { %v5210_v54 = vmax.f32 %v6271_v35, 0.0  ;;  %5117 = vmatmul.mubr.bf16.gmra.mrb[244].mxu0 %v7270_v36  ;;  %v7273_v36 = vld [vmem:[#allocation3 + $0xbb0] ss:$24 sps:$4 sm:$0xff]  }
 0x38d   :  { %5124 = vmatprep.mubr.bf16.mxu0 %v7271_v4 }
 0x38e   :  { %v8660_v53 = vpack.c.bf16 %v5210_v54, %v5209_v42  ;;  %v8662_v13 = vpop.f32.mrb[196].mxu1  ;;  %v8668_v54 = vpop.permute.xlu1 %1125 }
 0x38f   :  { %9083 = vst [vmem:[#allocation14_spill] sm:$0xff] %v8662_v13  ;;  %v4910_v60 = vpop.f32.mrb[140].mxu0  ;;  %v4479_v56 = vpop.f32.mrb[197].mxu1 }
 0x390   :  { %v6273_v10 = vadd.f32 %v4910_v60, %v3821_v14  ;;  %v4912_v29 = vpop.f32.mrb[141].mxu0  ;;  %v8666_v61 = vpop.f32.mrb[198].mxu1  ;;  %v9086_v56 = vld [vmem:[#allocation67_spill] sm:$0xff] }
 0x391   :  { %9085 = vst [vmem:[#allocation51_spill] sm:$0xff] %v8666_v61  ;;  %v4913_v4 = vpop.f32.mrb[142].mxu0  ;;  %v4482_v35 = vpop.f32.mrb[199].mxu1  ;;  %v3829_v13 = vadd.f32 %v9086_v56, %v8552_v20 }
 0x392   :  { %v6275_v52 = vadd.f32 %v4913_v4, %v3824_v43  ;;  %v4915_v15 = vpop.f32.mrb[143].mxu0  ;;  %v5211_v34 = vmax.f32 %v6273_v10, 0.0  ;;  %v8672_v50 = vpop.permute.xlu0 %1230  ;;  %v9089_v43 = vld [vmem:[#allocation68_spill] sm:$0xff] }
 0x393   :  { %9087 = vst [vmem:[#allocation15_spill] sm:$0xff] %v8672_v50  ;;  %v3832_v4 = vadd.f32 %v9089_v43, %v8627_v27  ;;  %v9094_v43 = vld [vmem:[#allocation70_spill] sm:$0xff] }
 0x394   :  { %v5212_v42 = vmax.f32 %v6275_v52, 0.0  ;;  %5125 = vmatmul.mubr.bf16.gmra.mrb[248].mxu0 %v7273_v36  ;;  %v7276_v52 = vld [vmem:[#allocation3 + $0xbe0] ss:$24 sps:$4 sm:$0xff]  }
 0x395   :  { %5132 = vmatprep.mubr.bf16.mxu0 %v7274_v63 }
 0x396   :  { %v8674_v14 = vpack.c.bf16 %v5212_v42, %v5211_v34  ;;  %v8676_v60 = vpop.f32.mrb[200].mxu1  ;;  %v1046_v34 = vpop.permute.xlu1 %1045  ;;  %v9091_v42 = vld [vmem:[#allocation69_spill] sm:$0xff] }
 0x397   :  { %9088 = vst [vmem:[#allocation52_spill] sm:$0xff] %v8676_v60  ;;  %v4918_v0 = vpop.f32.mrb[144].mxu0  ;;  %v4487_v29 = vpop.f32.mrb[201].mxu1  ;;  %v3837_v60 = vadd.f32 %v9091_v42, %v8578_v47 }
 0x398   :  { %v6277_v10 = vadd.f32 %v4918_v0, %v3829_v13  ;;  %v4920_v35 = vpop.f32.mrb[145].mxu0  ;;  %v8680_v36 = vpop.f32.mrb[202].mxu1 }
 0x399   :  { %9090 = vst [vmem:[#allocation16_spill] sm:$0xff] %v8680_v36  ;;  %v4921_v63 = vpop.f32.mrb[146].mxu0  ;;  %v4490_v15 = vpop.f32.mrb[203].mxu1  ;;  %v3840_v35 = vadd.f32 %v9094_v43, %v1036_v6  ;;  %v9099_v43 = vld [vmem:[#allocation72_spill] sm:$0xff] }
 0x39a   :  { %v6279_v61 = vadd.f32 %v4921_v63, %v3832_v4  ;;  %v4923_v20 = vpop.f32.mrb[147].mxu0  ;;  %v5213_v56 = vmax.f32 %v6277_v10, 0.0  ;;  %v8684_v29 = vpop.permute.xlu0 %1150 }
 0x39b   :  { %9092 = vst [vmem:[#allocation54_spill] sm:$0xff] %v8684_v29  ;;  %v8693_v42 = vpop.permute.xlu1 %1135 }
 0x39c   :  { %v5214_v50 = vmax.f32 %v6279_v61, 0.0  ;;  %5133 = vmatmul.mubr.bf16.gmra.mrb[252].mxu0 %v7276_v52 }
 0x39e   :  { %v8686_v23 = vpack.c.bf16 %v5214_v50, %v5213_v56  ;;  %v8688_v27 = vpop.f32.mrb[204].mxu1  ;;  %v9096_v50 = vld [vmem:[#allocation71_spill] sm:$0xff] }
 0x39f   :  { %9093 = vst [vmem:[#allocation17_spill] sm:$0xff] %v8688_v27  ;;  %v4926_v13 = vpop.f32.mrb[148].mxu0  ;;  %v4495_v0 = vpop.f32.mrb[205].mxu1  ;;  %v3845_v56 = vadd.f32 %v9096_v50, %v8600_v58 }
 0x3a0   :  { %v6281_v15 = vadd.f32 %v4926_v13, %v3837_v60  ;;  %v4928_v4 = vpop.f32.mrb[149].mxu0  ;;  %v8691_v63 = vpop.f32.mrb[206].mxu1 }
 0x3a1   :  { %9095 = vst [vmem:[#allocation56_spill] sm:$0xff] %v8691_v63  ;;  %v4929_v61 = vpop.f32.mrb[150].mxu0  ;;  %v4498_v10 = vpop.f32.mrb[207].mxu1  ;;  %v3848_v4 = vadd.f32 %v9099_v43, %v1046_v34 }
 0x3a2   :  { %v6283_v52 = vadd.f32 %v4929_v61, %v3840_v35  ;;  %v4931_v20 = vpop.f32.mrb[151].mxu0  ;;  %v5215_v36 = vmax.f32 %v6281_v15, 0.0  ;;  %v8697_v27 = vpop.permute.xlu0 %1240 }
 0x3a3   :  { %9097 = vst [vmem:[#allocation18_spill] sm:$0xff] %v8697_v27  ;;  %v1056_v50 = vpop.permute.xlu1 %1055 }
 0x3a4   :  { %v5216_v47 = vmax.f32 %v6283_v52, 0.0 }
 0x3a6   :  { %v8699_v0 = vpack.c.bf16 %v5216_v47, %v5215_v36  ;;  %v8701_v6 = vpop.f32.mrb[208].mxu1  ;;  %v8706_v27 = vpop.permute.xlu0 %1160  ;;  %v6288_v36 = vadd.f32 %v8515_v45, %v8632_v39  ;;  %v6292_v45 = vadd.f32 %v8528_v21, %v8458_v12  ;;  %v6296_v21 = vadd.f32 %v8541_v25, %v8478_v26 }
 0x3a7   :  { %9098 = vst [vmem:[#allocation19_spill] sm:$0xff] %v8701_v6  ;;  %v4934_v60 = vpop.f32.mrb[152].mxu0  ;;  %v4503_v13 = vpop.f32.mrb[209].mxu1 }
 0x3a8   :  { %v6285_v10 = vadd.f32 %v4934_v60, %v3845_v56  ;;  %v4936_v35 = vpop.f32.mrb[153].mxu0  ;;  %v8704_v61 = vpop.f32.mrb[210].mxu1  ;;  %v6290_v60 = vadd.f32 %v8519_v9, %v1056_v50  ;;  %v6294_v50 = vadd.f32 %v8532_v2, %v8503_v31  ;;  %v6298_v2 = vadd.f32 %v8545_v19, %v8522_v32 }
 0x3a9   :  { %9100 = vst [vmem:[#allocation20_spill] sm:$0xff] %v8704_v61  ;;  %v4937_v15 = vpop.f32.mrb[154].mxu0  ;;  %v4506_v52 = vpop.f32.mrb[211].mxu1  ;;  %v6300_v32 = vadd.f32 %v8554_v18, %v8496_v38 }
 0x3aa   :  { %v6287_v20 = vadd.f32 %v4937_v15, %v3848_v4  ;;  %v4939_v63 = vpop.f32.mrb[155].mxu0  ;;  %v5217_v29 = vmax.f32 %v6285_v10, 0.0  ;;  %v8717_v6 = vpop.permute.xlu0 %1250 }
 0x3ac   :  { %v5218_v58 = vmax.f32 %v6287_v20, 0.0 }
 0x3ae   :  { %v8710_v47 = vpack.c.bf16 %v5218_v58, %v5217_v29  ;;  %v8712_v13 = vpop.f32.mrb[212].mxu1  ;;  %v8729_v12 = vpop.permute.xlu0 %1170 }
 0x3af   :  { %v4942_v34 = vpop.f32.mrb[156].mxu0  ;;  %v4511_v56 = vpop.f32.mrb[213].mxu1 }
 0x3b0   :  { %v6289_v43 = vadd.f32 %v6288_v36, %v4942_v34  ;;  %v4944_v35 = vpop.f32.mrb[157].mxu0  ;;  %v8715_v4 = vpop.f32.mrb[214].mxu1 }
 0x3b1   :  { %v4945_v63 = vpop.f32.mrb[158].mxu0  ;;  %v4514_v10 = vpop.f32.mrb[215].mxu1 }
 0x3b2   :  { %v6291_v15 = vadd.f32 %v6290_v60, %v4945_v63  ;;  %v4947_v52 = vpop.f32.mrb[159].mxu0  ;;  %v5219_v20 = vmax.f32 %v6289_v43, 0.0 }
 0x3b4   :  { %v5220_v61 = vmax.f32 %v6291_v15, 0.0 }
 0x3b6   :  { %v8721_v39 = vpack.c.bf16 %v5220_v61, %v5219_v20  ;;  %v8723_v29 = vpop.f32.mrb[216].mxu1 }
 0x3b7   :  { %v4950_v9 = vpop.f32.mrb[160].mxu0  ;;  %v4519_v58 = vpop.f32.mrb[217].mxu1 }
 0x3b8   :  { %v6293_v36 = vadd.f32 %v6292_v45, %v4950_v9  ;;  %v4952_v34 = vpop.f32.mrb[161].mxu0  ;;  %v8727_v56 = vpop.f32.mrb[218].mxu1 }
 0x3b9   :  { %v4953_v60 = vpop.f32.mrb[162].mxu0  ;;  %v4522_v43 = vpop.f32.mrb[219].mxu1 }
 0x3ba   :  { %v6295_v35 = vadd.f32 %v6294_v50, %v4953_v60  ;;  %v4955_v63 = vpop.f32.mrb[163].mxu0  ;;  %v5221_v10 = vmax.f32 %v6293_v36, 0.0  ;;  %v8740_v43 = vpop.permute.xlu1 %1225 }
 0x3bc   :  { %v5222_v15 = vmax.f32 %v6295_v35, 0.0  ;;  %v8742_v35 = vpop.permute.xlu0 %1260 }
 0x3be   :  { %v5310_v61 = vpack.c.bf16 %v5222_v15, %v5221_v10  ;;  %v8733_v52 = vpop.f32.mrb[220].mxu1 }
 0x3bf   :  { %v4958_v20 = vpop.f32.mrb[164].mxu0  ;;  %v4527_v31 = vpop.f32.mrb[221].mxu1 }
 0x3c0   :  { %v6297_v45 = vadd.f32 %v6296_v21, %v4958_v20  ;;  %v4960_v9 = vpop.f32.mrb[165].mxu0  ;;  %6056 = vmatprep.subr.bf16.mxu1 %v5310_v61  ;;  %v8737_v58 = vpop.f32.mrb[222].mxu1 }
 0x3c1   :  { %v4961_v50 = vpop.f32.mrb[166].mxu0  ;;  %6057 = vmatpush3.bf16.msra.mxu1 %v8634_v44  ;;  %v4530_v36 = vpop.f32.mrb[223].mxu1  ;;  %v6302_v44 = vadd.f32 %v8558_v16, %v8548_v28  ;;  %v6304_v28 = vadd.f32 %v8567_v55, %v8513_v30 }
 0x3c2   :  { %v6299_v34 = vadd.f32 %v6298_v2, %v4961_v50  ;;  %v4963_v60 = vpop.f32.mrb[167].mxu0  ;;  %v5223_v26 = vmax.f32 %v6297_v45, 0.0  ;;  %v8753_v50 = vpop.permute.xlu1 %1145 }
 0x3c3   :  { %v8755_v36 = vpop.permute.xlu0 %1180 }
 0x3c4   :  { %v5224_v25 = vmax.f32 %v6299_v34, 0.0 }
 0x3c6   :  { %v5311_v19 = vpack.c.bf16 %v5224_v25, %v5223_v26  ;;  %v8746_v63 = vpop.f32.mrb[224].mxu1 }
 0x3c7   :  { %v4966_v10 = vpop.f32.mrb[168].mxu0  ;;  %v4535_v15 = vpop.f32.mrb[225].mxu1 }
 0x3c8   :  { %v6301_v21 = vadd.f32 %v6300_v32, %v4966_v10  ;;  %v4968_v61 = vpop.f32.mrb[169].mxu0  ;;  %6058 = vmatprep.subr.bf16.mxu1 %v5311_v19  ;;  %v8750_v20 = vpop.f32.mrb[226].mxu1 }
 0x3c9   :  { %v4969_v31 = vpop.f32.mrb[170].mxu0  ;;  %6059 = vmatpush3.bf16.msra.mxu1 %v8648_v48  ;;  %v4538_v2 = vpop.f32.mrb[227].mxu1  ;;  %v6306_v48 = vadd.f32 %v8571_v46, %v8574_v1  ;;  %v6308_v46 = vadd.f32 %v8580_v41, %v8539_v17 }
 0x3ca   :  { %v6303_v45 = vadd.f32 %v6302_v44, %v4969_v31  ;;  %v4971_v9 = vpop.f32.mrb[171].mxu0  ;;  %v5225_v38 = vmax.f32 %v6301_v21, 0.0  ;;  %v8766_v61 = vpop.permute.xlu1 %1235 }
 0x3cb   :  { %v8768_v31 = vpop.permute.xlu0 %1270 }
 0x3cc   :  { %v5226_v18 = vmax.f32 %v6303_v45, 0.0 }
 0x3ce   :  { %v5312_v16 = vpack.c.bf16 %v5226_v18, %v5225_v38  ;;  %v8759_v34 = vpop.f32.mrb[228].mxu1 }
 0x3cf   :  { %v4974_v60 = vpop.f32.mrb[172].mxu0  ;;  %v4543_v26 = vpop.f32.mrb[229].mxu1 }
 0x3d0   :  { %v6305_v25 = vadd.f32 %v6304_v28, %v4974_v60  ;;  %v4976_v32 = vpop.f32.mrb[173].mxu0  ;;  %6060 = vmatprep.subr.bf16.mxu1 %v5312_v16  ;;  %v8763_v19 = vpop.f32.mrb[230].mxu1 }
 0x3d1   :  { %v4977_v10 = vpop.f32.mrb[174].mxu0  ;;  %6061 = vmatpush3.bf16.msra.mxu1 %v8660_v53  ;;  %v4546_v15 = vpop.f32.mrb[231].mxu1  ;;  %v6310_v53 = vadd.f32 %v8584_v5, %v8604_v57  ;;  %v6312_v5 = vadd.f32 %v8593_v62, %v8565_v33 }
 0x3d2   :  { %v6307_v44 = vadd.f32 %v6306_v48, %v4977_v10  ;;  %v4979_v21 = vpop.f32.mrb[175].mxu0  ;;  %v5227_v30 = vmax.f32 %v6305_v25, 0.0  ;;  %v8779_v25 = vpop.permute.xlu1 %1155 }
 0x3d3   :  { %v8781_v32 = vpop.permute.xlu0 %1190 }
 0x3d4   :  { %v5228_v55 = vmax.f32 %v6307_v44, 0.0 }
 0x3d6   :  { %v5313_v1 = vpack.c.bf16 %v5228_v55, %v5227_v30  ;;  %v8772_v2 = vpop.f32.mrb[232].mxu1 }
 0x3d7   :  { %v4982_v45 = vpop.f32.mrb[176].mxu0  ;;  %v4551_v9 = vpop.f32.mrb[233].mxu1 }
 0x3d8   :  { %v6309_v38 = vadd.f32 %v6308_v46, %v4982_v45  ;;  %v4984_v18 = vpop.f32.mrb[177].mxu0  ;;  %6062 = vmatprep.subr.bf16.mxu1 %v5313_v1  ;;  %v8776_v28 = vpop.f32.mrb[234].mxu1 }
 0x3d9   :  { %v4985_v16 = vpop.f32.mrb[178].mxu0  ;;  %6063 = vmatpush3.bf16.msra.mxu1 %v8674_v14  ;;  %v4554_v60 = vpop.f32.mrb[235].mxu1  ;;  %v6314_v14 = vadd.f32 %v8597_v59, %v8642_v3  ;;  %v6316_v59 = vadd.f32 %v8613_v22, %v8587_v11 }
 0x3da   :  { %v6311_v26 = vadd.f32 %v6310_v53, %v4985_v16  ;;  %v4987_v48 = vpop.f32.mrb[179].mxu0  ;;  %v5229_v17 = vmax.f32 %v6309_v38, 0.0  ;;  %v8792_v53 = vpop.permute.xlu1 %1245 }
 0x3db   :  { %v8794_v38 = vpop.permute.xlu0 %1280 }
 0x3dc   :  { %v5230_v41 = vmax.f32 %v6311_v26, 0.0 }
 0x3de   :  { %v5314_v57 = vpack.c.bf16 %v5230_v41, %v5229_v17  ;;  %v8785_v10 = vpop.f32.mrb[236].mxu1 }
 0x3df   :  { %v4990_v15 = vpop.f32.mrb[180].mxu0  ;;  %v4559_v44 = vpop.f32.mrb[237].mxu1 }
 0x3e0   :  { %v6313_v21 = vadd.f32 %v6312_v5, %v4990_v15  ;;  %v4992_v30 = vpop.f32.mrb[181].mxu0  ;;  %6064 = vmatprep.subr.bf16.mxu1 %v5314_v57  ;;  %v8789_v55 = vpop.f32.mrb[238].mxu1 }
 0x3e1   :  { %v4993_v46 = vpop.f32.mrb[182].mxu0  ;;  %6065 = vmatpush3.bf16.msra.mxu1 %v8686_v23  ;;  %v4562_v1 = vpop.f32.mrb[239].mxu1  ;;  %v6318_v23 = vadd.f32 %v8621_v7, %v8668_v54  ;;  %v6320_v7 = vadd.f32 %v8636_v40, %v8611_v37 }
 0x3e2   :  { %v6315_v45 = vadd.f32 %v6314_v14, %v4993_v46  ;;  %v4995_v9 = vpop.f32.mrb[183].mxu0  ;;  %v5231_v33 = vmax.f32 %v6313_v21, 0.0  ;;  %v8805_v44 = vpop.permute.xlu1 %1165 }
 0x3e3   :  { %v8807_v14 = vpop.permute.xlu0 %1200 }
 0x3e4   :  { %v5232_v62 = vmax.f32 %v6315_v45, 0.0 }
 0x3e6   :  { %v5315_v3 = vpack.c.bf16 %v5232_v62, %v5231_v33  ;;  %v8798_v18 = vpop.f32.mrb[240].mxu1 }
 0x3e7   :  { %v4998_v16 = vpop.f32.mrb[184].mxu0  ;;  %v4567_v60 = vpop.f32.mrb[241].mxu1 }
 0x3e8   :  { %v6317_v26 = vadd.f32 %v6316_v59, %v4998_v16  ;;  %v5000_v48 = vpop.f32.mrb[185].mxu0  ;;  %6066 = vmatprep.subr.bf16.mxu1 %v5315_v3  ;;  %v8802_v17 = vpop.f32.mrb[242].mxu1 }
 0x3e9   :  { %v5001_v41 = vpop.f32.mrb[186].mxu0  ;;  %6067 = vmatpush3.bf16.msra.mxu1 %v8699_v0  ;;  %v4570_v5 = vpop.f32.mrb[243].mxu1  ;;  %v6322_v0 = vadd.f32 %v8640_v8, %v8693_v42  ;;  %v6324_v8 = vadd.f32 %v8650_v24, %v8658_v49  ;;  %v9104_v24 = vld [vmem:[#allocation13_spill] sm:$0xff] }
 0x3ea   :  { %v6319_v57 = vadd.f32 %v6318_v23, %v5001_v41  ;;  %v5003_v15 = vpop.f32.mrb[187].mxu0  ;;  %v5233_v11 = vmax.f32 %v6317_v26, 0.0  ;;  %v8818_v16 = vpop.permute.xlu1 %1255 }
 0x3eb   :  { %v8820_v60 = vpop.permute.xlu0 %1290  ;;  %v9101_v15 = vld [vmem:[#allocation12_spill] sm:$0xff] }
 0x3ec   :  { %v5234_v22 = vmax.f32 %v6319_v57, 0.0 }
 0x3ee   :  { %v5316_v54 = vpack.c.bf16 %v5234_v22, %v5233_v11  ;;  %v8811_v21 = vpop.f32.mrb[244].mxu1  ;;  %v9102_v11 = vld [vmem:[#allocation48_spill] sm:$0xff] }
 0x3ef   :  { %v5006_v30 = vpop.f32.mrb[188].mxu0  ;;  %v4575_v46 = vpop.f32.mrb[245].mxu1  ;;  %v8832_v22 = vrot.slane %v9102_v11, %v9101_v15  ;;  %v9108_v11 = vld [vmem:[#allocation46_spill] sm:$0xff] }
 0x3f0   :  { %v6321_v1 = vadd.f32 %v6320_v7, %v5006_v30  ;;  %v5008_v45 = vpop.f32.mrb[189].mxu0  ;;  %6068 = vmatprep.subr.bf16.mxu1 %v5316_v54  ;;  %v8815_v9 = vpop.f32.mrb[246].mxu1  ;;  %v5393_v54 = vcombine.high %v9104_v24, %v9104_v24 }
 0x3f1   :  { %v5009_v33 = vpop.f32.mrb[190].mxu0  ;;  %6069 = vmatpush3.bf16.msra.mxu1 %v8710_v47  ;;  %v4578_v62 = vpop.f32.mrb[247].mxu1  ;;  %v6326_v47 = vadd.f32 %v8654_v51, %v8753_v50  ;;  %9103 = vst [vmem:[#allocation21_spill] sm:$0xff] %v8832_v22  ;;  %v9105_v45 = vld [vmem:[#allocation54_spill] sm:$0xff] }
 0x3f2   :  { %v6323_v59 = vadd.f32 %v6322_v0, %v5009_v33  ;;  %v5011_v3 = vpop.f32.mrb[191].mxu0  ;;  %v5235_v37 = vmax.f32 %v6321_v1, 0.0  ;;  %v1176_v50 = vpop.permute.xlu1 %1175  ;;  %v9106_v33 = vld [vmem:[#allocation14_spill] sm:$0xff] }
 0x3f3   :  { %v8838_v1 = vpop.permute.xlu0 %1210  ;;  %v6328_v62 = vadd.f32 %v9106_v33, %v9105_v45 }
 0x3f4   :  { %v5236_v40 = vmax.f32 %v6323_v59, 0.0 }
 0x3f6   :  { %v5317_v42 = vpack.c.bf16 %v5236_v40, %v5235_v37  ;;  %v8824_v23 = vpop.f32.mrb[248].mxu1  ;;  %v9107_v40 = vld [vmem:[#allocation51_spill] sm:$0xff] }
 0x3f7   :  { %v5014_v26 = vpop.f32.mrb[192].mxu0  ;;  %v4583_v48 = vpop.f32.mrb[249].mxu1 }
 0x3f8   :  { %v6325_v41 = vadd.f32 %v6324_v8, %v5014_v26  ;;  %v5016_v5 = vpop.f32.mrb[193].mxu0  ;;  %6070 = vmatprep.subr.bf16.mxu1 %v5317_v42  ;;  %v8828_v57 = vpop.f32.mrb[250].mxu1  ;;  %v6330_v8 = vadd.f32 %v9107_v40, %v8779_v25 }
 0x3f9   :  { %v5017_v7 = vpop.f32.mrb[194].mxu0  ;;  %6071 = vmatpush3.bf16.msra.mxu1 %v8721_v39  ;;  %v4586_v49 = vpop.f32.mrb[251].mxu1 }
 0x3fa   :  { %v6327_v30 = vadd.f32 %v6326_v47, %v5017_v7  ;;  %v5019_v46 = vpop.f32.mrb[195].mxu0  ;;  %v5237_v0 = vmax.f32 %v6325_v41, 0.0  ;;  %v5342_v7 = vsub.s32 0, %v9108_v11 }
 0x3fb   :  { %v9109_v46 = vld [vmem:[#allocation52_spill] sm:$0xff] }
 0x3fc   :  { %v5238_v51 = vmax.f32 %v6327_v30, 0.0  ;;  %5515 = vmatmul.mubr.bf16.vlgmr.msra.gmra.mrb[8].mxu1 %v8832_v22  ;;  %v5338_v30 = vpop.permute.xlu0 %5337 }
 0x3fd   :  { %5554 = vmatprep.mubr.bf16.mxu1 %v5393_v54  ;;  %v8851_v54 = vpop.permute.xlu1 %1265 }
 0x3fe   :  { %v8842_v59 = vpack.c.bf16 %v5238_v51, %v5237_v0  ;;  %v8844_v39 = vpop.f32.mrb[252].mxu1  ;;  %v6332_v0 = vadd.f32 %v9109_v46, %v8706_v27  ;;  %v9111_v46 = vld [vmem:[#allocation17_spill] sm:$0xff] }
 0x3ff   :  { %v5022_v3 = vpop.f32.mrb[196].mxu0  ;;  %v4591_v37 = vpop.f32.mrb[253].mxu1  ;;  %v6336_v22 = vadd.f32 %v9111_v46, %v8729_v12 }
 0x400   :  { %v6329_v42 = vadd.f32 %v6328_v62, %v5022_v3  ;;  %v5024_v26 = vpop.f32.mrb[197].mxu0  ;;  %v8848_v48 = vpop.f32.mrb[254].mxu1  ;;  %v5343_v62 = vrot.slane %v5338_v30, %v5342_v7  ;;  %v9110_v3 = vld [vmem:[#allocation16_spill] sm:$0xff] }
 0x401   :  { %v5025_v47 = vpop.f32.mrb[198].mxu0  ;;  %v4594_v41 = vpop.f32.mrb[255].mxu1  ;;  %v6334_v37 = vadd.f32 %v9110_v3, %v8805_v44  ;;  %v9112_v44 = vld [vmem:[#allocation56_spill] sm:$0xff] }
 0x402   :  { %v6331_v5 = vadd.f32 %v6330_v8, %v5025_v47  ;;  %v5027_v15 = vpop.f32.mrb[199].mxu0  ;;  %v5239_v49 = vmax.f32 %v6329_v42, 0.0  ;;  %v1186_v27 = vpop.permute.xlu1 %1185 }
 0x404   :  { %v5240_v24 = vmax.f32 %v6331_v5, 0.0 }
 0x406   :  { %v8855_v51 = vpack.c.bf16 %v5240_v24, %v5239_v49  ;;  %v6028_v25 = vpop.f32.mrb[0].mxu1 }
 0x407   :  { %v5030_v45 = vpop.f32.mrb[200].mxu0  ;;  %v6029_v33 = vpop.f32.mrb[1].mxu1 }
 0x408   :  { %v6333_v40 = vadd.f32 %v6332_v0, %v5030_v45  ;;  %v5032_v8 = vpop.f32.mrb[201].mxu0  ;;  %v6030_v26 = vadd.f32 %v6029_v33, %v6028_v25  ;;  %v6031_v42 = vpop.f32.mrb[2].mxu1  ;;  %v6338_v0 = vadd.f32 %v9112_v44, %v1176_v50 }
 0x409   :  { %v5033_v47 = vpop.f32.mrb[202].mxu0  ;;  %v6032_v41 = vpop.f32.mrb[3].mxu1 }
 0x40a   :  { %v8859_v5 = vadd.f32 %v6030_v26, %v5343_v62  ;;  %v6335_v15 = vadd.f32 %v6334_v37, %v5033_v47  ;;  %v5035_v11 = vpop.f32.mrb[203].mxu0  ;;  %v5241_v49 = vmax.f32 %v6333_v40, 0.0  ;;  %v8866_v33 = vpop.permute.xlu1 %1275  ;;  %v9113_v40 = vld [vmem:[#allocation19_spill] sm:$0xff] }
 0x40b   :  { %v6340_v42 = vadd.f32 %v9113_v40, %v8755_v36 }
 0x40c   :  { %v5242_v24 = vmax.f32 %v6335_v15, 0.0  ;;  %v9114_v15 = vld [vmem:[#allocation20_spill] sm:$0xff] }
 0x40d   :  { %v6342_v11 = vadd.f32 %v9114_v15, %v1186_v27  ;;  %v6348_v15 = vadd.f32 %v8723_v29, %v8807_v14 }
 0x40e   :  { %v8863_v7 = vpack.c.bf16 %v5242_v24, %v5241_v49  ;;  %v1196_v12 = vpop.permute.xlu1 %1195 }
 0x40f   :  { %v5038_v30 = vpop.f32.mrb[204].mxu0 }
 0x410   :  { %v6337_v45 = vadd.f32 %v6336_v22, %v5038_v30  ;;  %v5040_v25 = vpop.f32.mrb[205].mxu0 }
 0x411   :  { %v5041_v3 = vpop.f32.mrb[206].mxu0 }
 0x412   :  { %v6339_v62 = vadd.f32 %v6338_v0, %v5041_v3  ;;  %v5043_v8 = vpop.f32.mrb[207].mxu0  ;;  %v5243_v37 = vmax.f32 %v6337_v45, 0.0  ;;  %v8873_v0 = vpop.permute.xlu1 %1285  ;;  %v6344_v45 = vadd.f32 %v8712_v13, %v8781_v32  ;;  %v6346_v3 = vadd.f32 %v8715_v4, %v1196_v12 }
 0x414   :  { %v5244_v26 = vmax.f32 %v6339_v62, 0.0 }
 0x416   :  { %v8870_v47 = vpack.c.bf16 %v5244_v26, %v5243_v37  ;;  %v1206_v40 = vpop.permute.xlu1 %1205 }
 0x417   :  { %v5046_v41 = vpop.f32.mrb[208].mxu0  ;;  %v6350_v13 = vadd.f32 %v8727_v56, %v1206_v40  ;;  %v9115_v40 = vld [vmem:[#allocation50_spill] sm:$0xff] }
 0x418   :  { %v6341_v49 = vadd.f32 %v6340_v42, %v5046_v41  ;;  %v5048_v50 = vpop.f32.mrb[209].mxu0 }
 0x419   :  { %v5049_v22 = vpop.f32.mrb[210].mxu0 }
 0x41a   :  { %v6343_v24 = vadd.f32 %v6342_v11, %v5049_v22  ;;  %v5051_v46 = vpop.f32.mrb[211].mxu0  ;;  %v5245_v30 = vmax.f32 %v6341_v49, 0.0  ;;  %v8885_v22 = vpop.permute.xlu1 %1295 }
 0x41c   :  { %v5246_v44 = vmax.f32 %v6343_v24, 0.0 }
 0x41e   :  { %v8877_v25 = vpack.c.bf16 %v5246_v44, %v5245_v30  ;;  %v6352_v44 = vadd.f32 %v8733_v52, %v8838_v1  ;;  %v1216_v29 = vpop.permute.xlu1 %1215  ;;  %v6358_v52 = vadd.f32 %v8750_v20, %v8740_v43 }
 0x41f   :  { %v5054_v36 = vpop.f32.mrb[212].mxu0 }
 0x420   :  { %v6345_v62 = vadd.f32 %v6344_v45, %v5054_v36  ;;  %v5056_v8 = vpop.f32.mrb[213].mxu0  ;;  %v6354_v36 = vadd.f32 %v8737_v58, %v1216_v29 }
 0x421   :  { %v5057_v27 = vpop.f32.mrb[214].mxu0 }
 0x422   :  { %v6347_v37 = vadd.f32 %v6346_v3, %v5057_v27  ;;  %v5059_v26 = vpop.f32.mrb[215].mxu0  ;;  %v5247_v42 = vmax.f32 %v6345_v62, 0.0 }
 0x424   :  { %v5248_v41 = vmax.f32 %v6347_v37, 0.0 }
 0x426   :  { %v8882_v11 = vpack.c.bf16 %v5248_v41, %v5247_v42  ;;  %v6356_v42 = vadd.f32 %v8746_v63, %v9115_v40  ;;  %v6362_v63 = vadd.f32 %v8763_v19, %v8766_v61 }
 0x427   :  { %v5062_v49 = vpop.f32.mrb[216].mxu0 }
 0x428   :  { %v6349_v32 = vadd.f32 %v6348_v15, %v5062_v49  ;;  %v5064_v50 = vpop.f32.mrb[217].mxu0 }
 0x429   :  { %v5065_v4 = vpop.f32.mrb[218].mxu0 }
 0x42a   :  { %v6351_v12 = vadd.f32 %v6350_v13, %v5065_v4  ;;  %v5067_v24 = vpop.f32.mrb[219].mxu0  ;;  %v5249_v46 = vmax.f32 %v6349_v32, 0.0 }
 0x42c   :  { %v5250_v30 = vmax.f32 %v6351_v12, 0.0  ;;  %v9116_v12 = vld [vmem:[#allocation15_spill] sm:$0xff] }
 0x42d   :  { %v6360_v24 = vadd.f32 %v8759_v34, %v9116_v12 }
 0x42e   :  { %v8889_v45 = vpack.c.bf16 %v5250_v30, %v5249_v46 }
 0x42f   :  { %v5070_v14 = vpop.f32.mrb[220].mxu0 }
 0x430   :  { %v6353_v3 = vadd.f32 %v6352_v44, %v5070_v14  ;;  %v5072_v56 = vpop.f32.mrb[221].mxu0 }
 0x431   :  { %v5073_v62 = vpop.f32.mrb[222].mxu0  ;;  %v9117_v56 = vld [vmem:[#allocation18_spill] sm:$0xff] }
 0x432   :  { %v6355_v8 = vadd.f32 %v6354_v36, %v5073_v62  ;;  %v5075_v27 = vpop.f32.mrb[223].mxu0  ;;  %v5251_v37 = vmax.f32 %v6353_v3, 0.0  ;;  %v6364_v62 = vadd.f32 %v8772_v2, %v9117_v56 }
 0x433   :  { %v6366_v27 = vadd.f32 %v8776_v28, %v8792_v53 }
 0x434   :  { %v5252_v26 = vmax.f32 %v6355_v8, 0.0 }
 0x436   :  { %v8894_v41 = vpack.c.bf16 %v5252_v26, %v5251_v37 }
 0x437   :  { %v5078_v15 = vpop.f32.mrb[224].mxu0 }
 0x438   :  { %v6357_v1 = vadd.f32 %v6356_v42, %v5078_v15  ;;  %v5080_v49 = vpop.f32.mrb[225].mxu0  ;;  %v6368_v15 = vadd.f32 %v8785_v10, %v8717_v6 }
 0x439   :  { %v5081_v13 = vpop.f32.mrb[226].mxu0  ;;  %v6370_v49 = vadd.f32 %v8789_v55, %v8818_v16  ;;  %v6372_v55 = vadd.f32 %v8798_v18, %v8742_v35  ;;  %v6378_v18 = vadd.f32 %v8815_v9, %v8866_v33 }
 0x43a   :  { %v6359_v58 = vadd.f32 %v6358_v52, %v5081_v13  ;;  %v5083_v32 = vpop.f32.mrb[227].mxu0  ;;  %v5253_v50 = vmax.f32 %v6357_v1, 0.0 }
 0x43c   :  { %v5254_v4 = vmax.f32 %v6359_v58, 0.0 }
 0x43e   :  { %v5326_v46 = vpack.c.bf16 %v5254_v4, %v5253_v50 }
 0x43f   :  { %v5086_v30 = vpop.f32.mrb[228].mxu0 }
 0x440   :  { %v6361_v44 = vadd.f32 %v6360_v24, %v5086_v30  ;;  %v5088_v29 = vpop.f32.mrb[229].mxu0  ;;  %6078 = vmatprep.subr.bf16.mxu1 %v5326_v46  ;;  %v6374_v30 = vadd.f32 %v8802_v17, %v8851_v54 }
 0x441   :  { %v5089_v14 = vpop.f32.mrb[230].mxu0  ;;  %6079 = vmatpush3.bf16.msra.mxu1 %v8842_v59 }
 0x442   :  { %v6363_v43 = vadd.f32 %v6362_v63, %v5089_v14  ;;  %v5091_v20 = vpop.f32.mrb[231].mxu0  ;;  %v5255_v36 = vmax.f32 %v6361_v44, 0.0 }
 0x443   :  { %v6376_v20 = vadd.f32 %v8811_v21, %v8768_v31  ;;  %v6382_v21 = vadd.f32 %v8828_v57, %v8873_v0 }
 0x444   :  { %v5256_v3 = vmax.f32 %v6363_v43, 0.0 }
 0x446   :  { %v5327_v8 = vpack.c.bf16 %v5256_v3, %v5255_v36 }
 0x447   :  { %v5094_v34 = vpop.f32.mrb[232].mxu0 }
 0x448   :  { %v6365_v37 = vadd.f32 %v6364_v62, %v5094_v34  ;;  %v5096_v19 = vpop.f32.mrb[233].mxu0  ;;  %6080 = vmatprep.subr.bf16.mxu1 %v5327_v8  ;;  %v6380_v34 = vadd.f32 %v8824_v23, %v8794_v38  ;;  %v6386_v23 = vadd.f32 %v8848_v48, %v8885_v22 }
 0x449   :  { %v5097_v61 = vpop.f32.mrb[234].mxu0  ;;  %6081 = vmatpush3.bf16.msra.mxu1 %v8855_v51 }
 0x44a   :  { %v6367_v26 = vadd.f32 %v6366_v27, %v5097_v61  ;;  %v5099_v59 = vpop.f32.mrb[235].mxu0  ;;  %v5257_v40 = vmax.f32 %v6365_v37, 0.0 }
 0x44b   :  { %v6384_v59 = vadd.f32 %v8844_v39, %v8820_v60 }
 0x44c   :  { %v5258_v42 = vmax.f32 %v6367_v26, 0.0 }
 0x44e   :  { %v5328_v52 = vpack.c.bf16 %v5258_v42, %v5257_v40 }
 0x44f   :  { %v5102_v2 = vpop.f32.mrb[236].mxu0  ;;  %v6050_v1 = vpop.f32.mrb[4].mxu1 }
 0x450   :  { %v6369_v28 = vadd.f32 %v6368_v15, %v5102_v2  ;;  %v5104_v53 = vpop.f32.mrb[237].mxu0  ;;  %v6051_v13 = vpop.f32.mrb[5].mxu1  ;;  %6082 = vmatprep.subr.bf16.mxu1 %v5328_v52 }
 0x451   :  { %v6052_v58 = vadd.f32 %v6051_v13, %v6050_v1  ;;  %v5105_v32 = vpop.f32.mrb[238].mxu0  ;;  %6083 = vmatpush3.bf16.msra.mxu1 %v8863_v7  ;;  %v6053_v51 = vpop.f32.mrb[6].mxu1 }
 0x452   :  { %v6371_v50 = vadd.f32 %v6370_v49, %v5105_v32  ;;  %v5107_v4 = vpop.f32.mrb[239].mxu0  ;;  %v6054_v12 = vpop.f32.mrb[7].mxu1  ;;  %v5259_v10 = vmax.f32 %v6369_v28, 0.0  ;;  %v9118_v49 = vld [vmem:[#allocation21_spill] sm:$0xff] }
 0x453   :  { %v8914_v6 = vadd.f32 %v6052_v58, %v8859_v5  ;;  %v5391_v28 = vcombine.high %v9118_v49, %v9118_v49 }
 0x454   :  { %v5260_v24 = vmax.f32 %v6371_v50, 0.0 }
 0x456   :  { %v5329_v16 = vpack.c.bf16 %v5260_v24, %v5259_v10 }
 0x457   :  { %v5110_v46 = vpop.f32.mrb[240].mxu0 }
 0x458   :  { %v6373_v63 = vadd.f32 %v6372_v55, %v5110_v46  ;;  %v5112_v44 = vpop.f32.mrb[241].mxu0  ;;  %6084 = vmatprep.subr.bf16.mxu1 %v5329_v16 }
 0x459   :  { %v5113_v7 = vpop.f32.mrb[242].mxu0  ;;  %6085 = vmatpush3.bf16.msra.mxu1 %v8870_v47 }
 0x45a   :  { %v6375_v29 = vadd.f32 %v6374_v30, %v5113_v7  ;;  %v5115_v14 = vpop.f32.mrb[243].mxu0  ;;  %v5261_v5 = vmax.f32 %v6373_v63, 0.0 }
 0x45c   :  { %v5262_v43 = vmax.f32 %v6375_v29, 0.0 }
 0x45e   :  { %v5330_v36 = vpack.c.bf16 %v5262_v43, %v5261_v5 }
 0x45f   :  { %v5118_v35 = vpop.f32.mrb[244].mxu0 }
 0x460   :  { %v6377_v3 = vadd.f32 %v6376_v20, %v5118_v35  ;;  %v5120_v17 = vpop.f32.mrb[245].mxu0  ;;  %6086 = vmatprep.subr.bf16.mxu1 %v5330_v36 }
 0x461   :  { %v5121_v54 = vpop.f32.mrb[246].mxu0  ;;  %6087 = vmatpush3.bf16.msra.mxu1 %v8877_v25 }
 0x462   :  { %v6379_v56 = vadd.f32 %v6378_v18, %v5121_v54  ;;  %v5123_v47 = vpop.f32.mrb[247].mxu0  ;;  %v5263_v62 = vmax.f32 %v6377_v3, 0.0 }
 0x464   :  { %v5264_v8 = vmax.f32 %v6379_v56, 0.0 }
 0x466   :  { %v5331_v27 = vpack.c.bf16 %v5264_v8, %v5263_v62 }
 0x467   :  { %v5126_v31 = vpop.f32.mrb[248].mxu0 }
 0x468   :  { %v6381_v37 = vadd.f32 %v6380_v34, %v5126_v31  ;;  %v5128_v9 = vpop.f32.mrb[249].mxu0  ;;  %6088 = vmatprep.subr.bf16.mxu1 %v5331_v27 }
 0x469   :  { %v5129_v33 = vpop.f32.mrb[250].mxu0  ;;  %6089 = vmatpush3.bf16.msra.mxu1 %v8882_v11 }
 0x46a   :  { %v6383_v19 = vadd.f32 %v6382_v21, %v5129_v33  ;;  %v5131_v25 = vpop.f32.mrb[251].mxu0  ;;  %v5265_v61 = vmax.f32 %v6381_v37, 0.0 }
 0x46c   :  { %v5266_v26 = vmax.f32 %v6383_v19, 0.0 }
 0x46e   :  { %v5332_v40 = vpack.c.bf16 %v5266_v26, %v5265_v61 }
 0x46f   :  { %v5134_v38 = vpop.f32.mrb[252].mxu0 }
 0x470   :  { %v6385_v42 = vadd.f32 %v6384_v59, %v5134_v38  ;;  %v5136_v57 = vpop.f32.mrb[253].mxu0  ;;  %6090 = vmatprep.subr.bf16.mxu1 %v5332_v40 }
 0x471   :  { %v5137_v0 = vpop.f32.mrb[254].mxu0  ;;  %6091 = vmatpush3.bf16.msra.mxu1 %v8889_v45 }
 0x472   :  { %v6387_v15 = vadd.f32 %v6386_v23, %v5137_v0  ;;  %v5139_v11 = vpop.f32.mrb[255].mxu0  ;;  %v5267_v52 = vmax.f32 %v6385_v42, 0.0 }
 0x474   :  { %v5268_v2 = vmax.f32 %v6387_v15, 0.0 }
 0x476   :  { %v5333_v1 = vpack.c.bf16 %v5268_v2, %v5267_v52 }
 0x478   :  { %6092 = vmatprep.subr.bf16.mxu1 %v5333_v1 }
 0x479   :  { %6093 = vmatpush3.bf16.msra.mxu1 %v8894_v41 }
 0x47c   :  { %5555 = vmatmul.mubr.bf16.vlgmr.msra.gmra.mrb[12].mxu1 %v5391_v28 }
 0x4cf   :  { %v6072_v60 = vpop.f32.mrb[8].mxu1 }
 0x4d0   :  { %v6073_v39 = vpop.f32.mrb[9].mxu1 }
 0x4d1   :  { %v6074_v48 = vadd.f32 %v6073_v39, %v6072_v60  ;;  %v6075_v22 = vpop.f32.mrb[10].mxu1 }
 0x4d2   :  { %v6076_v53 = vpop.f32.mrb[11].mxu1 }
 0x4d3   :  { %v5517_v13 = vadd.f32 %v6074_v48, %v8914_v6 }
 0x54f   :  { %v6094_v45 = vpop.f32.mrb[12].mxu1 }
 0x550   :  { %v6095_v58 = vpop.f32.mrb[13].mxu1 }
 0x551   :  { %v6096_v32 = vadd.f32 %v6095_v58, %v6094_v45  ;;  %v6097_v51 = vpop.f32.mrb[14].mxu1 }
 0x552   :  { %v6098_v50 = vpop.f32.mrb[15].mxu1 }
 0x553   :  { %v5557_v4 = vadd.f32 %v6096_v32, %v5517_v13 }
 0x555   :  { %5563 = vst.msk [vmem:[#allocation8] sm:$0x1] %vm5562_vm0, %v5557_v4 }
 0x556   :  { %7333 = shalt.err (!%p7330_p6)
}
 0x557   :  { %s7334_s30 = scalar_lea.hbm %s8957_s5, 16 }
 0x558   :  { %p7335_p7 = scmp.ne.s32.totalorder %s8957_s5, %s7334_s30  ;;  %p7338_p8 = scmp.lt.u32.totalorder %s7334_s30, %s8957_s5 }
 0x55a   :  { %p7340_p9 = pnand %p7338_p8, %p7335_p7 }
 0x55c   :  { %7343 = shalt.err (!%p7340_p9)
}
 0x55d   :  { %5573 = dma.vmem_to_hbm [thread:$0]  %s5571_s27, 16, %s8957_s5, [#allocation5]  }
 0x55e   :  { %7348 = dma.done.wait [#allocation5], 16  }
 0x55f   :  { %7349 = vsyncadd [#allocation5], 4294967280 }
 0x560   :  { %5577 = vsyncpa [#allocation4], 1 }
 0x561   :  { %5578 = vsyncpa [#allocation7], 1 }
 0x562   :  { %5579 = vsyncpa [#allocation5], 1 }

</bundles_post_ra>
